<compile_context>
chip_gen: v7x
topology: tpu7x:2x2x1
jax: 0.10.0
libtpu: 0.0.40
codegen_flags: <defaults>
</compile_context>

<pallas_src>
import functools

import jax
import jax.numpy as jnp
from jax.experimental import pallas as pl
from jax.experimental.pallas import tpu as pltpu

BN_EPS = 1e-5
INV_SQRT2 = 0.7071067811865476          # 1/sqrt(2), for exact GELU
INV_RES_SCALE = 1.0 / 1.414             # residual scaling as a multiply, not a divide

_VMEM = pl.BlockSpec(memory_space=pltpu.MemorySpace.VMEM)
# Working set is tiny (<1 MiB); 32 MiB scoped limit is safe on v5e/v6e/v7x alike.
_COMPILER_PARAMS = pltpu.CompilerParams(vmem_limit_bytes=32 * 1024 * 1024)


# -----------------------------------------------------------------------------
# In-kernel math helpers.  "Row layout": rows = (n, h) on sublanes, lanes = w*C.
# -----------------------------------------------------------------------------
def _erf(x):
    # Abramowitz & Stegun 7.1.26 rational approximation, |abs err| < 1.5e-7.
    a1, a2, a3, a4, a5 = (0.254829592, -0.284496736, 1.421413741,
                          -1.453152027, 1.061405429)
    p = 0.3275911
    sgn = jnp.where(x >= 0.0, 1.0, -1.0)
    z = jnp.abs(x)
    d = 1.0 + p * z
    # EUP approximate reciprocal (frees VALU issue slots in the hottest per-element
    # chain) + one Newton-Raphson step to restore ~f32 accuracy.
    t = pl.reciprocal(d, approx=True)
    t = t * (2.0 - d * t)
    poly = ((((a5 * t + a4) * t + a3) * t + a2) * t + a1) * t
    return sgn * (1.0 - poly * jnp.exp(-z * z))


def _gelu_exact(x):
    # PyTorch nn.GELU() default: 0.5 * x * (1 + erf(x / sqrt(2)))
    return 0.5 * x * (1.0 + _erf(x * INV_SQRT2))


def _conv_rows(x_rows, a_ref, bias_row, n, h):
    """3x3 'same' conv in row layout as 3 accumulated matmuls (one per vertical tap).

    x_rows:   (n, h, W*Cin)     activation (any float dtype; cast to bf16 for the MXU)
    a_ref:    Ref (3, W*Cin, W*Cout)  banded row operators (horizontal taps + W padding baked in)
    bias_row: (1, W*Cout) f32   conv bias tiled over w
    returns   (n*h, W*Cout) float32
    """
    wc_in = x_rows.shape[-1]
    zrow = jnp.zeros((n, 1, wc_in), jnp.bfloat16)
    xp = jnp.concatenate([zrow, x_rows.astype(jnp.bfloat16), zrow], axis=1)  # (n, h+2, wc_in)
    y = jnp.dot(xp[:, 0:h, :].reshape(n * h, wc_in), a_ref[0],
                preferred_element_type=jnp.float32)
    y = y + jnp.dot(xp[:, 1:h + 1, :].reshape(n * h, wc_in), a_ref[1],
                    preferred_element_type=jnp.float32)
    y = y + jnp.dot(xp[:, 2:h + 2, :].reshape(n * h, wc_in), a_ref[2],
                    preferred_element_type=jnp.float32)
    return y + bias_row


def _bn_gelu(y, gamma_c, beta_c, sel, sel_t, inv_count):
    """Training-mode BatchNorm2d (one-pass batch stats, biased var) + exact GELU.

    y: (M, W*C) f32.  gamma_c/beta_c: (1, C).  sel: (W*C, C), sel_t: (C, W*C).
    Two M=2 MXU pushes (stats reduce, scale/shift broadcast); gamma/beta folded.
    """
    row_sum = jnp.sum(y, axis=0, keepdims=True)                          # (1, W*C)
    row_sq = jnp.sum(y * y, axis=0, keepdims=True)                       # (1, W*C)
    stats = jnp.concatenate([row_sum, row_sq], axis=0)                   # (2, W*C)
    ch = jnp.dot(stats, sel, preferred_element_type=jnp.float32) * inv_count   # (2, C)
    mean_c = ch[0:1, :]
    var_c = ch[1:2, :] - mean_c * mean_c                                 # biased variance
    scale_c = gamma_c * jax.lax.rsqrt(var_c + BN_EPS)
    shift_c = beta_c - mean_c * scale_c
    ss = jnp.concatenate([scale_c, shift_c], axis=0)                     # (2, C)
    ss_row = jnp.dot(ss, sel_t, preferred_element_type=jnp.float32)      # (2, W*C)
    return _gelu_exact(y * ss_row[0:1, :] + ss_row[1:2, :])


def _residual_block(x_rows, a1_ref, b1, g1, be1, a2_ref, b2, g2, be2,
                    sel, sel_t, n, h, inv_count):
    """ResidualConvBlock(is_res=True, same_channels=True) in row layout."""
    wc = x_rows.shape[-1]
    y1 = _conv_rows(x_rows, a1_ref, b1, n, h)
    x1 = _bn_gelu(y1, g1, be1, sel, sel_t, inv_count).reshape(n, h, wc)
    y2 = _conv_rows(x1, a2_ref, b2, n, h)
    x2 = _bn_gelu(y2, g2, be2, sel, sel_t, inv_count).reshape(n, h, wc)
    return (x_rows + x2) * INV_RES_SCALE


# -----------------------------------------------------------------------------
# The single fused Pallas kernel
# -----------------------------------------------------------------------------
def _unet_fused_kernel(x_ref, t_ref, wt_ref, bt_ref,
                       a0_ref, b0_ref,
                       a1a_ref, b1a_ref, g1a_ref, be1a_ref,
                       a1b_ref, b1b_ref, g1b_ref, be1b_ref,
                       a2a_ref, b2a_ref, g2a_ref, be2a_ref,
                       a2b_ref, b2b_ref, g2b_ref, be2b_ref,
                       sel_ref, selt_ref, sv_ref, bfull_ref, b4_ref,
                       out_ref, *, N, H, W, cout):
    """conv3x3 -> +time_emb -> ResidualConvBlock x2 -> Conv2d(k=4,s=2,p=1), fully fused."""
    wc = W * cout
    Ho = H // 2
    half = (N * Ho) // 2
    inv_count = 1.0 / float(N * H * W)

    # -- conv (3x3, pad 1): in_channels -> out_channels -----------------------
    h = _conv_rows(x_ref[...], a0_ref, b0_ref[...], N, H)                # (N*H, wc) f32

    # -- time embedding: ReLU(Linear(t)), broadcast over (H, W) ---------------
    temb = jnp.maximum(
        jnp.dot(t_ref[...], wt_ref[...], preferred_element_type=jnp.float32)
        + bt_ref[...], 0.0)                                              # (N, cout)
    temb_row = jnp.dot(temb, selt_ref[...],
                       preferred_element_type=jnp.float32)               # (N, wc)
    h = h.reshape(N, H, wc) + temb_row[:, None, :]

    # -- two ResidualConvBlocks (is_res=True, same_channels=True) -------------
    sel, sel_t = sel_ref[...], selt_ref[...]
    h = _residual_block(h, a1a_ref, b1a_ref[...], g1a_ref[...], be1a_ref[...],
                        a1b_ref, b1b_ref[...], g1b_ref[...], be1b_ref[...],
                        sel, sel_t, N, H, inv_count)
    h = _residual_block(h, a2a_ref, b2a_ref[...], g2a_ref[...], be2a_ref[...],
                        a2b_ref, b2b_ref[...], g2b_ref[...], be2b_ref[...],
                        sel, sel_t, N, H, inv_count)

    # -- transform: Conv2d(cout, cout, 4, 2, 1), fused in-kernel ---------------
    # The 4 vertical taps (input rows 2*ho-1 .. 2*ho+2, zero at the boundary) are
    # gathered with tiny precomputed 0/1 selector matmuls (sv_ref[d]) which also
    # reorder output rows as [all even ho | all odd ho] so the store is packed
    # into a lane-dense (N*Ho/2, 2*Wo*cout) slab.
    hb = h.reshape(N * H, wc).astype(jnp.bfloat16)
    cols = jnp.concatenate(
        [jnp.dot(sv_ref[d], hb,
                 preferred_element_type=jnp.float32).astype(jnp.bfloat16)
         for d in range(4)], axis=-1)                                    # (N*Ho, 4*wc)
    y = jnp.dot(cols, bfull_ref[...],
                preferred_element_type=jnp.float32) + b4_ref[...]        # (N*Ho, Wo*cout)
    out_ref[...] = jnp.concatenate([y[:half, :], y[half:, :]],
                                   axis=-1).astype(out_ref.dtype)        # (N*Ho/2, 2*Wo*cout)


# -----------------------------------------------------------------------------
# Wrapper-side precomputation of the banded "row operator" / selector matrices.
# -----------------------------------------------------------------------------
def _band_selector(wi, w_in):
    """(w_in, len(wi)) one-hot columns; out-of-range wi give all-zero columns."""
    return (jnp.arange(w_in)[:, None] == wi[None, :]).astype(jnp.float32)


def _row_operator_3x3(w, W):
    """w: (3, 3, cin, cout) -> (3, W*cin, W*cout) banded operators (stride 1, pad 1),
    one block per vertical tap (so the kernel accumulates 3 matmuls, no lane concat)."""
    _, _, cin, cout = w.shape
    wo = jnp.arange(W)
    blocks = []
    for dh in range(3):
        a = jnp.zeros((W * cin, W * cout), jnp.float32)
        for dw in range(3):
            sel = _band_selector(wo + dw - 1, W)                          # (W, W)
            a = a + jnp.einsum('pq,ik->piqk', sel, w[dh, dw]).reshape(W * cin, W * cout)
        blocks.append(a)
    return jnp.stack(blocks, axis=0)


def _row_operator_4x4_s2(w, W):
    """w: (4, 4, cin, cout) -> (4*W*cin, (W//2)*cout) banded operator (stride 2, pad 1)."""
    _, _, cin, cout = w.shape
    wout = W // 2
    wo = jnp.arange(wout)
    blocks = []
    for dh in range(4):
        b = jnp.zeros((W * cin, wout * cout), jnp.float32)
        for dw in range(4):
            sel = _band_selector(2 * wo - 1 + dw, W)                      # (W, W//2)
            b = b + jnp.einsum('pq,ik->piqk', sel, w[dh, dw]).reshape(W * cin, wout * cout)
        blocks.append(b)
    return jnp.concatenate(blocks, axis=0)


def _vert_selectors(N, H):
    """(4, N*Ho, N*H) 0/1 selectors gathering the 4 vertical taps (rows 2*ho-1+d) of the
    k=4/s=2 transform, with output rows ordered [all even ho | all odd ho] (n-major) so
    the kernel can pack two output rows per 128-lane store row."""
    Ho = H // 2
    r = jnp.arange(N * Ho)
    parity = r // (N * Ho // 2)                 # 0: even output rows, 1: odd
    idx = r % (N * Ho // 2)
    n_idx = idx // (Ho // 2)
    ho = 2 * (idx % (Ho // 2)) + parity
    cols = jnp.arange(N * H)[None, :]
    mats = []
    for d in range(4):
        src = 2 * ho - 1 + d                    # input row (within batch), pad=1
        valid = (src >= 0) & (src < H)
        tgt = n_idx * H + jnp.clip(src, 0, H - 1)
        mats.append(((cols == tgt[:, None]) & valid[:, None]).astype(jnp.float32))
    return jnp.stack(mats, axis=0)


# -----------------------------------------------------------------------------
# Public forward (UNetBlock, up=False)
# -----------------------------------------------------------------------------
@jax.jit
def unet_block_forward(x_nchw, t, params):
    """UNetBlock(up=False) forward.  x_nchw: (N, Cin, H, W), t: (N, time_emb_dim).

    Returns (N, Cout, H//2, W//2) in NCHW, matching the PyTorch module.
    """
    (w0, b0, wt, bt,
     w1a, b1a, g1a, be1a, w1b, b1b, g1b, be1b,
     w2a, b2a, g2a, be2a, w2b, b2b, g2b, be2b,
     w4, b4) = params

    N, cin, H, W = x_nchw.shape
    cout = w0.shape[-1]
    # H % 4 == 0: downsampled height even so two output rows pack per 128-lane store row.
    assert H % 4 == 0 and W % 2 == 0, (H, W)
    wc = W * cout
    Ho, Wo = H // 2, W // 2
    woc = Wo * cout

    # ---- layout glue (XLA): NCHW -> row layout (N, H, W*Cin); bf16 MXU operand ----
    x_rows = (jnp.transpose(x_nchw, (0, 2, 3, 1))
              .reshape(N, H, W * cin).astype(jnp.bfloat16))

    # ---- precompute banded row operators / selectors (bf16 MXU operands) ----------
    a0 = _row_operator_3x3(w0, W).astype(jnp.bfloat16)
    a1a = _row_operator_3x3(w1a, W).astype(jnp.bfloat16)
    a1b = _row_operator_3x3(w1b, W).astype(jnp.bfloat16)
    a2a = _row_operator_3x3(w2a, W).astype(jnp.bfloat16)
    a2b = _row_operator_3x3(w2b, W).astype(jnp.bfloat16)
    bfull = _row_operator_4x4_s2(w4, W).astype(jnp.bfloat16)
    svert = _vert_selectors(N, H).astype(jnp.bfloat16)                   # 0/1, exact in bf16

    def tile_row(v, reps):  # (C,) -> (1, reps*C), lane index = w*C + c
        return jnp.tile(v, reps)[None, :].astype(jnp.float32)

    def chan_row(v):        # (C,) -> (1, C)
        return v[None, :].astype(jnp.float32)

    b0_r = tile_row(b0, W)
    b1a_r, b1b_r = tile_row(b1a, W), tile_row(b1b, W)
    b2a_r, b2b_r = tile_row(b2a, W), tile_row(b2b, W)
    b4_r = tile_row(b4, Wo)
    g1a_r, be1a_r = chan_row(g1a), chan_row(be1a)
    g1b_r, be1b_r = chan_row(g1b), chan_row(be1b)
    g2a_r, be2a_r = chan_row(g2a), chan_row(be2a)
    g2b_r, be2b_r = chan_row(g2b), chan_row(be2b)
    bt_r = chan_row(bt)

    sel = jnp.tile(jnp.eye(cout, dtype=jnp.float32), (W, 1))             # (W*C, C)
    sel_t = sel.T                                                        # (C, W*C)

    # ---- ONE fused kernel: conv -> +time_emb -> ResBlock x2 -> downsample ----------
    kern = functools.partial(_unet_fused_kernel, N=N, H=H, W=W, cout=cout)
    out2 = pl.pallas_call(
        kern,
        out_shape=jax.ShapeDtypeStruct((N * Ho // 2, 2 * woc), jnp.float32),
        in_specs=[_VMEM] * 27,
        out_specs=_VMEM,
        compiler_params=_COMPILER_PARAMS,
    )(x_rows, t, wt, bt_r,
      a0, b0_r,
      a1a, b1a_r, g1a_r, be1a_r, a1b, b1b_r, g1b_r, be1b_r,
      a2a, b2a_r, g2a_r, be2a_r, a2b, b2b_r, g2b_r, be2b_r,
      sel, sel_t, svert, bfull, b4_r)

    # ---- layout glue: unpack (N, Ho/2, [even|odd], Wo, C) -> NCHW -------------------
    out_nhwc = out2.reshape(N, Ho // 2, 2, Wo, cout).reshape(N, Ho, Wo, cout)
    return jnp.transpose(out_nhwc, (0, 3, 1, 2))


# -----------------------------------------------------------------------------
# Pure-JAX (XLA, HIGHEST precision) reference, used as an in-script correctness check.
# -----------------------------------------------------------------------------
def _reference_forward(x, t, params):
    (w0, b0, wt, bt,
     w1a, b1a, g1a, be1a, w1b, b1b, g1b, be1b,
     w2a, b2a, g2a, be2a, w2b, b2b, g2b, be2b,
     w4, b4) = params
    hi = jax.lax.Precision.HIGHEST

    def conv(x, w, b, stride):
        w_oihw = jnp.transpose(w, (3, 2, 0, 1))
        y = jax.lax.conv_general_dilated(
            x, w_oihw, window_strides=(stride, stride),
            padding=((1, 1), (1, 1)),
            dimension_numbers=('NCHW', 'OIHW', 'NCHW'), precision=hi)
        return y + b[None, :, None, None]

    def bn(x, g, be):
        mean = jnp.mean(x, axis=(0, 2, 3), keepdims=True)
        var = jnp.mean((x - mean) ** 2, axis=(0, 2, 3), keepdims=True)
        xh = (x - mean) / jnp.sqrt(var + BN_EPS)
        return xh * g[None, :, None, None] + be[None, :, None, None]

    def resblock(x, wa, ba, ga, bea, wb, bb, gb, beb):
        x1 = jax.nn.gelu(bn(conv(x, wa, ba, 1), ga, bea), approximate=False)
        x2 = jax.nn.gelu(bn(conv(x1, wb, bb, 1), gb, beb), approximate=False)
        return (x + x2) / 1.414

    h = conv(x, w0, b0, 1)
    temb = jax.nn.relu(jnp.dot(t, wt, precision=hi) + bt)
    h = h + temb[:, :, None, None]
    h = resblock(h, w1a, b1a, g1a, be1a, w1b, b1b, g1b, be1b)
    h = resblock(h, w2a, b2a, g2a, be2a, w2b, b2b, g2b, be2b)
    return conv(h, w4, b4, 2)


if __name__ == "__main__":
    # UNetBlock(in_channels=4, out_channels=8, time_emb_dim=32, up=False)
    # out_channels=8 makes the working lane width W*C = 16*8 = 128 (fully lane-dense).
    N, C_IN, C_OUT, H, W, T_DIM = 2, 4, 8, 16, 16, 32

    key = jax.random.PRNGKey(0)
    ks = jax.random.split(key, 10)

    def conv_init(k, kh, kw, cin, cout):
        bound = 1.0 / float(cin * kh * kw) ** 0.5
        kw_, kb_ = jax.random.split(k)
        w = jax.random.uniform(kw_, (kh, kw, cin, cout), jnp.float32, -bound, bound)
        b = jax.random.uniform(kb_, (cout,), jnp.float32, -bound, bound)
        return w, b

    x = jax.random.normal(ks[0], (N, C_IN, H, W), jnp.float32)
    t = jax.random.normal(ks[1], (N, T_DIM), jnp.float32)

    w0, b0 = conv_init(ks[2], 3, 3, C_IN, C_OUT)
    w1a, b1a = conv_init(ks[3], 3, 3, C_OUT, C_OUT)
    w1b, b1b = conv_init(ks[4], 3, 3, C_OUT, C_OUT)
    w2a, b2a = conv_init(ks[5], 3, 3, C_OUT, C_OUT)
    w2b, b2b = conv_init(ks[6], 3, 3, C_OUT, C_OUT)
    w4, b4 = conv_init(ks[7], 4, 4, C_OUT, C_OUT)

    tb = 1.0 / float(T_DIM) ** 0.5
    wt = jax.random.uniform(ks[8], (T_DIM, C_OUT), jnp.float32, -tb, tb)
    bt = jax.random.uniform(ks[9], (C_OUT,), jnp.float32, -tb, tb)

    ones = jnp.ones((C_OUT,), jnp.float32)    # BatchNorm gamma (default init)
    zeros = jnp.zeros((C_OUT,), jnp.float32)  # BatchNorm beta  (default init)

    params = (w0, b0, wt, bt,
              w1a, b1a, ones, zeros, w1b, b1b, ones, zeros,
              w2a, b2a, ones, zeros, w2b, b2b, ones, zeros,
              w4, b4)

    out = unet_block_forward(x, t, params)
    out = jax.block_until_ready(out)

    assert out.shape == (N, C_OUT, H // 2, W // 2), out.shape
    assert bool(jnp.all(jnp.isfinite(out)))

    # Correctness check vs. an XLA reference at HIGHEST precision.  Error budget is
    # dominated by the intentional bf16 MXU operands across 6 convs (~0.5-1% rel RMS);
    # tolerance tightened from the previous 5e-2 to 2.5e-2 (~3x headroom).
    ref = _reference_forward(x, t, params)
    rel_rms = float(jnp.sqrt(jnp.mean((out - ref) ** 2) /
                             (jnp.mean(ref ** 2) + 1e-12)))
    assert rel_rms < 2.5e-2, rel_rms

    print("KERNEL_OK")
</pallas_src>

<mosaic_0001>
module attributes {stable_mosaic.version = 11 : i64} {
  func.func @_unet_fused_kernel(%arg0: memref<2x16x64xbf16, #tpu.memory_space<vmem>>, %arg1: memref<2x32xf32, #tpu.memory_space<vmem>>, %arg2: memref<32x8xf32, #tpu.memory_space<vmem>>, %arg3: memref<1x8xf32, #tpu.memory_space<vmem>>, %arg4: memref<3x64x128xbf16, #tpu.memory_space<vmem>>, %arg5: memref<1x128xf32, #tpu.memory_space<vmem>>, %arg6: memref<3x128x128xbf16, #tpu.memory_space<vmem>>, %arg7: memref<1x128xf32, #tpu.memory_space<vmem>>, %arg8: memref<1x8xf32, #tpu.memory_space<vmem>>, %arg9: memref<1x8xf32, #tpu.memory_space<vmem>>, %arg10: memref<3x128x128xbf16, #tpu.memory_space<vmem>>, %arg11: memref<1x128xf32, #tpu.memory_space<vmem>>, %arg12: memref<1x8xf32, #tpu.memory_space<vmem>>, %arg13: memref<1x8xf32, #tpu.memory_space<vmem>>, %arg14: memref<3x128x128xbf16, #tpu.memory_space<vmem>>, %arg15: memref<1x128xf32, #tpu.memory_space<vmem>>, %arg16: memref<1x8xf32, #tpu.memory_space<vmem>>, %arg17: memref<1x8xf32, #tpu.memory_space<vmem>>, %arg18: memref<3x128x128xbf16, #tpu.memory_space<vmem>>, %arg19: memref<1x128xf32, #tpu.memory_space<vmem>>, %arg20: memref<1x8xf32, #tpu.memory_space<vmem>>, %arg21: memref<1x8xf32, #tpu.memory_space<vmem>>, %arg22: memref<128x8xf32, #tpu.memory_space<vmem>>, %arg23: memref<8x128xf32, #tpu.memory_space<vmem>>, %arg24: memref<4x16x32xbf16, #tpu.memory_space<vmem>>, %arg25: memref<512x64xbf16, #tpu.memory_space<vmem>>, %arg26: memref<1x64xf32, #tpu.memory_space<vmem>>, %arg27: memref<8x128xf32, #tpu.memory_space<vmem>>) attributes {dimension_semantics = [], scalar_prefetch = 0 : i64, scratch_operands = 0 : i64, tpu.core_type = #tpu.core_type<tc>} {
    %c0 = arith.constant 0 : index
    %c0_0 = arith.constant 0 : index
    %c0_1 = arith.constant 0 : index
    %0 = vector.load %arg0[%c0, %c0_0, %c0_1] : memref<2x16x64xbf16, #tpu.memory_space<vmem>>, vector<2x16x64xbf16>
    %c0_2 = arith.constant 0 : index
    %c0_3 = arith.constant 0 : index
    %1 = vector.load %arg5[%c0_2, %c0_3] : memref<1x128xf32, #tpu.memory_space<vmem>>, vector<1x128xf32>
    %cst = arith.constant 0.000000e+00 : bf16
    %2 = vector.broadcast %cst : bf16 to vector<2x1x64xbf16>
    %3 = tpu.concatenate %2, %0, %2 in 1 : vector<2x1x64xbf16>, vector<2x16x64xbf16>, vector<2x1x64xbf16> -> vector<2x18x64xbf16>
    %4 = vector.extract_strided_slice %3 {offsets = [0, 0, 0], sizes = [2, 16, 64], strides = [1, 1, 1]} : vector<2x18x64xbf16> to vector<2x16x64xbf16>
    %5 = vector.shape_cast %4 : vector<2x16x64xbf16> to vector<32x64xbf16>
    %c0_4 = arith.constant 0 : index
    %c0_5 = arith.constant 0 : index
    %c0_6 = arith.constant 0 : index
    %6 = vector.load %arg4[%c0_4, %c0_5, %c0_6] : memref<3x64x128xbf16, #tpu.memory_space<vmem>>, vector<1x64x128xbf16>
    %7 = vector.shape_cast %6 : vector<1x64x128xbf16> to vector<64x128xbf16>
    %cst_7 = arith.constant dense<0.000000e+00> : vector<32x128xf32>
    %8 = tpu.matmul %5, %7, %cst_7 {dimension_numbers = #tpu.dot_dimension_numbers<[1], [0], [0], [1], [0, 0, 1, 1], [], []>} : vector<32x64xbf16>, vector<64x128xbf16>, vector<32x128xf32> -> vector<32x128xf32>
    %9 = vector.extract_strided_slice %3 {offsets = [0, 1, 0], sizes = [2, 16, 64], strides = [1, 1, 1]} : vector<2x18x64xbf16> to vector<2x16x64xbf16>
    %10 = vector.shape_cast %9 : vector<2x16x64xbf16> to vector<32x64xbf16>
    %c1 = arith.constant 1 : index
    %c0_8 = arith.constant 0 : index
    %c0_9 = arith.constant 0 : index
    %11 = vector.load %arg4[%c1, %c0_8, %c0_9] : memref<3x64x128xbf16, #tpu.memory_space<vmem>>, vector<1x64x128xbf16>
    %12 = vector.shape_cast %11 : vector<1x64x128xbf16> to vector<64x128xbf16>
    %cst_10 = arith.constant dense<0.000000e+00> : vector<32x128xf32>
    %13 = tpu.matmul %10, %12, %cst_10 {dimension_numbers = #tpu.dot_dimension_numbers<[1], [0], [0], [1], [0, 0, 1, 1], [], []>} : vector<32x64xbf16>, vector<64x128xbf16>, vector<32x128xf32> -> vector<32x128xf32>
    %14 = arith.addf %8, %13 : vector<32x128xf32>
    %15 = vector.extract_strided_slice %3 {offsets = [0, 2, 0], sizes = [2, 16, 64], strides = [1, 1, 1]} : vector<2x18x64xbf16> to vector<2x16x64xbf16>
    %16 = vector.shape_cast %15 : vector<2x16x64xbf16> to vector<32x64xbf16>
    %c2 = arith.constant 2 : index
    %c0_11 = arith.constant 0 : index
    %c0_12 = arith.constant 0 : index
    %17 = vector.load %arg4[%c2, %c0_11, %c0_12] : memref<3x64x128xbf16, #tpu.memory_space<vmem>>, vector<1x64x128xbf16>
    %18 = vector.shape_cast %17 : vector<1x64x128xbf16> to vector<64x128xbf16>
    %cst_13 = arith.constant dense<0.000000e+00> : vector<32x128xf32>
    %19 = tpu.matmul %16, %18, %cst_13 {dimension_numbers = #tpu.dot_dimension_numbers<[1], [0], [0], [1], [0, 0, 1, 1], [], []>} : vector<32x64xbf16>, vector<64x128xbf16>, vector<32x128xf32> -> vector<32x128xf32>
    %20 = arith.addf %14, %19 : vector<32x128xf32>
    %21 = vector.broadcast %1 : vector<1x128xf32> to vector<32x128xf32>
    %22 = arith.addf %20, %21 : vector<32x128xf32>
    %c0_14 = arith.constant 0 : index
    %c0_15 = arith.constant 0 : index
    %23 = vector.load %arg1[%c0_14, %c0_15] : memref<2x32xf32, #tpu.memory_space<vmem>>, vector<2x32xf32>
    %c0_16 = arith.constant 0 : index
    %c0_17 = arith.constant 0 : index
    %24 = vector.load %arg2[%c0_16, %c0_17] : memref<32x8xf32, #tpu.memory_space<vmem>>, vector<32x8xf32>
    %cst_18 = arith.constant dense<0.000000e+00> : vector<2x8xf32>
    %25 = tpu.matmul %23, %24, %cst_18 {dimension_numbers = #tpu.dot_dimension_numbers<[1], [0], [0], [1], [0, 0, 1, 1], [], []>} : vector<2x32xf32>, vector<32x8xf32>, vector<2x8xf32> -> vector<2x8xf32>
    %c0_19 = arith.constant 0 : index
    %c0_20 = arith.constant 0 : index
    %26 = vector.load %arg3[%c0_19, %c0_20] : memref<1x8xf32, #tpu.memory_space<vmem>>, vector<1x8xf32>
    %27 = vector.broadcast %26 : vector<1x8xf32> to vector<2x8xf32>
    %28 = arith.addf %25, %27 : vector<2x8xf32>
    %cst_21 = arith.constant 0.000000e+00 : f32
    %29 = vector.broadcast %cst_21 : f32 to vector<2x8xf32>
    %30 = arith.maximumf %28, %29 : vector<2x8xf32>
    %c0_22 = arith.constant 0 : index
    %c0_23 = arith.constant 0 : index
    %31 = vector.load %arg23[%c0_22, %c0_23] : memref<8x128xf32, #tpu.memory_space<vmem>>, vector<8x128xf32>
    %cst_24 = arith.constant dense<0.000000e+00> : vector<2x128xf32>
    %32 = tpu.matmul %30, %31, %cst_24 {dimension_numbers = #tpu.dot_dimension_numbers<[1], [0], [0], [1], [0, 0, 1, 1], [], []>} : vector<2x8xf32>, vector<8x128xf32>, vector<2x128xf32> -> vector<2x128xf32>
    %33 = vector.shape_cast %22 : vector<32x128xf32> to vector<2x16x128xf32>
    %34 = vector.shape_cast %32 : vector<2x128xf32> to vector<2x1x128xf32>
    %35 = vector.broadcast %34 : vector<2x1x128xf32> to vector<2x16x128xf32>
    %36 = arith.addf %33, %35 : vector<2x16x128xf32>
    %c0_25 = arith.constant 0 : index
    %c0_26 = arith.constant 0 : index
    %37 = vector.load %arg22[%c0_25, %c0_26] : memref<128x8xf32, #tpu.memory_space<vmem>>, vector<128x8xf32>
    %c0_27 = arith.constant 0 : index
    %c0_28 = arith.constant 0 : index
    %38 = vector.load %arg23[%c0_27, %c0_28] : memref<8x128xf32, #tpu.memory_space<vmem>>, vector<8x128xf32>
    %c0_29 = arith.constant 0 : index
    %c0_30 = arith.constant 0 : index
    %39 = vector.load %arg7[%c0_29, %c0_30] : memref<1x128xf32, #tpu.memory_space<vmem>>, vector<1x128xf32>
    %c0_31 = arith.constant 0 : index
    %c0_32 = arith.constant 0 : index
    %40 = vector.load %arg8[%c0_31, %c0_32] : memref<1x8xf32, #tpu.memory_space<vmem>>, vector<1x8xf32>
    %c0_33 = arith.constant 0 : index
    %c0_34 = arith.constant 0 : index
    %41 = vector.load %arg9[%c0_33, %c0_34] : memref<1x8xf32, #tpu.memory_space<vmem>>, vector<1x8xf32>
    %c0_35 = arith.constant 0 : index
    %c0_36 = arith.constant 0 : index
    %42 = vector.load %arg11[%c0_35, %c0_36] : memref<1x128xf32, #tpu.memory_space<vmem>>, vector<1x128xf32>
    %c0_37 = arith.constant 0 : index
    %c0_38 = arith.constant 0 : index
    %43 = vector.load %arg12[%c0_37, %c0_38] : memref<1x8xf32, #tpu.memory_space<vmem>>, vector<1x8xf32>
    %c0_39 = arith.constant 0 : index
    %c0_40 = arith.constant 0 : index
    %44 = vector.load %arg13[%c0_39, %c0_40] : memref<1x8xf32, #tpu.memory_space<vmem>>, vector<1x8xf32>
    %cst_41 = arith.constant 0.000000e+00 : bf16
    %45 = vector.broadcast %cst_41 : bf16 to vector<2x1x128xbf16>
    %46 = arith.truncf %36 : vector<2x16x128xf32> to vector<2x16x128xbf16>
    %47 = tpu.concatenate %45, %46, %45 in 1 : vector<2x1x128xbf16>, vector<2x16x128xbf16>, vector<2x1x128xbf16> -> vector<2x18x128xbf16>
    %48 = vector.extract_strided_slice %47 {offsets = [0, 0, 0], sizes = [2, 16, 128], strides = [1, 1, 1]} : vector<2x18x128xbf16> to vector<2x16x128xbf16>
    %49 = vector.shape_cast %48 : vector<2x16x128xbf16> to vector<32x128xbf16>
    %c0_42 = arith.constant 0 : index
    %c0_43 = arith.constant 0 : index
    %c0_44 = arith.constant 0 : index
    %50 = vector.load %arg6[%c0_42, %c0_43, %c0_44] : memref<3x128x128xbf16, #tpu.memory_space<vmem>>, vector<1x128x128xbf16>
    %51 = vector.shape_cast %50 : vector<1x128x128xbf16> to vector<128x128xbf16>
    %cst_45 = arith.constant dense<0.000000e+00> : vector<32x128xf32>
    %52 = tpu.matmul %49, %51, %cst_45 {dimension_numbers = #tpu.dot_dimension_numbers<[1], [0], [0], [1], [0, 0, 1, 1], [], []>} : vector<32x128xbf16>, vector<128x128xbf16>, vector<32x128xf32> -> vector<32x128xf32>
    %53 = vector.extract_strided_slice %47 {offsets = [0, 1, 0], sizes = [2, 16, 128], strides = [1, 1, 1]} : vector<2x18x128xbf16> to vector<2x16x128xbf16>
    %54 = vector.shape_cast %53 : vector<2x16x128xbf16> to vector<32x128xbf16>
    %c1_46 = arith.constant 1 : index
    %c0_47 = arith.constant 0 : index
    %c0_48 = arith.constant 0 : index
    %55 = vector.load %arg6[%c1_46, %c0_47, %c0_48] : memref<3x128x128xbf16, #tpu.memory_space<vmem>>, vector<1x128x128xbf16>
    %56 = vector.shape_cast %55 : vector<1x128x128xbf16> to vector<128x128xbf16>
    %cst_49 = arith.constant dense<0.000000e+00> : vector<32x128xf32>
    %57 = tpu.matmul %54, %56, %cst_49 {dimension_numbers = #tpu.dot_dimension_numbers<[1], [0], [0], [1], [0, 0, 1, 1], [], []>} : vector<32x128xbf16>, vector<128x128xbf16>, vector<32x128xf32> -> vector<32x128xf32>
    %58 = arith.addf %52, %57 : vector<32x128xf32>
    %59 = vector.extract_strided_slice %47 {offsets = [0, 2, 0], sizes = [2, 16, 128], strides = [1, 1, 1]} : vector<2x18x128xbf16> to vector<2x16x128xbf16>
    %60 = vector.shape_cast %59 : vector<2x16x128xbf16> to vector<32x128xbf16>
    %c2_50 = arith.constant 2 : index
    %c0_51 = arith.constant 0 : index
    %c0_52 = arith.constant 0 : index
    %61 = vector.load %arg6[%c2_50, %c0_51, %c0_52] : memref<3x128x128xbf16, #tpu.memory_space<vmem>>, vector<1x128x128xbf16>
    %62 = vector.shape_cast %61 : vector<1x128x128xbf16> to vector<128x128xbf16>
    %cst_53 = arith.constant dense<0.000000e+00> : vector<32x128xf32>
    %63 = tpu.matmul %60, %62, %cst_53 {dimension_numbers = #tpu.dot_dimension_numbers<[1], [0], [0], [1], [0, 0, 1, 1], [], []>} : vector<32x128xbf16>, vector<128x128xbf16>, vector<32x128xf32> -> vector<32x128xf32>
    %64 = arith.addf %58, %63 : vector<32x128xf32>
    %65 = vector.broadcast %39 : vector<1x128xf32> to vector<32x128xf32>
    %66 = arith.addf %64, %65 : vector<32x128xf32>
    %cst_54 = arith.constant dense<0.000000e+00> : vector<128xf32>
    %67 = vector.multi_reduction <add>, %66, %cst_54 [0] : vector<32x128xf32> to vector<128xf32>
    %68 = vector.shape_cast %67 : vector<128xf32> to vector<1x128xf32>
    %69 = arith.mulf %66, %66 : vector<32x128xf32>
    %cst_55 = arith.constant dense<0.000000e+00> : vector<128xf32>
    %70 = vector.multi_reduction <add>, %69, %cst_55 [0] : vector<32x128xf32> to vector<128xf32>
    %71 = vector.shape_cast %70 : vector<128xf32> to vector<1x128xf32>
    %72 = tpu.concatenate %68, %71 in 0 : vector<1x128xf32>, vector<1x128xf32> -> vector<2x128xf32>
    %cst_56 = arith.constant dense<0.000000e+00> : vector<2x8xf32>
    %73 = tpu.matmul %72, %37, %cst_56 {dimension_numbers = #tpu.dot_dimension_numbers<[1], [0], [0], [1], [0, 0, 1, 1], [], []>} : vector<2x128xf32>, vector<128x8xf32>, vector<2x8xf32> -> vector<2x8xf32>
    %cst_57 = arith.constant 0.001953125 : f32
    %74 = vector.broadcast %cst_57 : f32 to vector<2x8xf32>
    %75 = arith.mulf %73, %74 : vector<2x8xf32>
    %76 = vector.extract_strided_slice %75 {offsets = [0, 0], sizes = [1, 8], strides = [1, 1]} : vector<2x8xf32> to vector<1x8xf32>
    %77 = vector.extract_strided_slice %75 {offsets = [1, 0], sizes = [1, 8], strides = [1, 1]} : vector<2x8xf32> to vector<1x8xf32>
    %78 = arith.mulf %76, %76 : vector<1x8xf32>
    %79 = arith.subf %77, %78 : vector<1x8xf32>
    %cst_58 = arith.constant 9.99999974E-6 : f32
    %80 = vector.broadcast %cst_58 : f32 to vector<1x8xf32>
    %81 = arith.addf %79, %80 : vector<1x8xf32>
    %82 = math.rsqrt %81 : vector<1x8xf32>
    %83 = arith.mulf %40, %82 : vector<1x8xf32>
    %84 = arith.mulf %76, %83 : vector<1x8xf32>
    %85 = arith.subf %41, %84 : vector<1x8xf32>
    %86 = tpu.concatenate %83, %85 in 0 : vector<1x8xf32>, vector<1x8xf32> -> vector<2x8xf32>
    %cst_59 = arith.constant dense<0.000000e+00> : vector<2x128xf32>
    %87 = tpu.matmul %86, %38, %cst_59 {dimension_numbers = #tpu.dot_dimension_numbers<[1], [0], [0], [1], [0, 0, 1, 1], [], []>} : vector<2x8xf32>, vector<8x128xf32>, vector<2x128xf32> -> vector<2x128xf32>
    %88 = vector.extract_strided_slice %87 {offsets = [0, 0], sizes = [1, 128], strides = [1, 1]} : vector<2x128xf32> to vector<1x128xf32>
    %89 = vector.broadcast %88 : vector<1x128xf32> to vector<32x128xf32>
    %90 = arith.mulf %66, %89 : vector<32x128xf32>
    %91 = vector.extract_strided_slice %87 {offsets = [1, 0], sizes = [1, 128], strides = [1, 1]} : vector<2x128xf32> to vector<1x128xf32>
    %92 = vector.broadcast %91 : vector<1x128xf32> to vector<32x128xf32>
    %93 = arith.addf %90, %92 : vector<32x128xf32>
    %cst_60 = arith.constant 5.000000e-01 : f32
    %94 = vector.broadcast %cst_60 : f32 to vector<32x128xf32>
    %95 = arith.mulf %94, %93 : vector<32x128xf32>
    %cst_61 = arith.constant 0.707106769 : f32
    %96 = vector.broadcast %cst_61 : f32 to vector<32x128xf32>
    %97 = arith.mulf %93, %96 : vector<32x128xf32>
    %cst_62 = arith.constant 0.000000e+00 : f32
    %98 = vector.broadcast %cst_62 : f32 to vector<32x128xf32>
    %99 = arith.cmpf oge, %97, %98 : vector<32x128xf32>
    %cst_63 = arith.constant 1.000000e+00 : f32
    %cst_64 = arith.constant -1.000000e+00 : f32
    %100 = vector.broadcast %cst_63 : f32 to vector<32x128xf32>
    %101 = vector.broadcast %cst_64 : f32 to vector<32x128xf32>
    %102 = arith.select %99, %100, %101 : vector<32x128xi1>, vector<32x128xf32>
    %103 = math.absf %97 : vector<32x128xf32>
    %cst_65 = arith.constant 0.327591091 : f32
    %104 = vector.broadcast %cst_65 : f32 to vector<32x128xf32>
    %105 = arith.mulf %104, %103 : vector<32x128xf32>
    %cst_66 = arith.constant 1.000000e+00 : f32
    %106 = vector.broadcast %cst_66 : f32 to vector<32x128xf32>
    %107 = arith.addf %106, %105 : vector<32x128xf32>
    %108 = tpu.reciprocal %107 {approx = true} : vector<32x128xf32> -> vector<32x128xf32>
    %109 = arith.mulf %107, %108 : vector<32x128xf32>
    %cst_67 = arith.constant 2.000000e+00 : f32
    %110 = vector.broadcast %cst_67 : f32 to vector<32x128xf32>
    %111 = arith.subf %110, %109 : vector<32x128xf32>
    %112 = arith.mulf %108, %111 : vector<32x128xf32>
    %cst_68 = arith.constant 1.06140542 : f32
    %113 = vector.broadcast %cst_68 : f32 to vector<32x128xf32>
    %114 = arith.mulf %113, %112 : vector<32x128xf32>
    %cst_69 = arith.constant -1.45315206 : f32
    %115 = vector.broadcast %cst_69 : f32 to vector<32x128xf32>
    %116 = arith.addf %114, %115 : vector<32x128xf32>
    %117 = arith.mulf %116, %112 : vector<32x128xf32>
    %cst_70 = arith.constant 1.42141378 : f32
    %118 = vector.broadcast %cst_70 : f32 to vector<32x128xf32>
    %119 = arith.addf %117, %118 : vector<32x128xf32>
    %120 = arith.mulf %119, %112 : vector<32x128xf32>
    %cst_71 = arith.constant -0.284496725 : f32
    %121 = vector.broadcast %cst_71 : f32 to vector<32x128xf32>
    %122 = arith.addf %120, %121 : vector<32x128xf32>
    %123 = arith.mulf %122, %112 : vector<32x128xf32>
    %cst_72 = arith.constant 0.254829586 : f32
    %124 = vector.broadcast %cst_72 : f32 to vector<32x128xf32>
    %125 = arith.addf %123, %124 : vector<32x128xf32>
    %126 = arith.mulf %125, %112 : vector<32x128xf32>
    %cst_73 = arith.constant 0.000000e+00 : f32
    %127 = vector.broadcast %cst_73 : f32 to vector<32x128xf32>
    %128 = arith.subf %127, %103 : vector<32x128xf32>
    %129 = arith.mulf %128, %103 : vector<32x128xf32>
    %130 = math.exp %129 : vector<32x128xf32>
    %131 = arith.mulf %126, %130 : vector<32x128xf32>
    %cst_74 = arith.constant 1.000000e+00 : f32
    %132 = vector.broadcast %cst_74 : f32 to vector<32x128xf32>
    %133 = arith.subf %132, %131 : vector<32x128xf32>
    %134 = arith.mulf %102, %133 : vector<32x128xf32>
    %cst_75 = arith.constant 1.000000e+00 : f32
    %135 = vector.broadcast %cst_75 : f32 to vector<32x128xf32>
    %136 = arith.addf %135, %134 : vector<32x128xf32>
    %137 = arith.mulf %95, %136 : vector<32x128xf32>
    %138 = vector.shape_cast %137 : vector<32x128xf32> to vector<2x16x128xf32>
    %cst_76 = arith.constant 0.000000e+00 : bf16
    %139 = vector.broadcast %cst_76 : bf16 to vector<2x1x128xbf16>
    %140 = arith.truncf %138 : vector<2x16x128xf32> to vector<2x16x128xbf16>
    %141 = tpu.concatenate %139, %140, %139 in 1 : vector<2x1x128xbf16>, vector<2x16x128xbf16>, vector<2x1x128xbf16> -> vector<2x18x128xbf16>
    %142 = vector.extract_strided_slice %141 {offsets = [0, 0, 0], sizes = [2, 16, 128], strides = [1, 1, 1]} : vector<2x18x128xbf16> to vector<2x16x128xbf16>
    %143 = vector.shape_cast %142 : vector<2x16x128xbf16> to vector<32x128xbf16>
    %c0_77 = arith.constant 0 : index
    %c0_78 = arith.constant 0 : index
    %c0_79 = arith.constant 0 : index
    %144 = vector.load %arg10[%c0_77, %c0_78, %c0_79] : memref<3x128x128xbf16, #tpu.memory_space<vmem>>, vector<1x128x128xbf16>
    %145 = vector.shape_cast %144 : vector<1x128x128xbf16> to vector<128x128xbf16>
    %cst_80 = arith.constant dense<0.000000e+00> : vector<32x128xf32>
    %146 = tpu.matmul %143, %145, %cst_80 {dimension_numbers = #tpu.dot_dimension_numbers<[1], [0], [0], [1], [0, 0, 1, 1], [], []>} : vector<32x128xbf16>, vector<128x128xbf16>, vector<32x128xf32> -> vector<32x128xf32>
    %147 = vector.extract_strided_slice %141 {offsets = [0, 1, 0], sizes = [2, 16, 128], strides = [1, 1, 1]} : vector<2x18x128xbf16> to vector<2x16x128xbf16>
    %148 = vector.shape_cast %147 : vector<2x16x128xbf16> to vector<32x128xbf16>
    %c1_81 = arith.constant 1 : index
    %c0_82 = arith.constant 0 : index
    %c0_83 = arith.constant 0 : index
    %149 = vector.load %arg10[%c1_81, %c0_82, %c0_83] : memref<3x128x128xbf16, #tpu.memory_space<vmem>>, vector<1x128x128xbf16>
    %150 = vector.shape_cast %149 : vector<1x128x128xbf16> to vector<128x128xbf16>
    %cst_84 = arith.constant dense<0.000000e+00> : vector<32x128xf32>
    %151 = tpu.matmul %148, %150, %cst_84 {dimension_numbers = #tpu.dot_dimension_numbers<[1], [0], [0], [1], [0, 0, 1, 1], [], []>} : vector<32x128xbf16>, vector<128x128xbf16>, vector<32x128xf32> -> vector<32x128xf32>
    %152 = arith.addf %146, %151 : vector<32x128xf32>
    %153 = vector.extract_strided_slice %141 {offsets = [0, 2, 0], sizes = [2, 16, 128], strides = [1, 1, 1]} : vector<2x18x128xbf16> to vector<2x16x128xbf16>
    %154 = vector.shape_cast %153 : vector<2x16x128xbf16> to vector<32x128xbf16>
    %c2_85 = arith.constant 2 : index
    %c0_86 = arith.constant 0 : index
    %c0_87 = arith.constant 0 : index
    %155 = vector.load %arg10[%c2_85, %c0_86, %c0_87] : memref<3x128x128xbf16, #tpu.memory_space<vmem>>, vector<1x128x128xbf16>
    %156 = vector.shape_cast %155 : vector<1x128x128xbf16> to vector<128x128xbf16>
    %cst_88 = arith.constant dense<0.000000e+00> : vector<32x128xf32>
    %157 = tpu.matmul %154, %156, %cst_88 {dimension_numbers = #tpu.dot_dimension_numbers<[1], [0], [0], [1], [0, 0, 1, 1], [], []>} : vector<32x128xbf16>, vector<128x128xbf16>, vector<32x128xf32> -> vector<32x128xf32>
    %158 = arith.addf %152, %157 : vector<32x128xf32>
    %159 = vector.broadcast %42 : vector<1x128xf32> to vector<32x128xf32>
    %160 = arith.addf %158, %159 : vector<32x128xf32>
    %cst_89 = arith.constant dense<0.000000e+00> : vector<128xf32>
    %161 = vector.multi_reduction <add>, %160, %cst_89 [0] : vector<32x128xf32> to vector<128xf32>
    %162 = vector.shape_cast %161 : vector<128xf32> to vector<1x128xf32>
    %163 = arith.mulf %160, %160 : vector<32x128xf32>
    %cst_90 = arith.constant dense<0.000000e+00> : vector<128xf32>
    %164 = vector.multi_reduction <add>, %163, %cst_90 [0] : vector<32x128xf32> to vector<128xf32>
    %165 = vector.shape_cast %164 : vector<128xf32> to vector<1x128xf32>
    %166 = tpu.concatenate %162, %165 in 0 : vector<1x128xf32>, vector<1x128xf32> -> vector<2x128xf32>
    %cst_91 = arith.constant dense<0.000000e+00> : vector<2x8xf32>
    %167 = tpu.matmul %166, %37, %cst_91 {dimension_numbers = #tpu.dot_dimension_numbers<[1], [0], [0], [1], [0, 0, 1, 1], [], []>} : vector<2x128xf32>, vector<128x8xf32>, vector<2x8xf32> -> vector<2x8xf32>
    %cst_92 = arith.constant 0.001953125 : f32
    %168 = vector.broadcast %cst_92 : f32 to vector<2x8xf32>
    %169 = arith.mulf %167, %168 : vector<2x8xf32>
    %170 = vector.extract_strided_slice %169 {offsets = [0, 0], sizes = [1, 8], strides = [1, 1]} : vector<2x8xf32> to vector<1x8xf32>
    %171 = vector.extract_strided_slice %169 {offsets = [1, 0], sizes = [1, 8], strides = [1, 1]} : vector<2x8xf32> to vector<1x8xf32>
    %172 = arith.mulf %170, %170 : vector<1x8xf32>
    %173 = arith.subf %171, %172 : vector<1x8xf32>
    %cst_93 = arith.constant 9.99999974E-6 : f32
    %174 = vector.broadcast %cst_93 : f32 to vector<1x8xf32>
    %175 = arith.addf %173, %174 : vector<1x8xf32>
    %176 = math.rsqrt %175 : vector<1x8xf32>
    %177 = arith.mulf %43, %176 : vector<1x8xf32>
    %178 = arith.mulf %170, %177 : vector<1x8xf32>
    %179 = arith.subf %44, %178 : vector<1x8xf32>
    %180 = tpu.concatenate %177, %179 in 0 : vector<1x8xf32>, vector<1x8xf32> -> vector<2x8xf32>
    %cst_94 = arith.constant dense<0.000000e+00> : vector<2x128xf32>
    %181 = tpu.matmul %180, %38, %cst_94 {dimension_numbers = #tpu.dot_dimension_numbers<[1], [0], [0], [1], [0, 0, 1, 1], [], []>} : vector<2x8xf32>, vector<8x128xf32>, vector<2x128xf32> -> vector<2x128xf32>
    %182 = vector.extract_strided_slice %181 {offsets = [0, 0], sizes = [1, 128], strides = [1, 1]} : vector<2x128xf32> to vector<1x128xf32>
    %183 = vector.broadcast %182 : vector<1x128xf32> to vector<32x128xf32>
    %184 = arith.mulf %160, %183 : vector<32x128xf32>
    %185 = vector.extract_strided_slice %181 {offsets = [1, 0], sizes = [1, 128], strides = [1, 1]} : vector<2x128xf32> to vector<1x128xf32>
    %186 = vector.broadcast %185 : vector<1x128xf32> to vector<32x128xf32>
    %187 = arith.addf %184, %186 : vector<32x128xf32>
    %cst_95 = arith.constant 5.000000e-01 : f32
    %188 = vector.broadcast %cst_95 : f32 to vector<32x128xf32>
    %189 = arith.mulf %188, %187 : vector<32x128xf32>
    %cst_96 = arith.constant 0.707106769 : f32
    %190 = vector.broadcast %cst_96 : f32 to vector<32x128xf32>
    %191 = arith.mulf %187, %190 : vector<32x128xf32>
    %cst_97 = arith.constant 0.000000e+00 : f32
    %192 = vector.broadcast %cst_97 : f32 to vector<32x128xf32>
    %193 = arith.cmpf oge, %191, %192 : vector<32x128xf32>
    %cst_98 = arith.constant 1.000000e+00 : f32
    %cst_99 = arith.constant -1.000000e+00 : f32
    %194 = vector.broadcast %cst_98 : f32 to vector<32x128xf32>
    %195 = vector.broadcast %cst_99 : f32 to vector<32x128xf32>
    %196 = arith.select %193, %194, %195 : vector<32x128xi1>, vector<32x128xf32>
    %197 = math.absf %191 : vector<32x128xf32>
    %cst_100 = arith.constant 0.327591091 : f32
    %198 = vector.broadcast %cst_100 : f32 to vector<32x128xf32>
    %199 = arith.mulf %198, %197 : vector<32x128xf32>
    %cst_101 = arith.constant 1.000000e+00 : f32
    %200 = vector.broadcast %cst_101 : f32 to vector<32x128xf32>
    %201 = arith.addf %200, %199 : vector<32x128xf32>
    %202 = tpu.reciprocal %201 {approx = true} : vector<32x128xf32> -> vector<32x128xf32>
    %203 = arith.mulf %201, %202 : vector<32x128xf32>
    %cst_102 = arith.constant 2.000000e+00 : f32
    %204 = vector.broadcast %cst_102 : f32 to vector<32x128xf32>
    %205 = arith.subf %204, %203 : vector<32x128xf32>
    %206 = arith.mulf %202, %205 : vector<32x128xf32>
    %cst_103 = arith.constant 1.06140542 : f32
    %207 = vector.broadcast %cst_103 : f32 to vector<32x128xf32>
    %208 = arith.mulf %207, %206 : vector<32x128xf32>
    %cst_104 = arith.constant -1.45315206 : f32
    %209 = vector.broadcast %cst_104 : f32 to vector<32x128xf32>
    %210 = arith.addf %208, %209 : vector<32x128xf32>
    %211 = arith.mulf %210, %206 : vector<32x128xf32>
    %cst_105 = arith.constant 1.42141378 : f32
    %212 = vector.broadcast %cst_105 : f32 to vector<32x128xf32>
    %213 = arith.addf %211, %212 : vector<32x128xf32>
    %214 = arith.mulf %213, %206 : vector<32x128xf32>
    %cst_106 = arith.constant -0.284496725 : f32
    %215 = vector.broadcast %cst_106 : f32 to vector<32x128xf32>
    %216 = arith.addf %214, %215 : vector<32x128xf32>
    %217 = arith.mulf %216, %206 : vector<32x128xf32>
    %cst_107 = arith.constant 0.254829586 : f32
    %218 = vector.broadcast %cst_107 : f32 to vector<32x128xf32>
    %219 = arith.addf %217, %218 : vector<32x128xf32>
    %220 = arith.mulf %219, %206 : vector<32x128xf32>
    %cst_108 = arith.constant 0.000000e+00 : f32
    %221 = vector.broadcast %cst_108 : f32 to vector<32x128xf32>
    %222 = arith.subf %221, %197 : vector<32x128xf32>
    %223 = arith.mulf %222, %197 : vector<32x128xf32>
    %224 = math.exp %223 : vector<32x128xf32>
    %225 = arith.mulf %220, %224 : vector<32x128xf32>
    %cst_109 = arith.constant 1.000000e+00 : f32
    %226 = vector.broadcast %cst_109 : f32 to vector<32x128xf32>
    %227 = arith.subf %226, %225 : vector<32x128xf32>
    %228 = arith.mulf %196, %227 : vector<32x128xf32>
    %cst_110 = arith.constant 1.000000e+00 : f32
    %229 = vector.broadcast %cst_110 : f32 to vector<32x128xf32>
    %230 = arith.addf %229, %228 : vector<32x128xf32>
    %231 = arith.mulf %189, %230 : vector<32x128xf32>
    %232 = vector.shape_cast %231 : vector<32x128xf32> to vector<2x16x128xf32>
    %233 = arith.addf %36, %232 : vector<2x16x128xf32>
    %cst_111 = arith.constant 0.70721358 : f32
    %234 = vector.broadcast %cst_111 : f32 to vector<2x16x128xf32>
    %235 = arith.mulf %233, %234 : vector<2x16x128xf32>
    %c0_112 = arith.constant 0 : index
    %c0_113 = arith.constant 0 : index
    %236 = vector.load %arg15[%c0_112, %c0_113] : memref<1x128xf32, #tpu.memory_space<vmem>>, vector<1x128xf32>
    %c0_114 = arith.constant 0 : index
    %c0_115 = arith.constant 0 : index
    %237 = vector.load %arg16[%c0_114, %c0_115] : memref<1x8xf32, #tpu.memory_space<vmem>>, vector<1x8xf32>
    %c0_116 = arith.constant 0 : index
    %c0_117 = arith.constant 0 : index
    %238 = vector.load %arg17[%c0_116, %c0_117] : memref<1x8xf32, #tpu.memory_space<vmem>>, vector<1x8xf32>
    %c0_118 = arith.constant 0 : index
    %c0_119 = arith.constant 0 : index
    %239 = vector.load %arg19[%c0_118, %c0_119] : memref<1x128xf32, #tpu.memory_space<vmem>>, vector<1x128xf32>
    %c0_120 = arith.constant 0 : index
    %c0_121 = arith.constant 0 : index
    %240 = vector.load %arg20[%c0_120, %c0_121] : memref<1x8xf32, #tpu.memory_space<vmem>>, vector<1x8xf32>
    %c0_122 = arith.constant 0 : index
    %c0_123 = arith.constant 0 : index
    %241 = vector.load %arg21[%c0_122, %c0_123] : memref<1x8xf32, #tpu.memory_space<vmem>>, vector<1x8xf32>
    %cst_124 = arith.constant 0.000000e+00 : bf16
    %242 = vector.broadcast %cst_124 : bf16 to vector<2x1x128xbf16>
    %243 = arith.truncf %235 : vector<2x16x128xf32> to vector<2x16x128xbf16>
    %244 = tpu.concatenate %242, %243, %242 in 1 : vector<2x1x128xbf16>, vector<2x16x128xbf16>, vector<2x1x128xbf16> -> vector<2x18x128xbf16>
    %245 = vector.extract_strided_slice %244 {offsets = [0, 0, 0], sizes = [2, 16, 128], strides = [1, 1, 1]} : vector<2x18x128xbf16> to vector<2x16x128xbf16>
    %246 = vector.shape_cast %245 : vector<2x16x128xbf16> to vector<32x128xbf16>
    %c0_125 = arith.constant 0 : index
    %c0_126 = arith.constant 0 : index
    %c0_127 = arith.constant 0 : index
    %247 = vector.load %arg14[%c0_125, %c0_126, %c0_127] : memref<3x128x128xbf16, #tpu.memory_space<vmem>>, vector<1x128x128xbf16>
    %248 = vector.shape_cast %247 : vector<1x128x128xbf16> to vector<128x128xbf16>
    %cst_128 = arith.constant dense<0.000000e+00> : vector<32x128xf32>
    %249 = tpu.matmul %246, %248, %cst_128 {dimension_numbers = #tpu.dot_dimension_numbers<[1], [0], [0], [1], [0, 0, 1, 1], [], []>} : vector<32x128xbf16>, vector<128x128xbf16>, vector<32x128xf32> -> vector<32x128xf32>
    %250 = vector.extract_strided_slice %244 {offsets = [0, 1, 0], sizes = [2, 16, 128], strides = [1, 1, 1]} : vector<2x18x128xbf16> to vector<2x16x128xbf16>
    %251 = vector.shape_cast %250 : vector<2x16x128xbf16> to vector<32x128xbf16>
    %c1_129 = arith.constant 1 : index
    %c0_130 = arith.constant 0 : index
    %c0_131 = arith.constant 0 : index
    %252 = vector.load %arg14[%c1_129, %c0_130, %c0_131] : memref<3x128x128xbf16, #tpu.memory_space<vmem>>, vector<1x128x128xbf16>
    %253 = vector.shape_cast %252 : vector<1x128x128xbf16> to vector<128x128xbf16>
    %cst_132 = arith.constant dense<0.000000e+00> : vector<32x128xf32>
    %254 = tpu.matmul %251, %253, %cst_132 {dimension_numbers = #tpu.dot_dimension_numbers<[1], [0], [0], [1], [0, 0, 1, 1], [], []>} : vector<32x128xbf16>, vector<128x128xbf16>, vector<32x128xf32> -> vector<32x128xf32>
    %255 = arith.addf %249, %254 : vector<32x128xf32>
    %256 = vector.extract_strided_slice %244 {offsets = [0, 2, 0], sizes = [2, 16, 128], strides = [1, 1, 1]} : vector<2x18x128xbf16> to vector<2x16x128xbf16>
    %257 = vector.shape_cast %256 : vector<2x16x128xbf16> to vector<32x128xbf16>
    %c2_133 = arith.constant 2 : index
    %c0_134 = arith.constant 0 : index
    %c0_135 = arith.constant 0 : index
    %258 = vector.load %arg14[%c2_133, %c0_134, %c0_135] : memref<3x128x128xbf16, #tpu.memory_space<vmem>>, vector<1x128x128xbf16>
    %259 = vector.shape_cast %258 : vector<1x128x128xbf16> to vector<128x128xbf16>
    %cst_136 = arith.constant dense<0.000000e+00> : vector<32x128xf32>
    %260 = tpu.matmul %257, %259, %cst_136 {dimension_numbers = #tpu.dot_dimension_numbers<[1], [0], [0], [1], [0, 0, 1, 1], [], []>} : vector<32x128xbf16>, vector<128x128xbf16>, vector<32x128xf32> -> vector<32x128xf32>
    %261 = arith.addf %255, %260 : vector<32x128xf32>
    %262 = vector.broadcast %236 : vector<1x128xf32> to vector<32x128xf32>
    %263 = arith.addf %261, %262 : vector<32x128xf32>
    %cst_137 = arith.constant dense<0.000000e+00> : vector<128xf32>
    %264 = vector.multi_reduction <add>, %263, %cst_137 [0] : vector<32x128xf32> to vector<128xf32>
    %265 = vector.shape_cast %264 : vector<128xf32> to vector<1x128xf32>
    %266 = arith.mulf %263, %263 : vector<32x128xf32>
    %cst_138 = arith.constant dense<0.000000e+00> : vector<128xf32>
    %267 = vector.multi_reduction <add>, %266, %cst_138 [0] : vector<32x128xf32> to vector<128xf32>
    %268 = vector.shape_cast %267 : vector<128xf32> to vector<1x128xf32>
    %269 = tpu.concatenate %265, %268 in 0 : vector<1x128xf32>, vector<1x128xf32> -> vector<2x128xf32>
    %cst_139 = arith.constant dense<0.000000e+00> : vector<2x8xf32>
    %270 = tpu.matmul %269, %37, %cst_139 {dimension_numbers = #tpu.dot_dimension_numbers<[1], [0], [0], [1], [0, 0, 1, 1], [], []>} : vector<2x128xf32>, vector<128x8xf32>, vector<2x8xf32> -> vector<2x8xf32>
    %cst_140 = arith.constant 0.001953125 : f32
    %271 = vector.broadcast %cst_140 : f32 to vector<2x8xf32>
    %272 = arith.mulf %270, %271 : vector<2x8xf32>
    %273 = vector.extract_strided_slice %272 {offsets = [0, 0], sizes = [1, 8], strides = [1, 1]} : vector<2x8xf32> to vector<1x8xf32>
    %274 = vector.extract_strided_slice %272 {offsets = [1, 0], sizes = [1, 8], strides = [1, 1]} : vector<2x8xf32> to vector<1x8xf32>
    %275 = arith.mulf %273, %273 : vector<1x8xf32>
    %276 = arith.subf %274, %275 : vector<1x8xf32>
    %cst_141 = arith.constant 9.99999974E-6 : f32
    %277 = vector.broadcast %cst_141 : f32 to vector<1x8xf32>
    %278 = arith.addf %276, %277 : vector<1x8xf32>
    %279 = math.rsqrt %278 : vector<1x8xf32>
    %280 = arith.mulf %237, %279 : vector<1x8xf32>
    %281 = arith.mulf %273, %280 : vector<1x8xf32>
    %282 = arith.subf %238, %281 : vector<1x8xf32>
    %283 = tpu.concatenate %280, %282 in 0 : vector<1x8xf32>, vector<1x8xf32> -> vector<2x8xf32>
    %cst_142 = arith.constant dense<0.000000e+00> : vector<2x128xf32>
    %284 = tpu.matmul %283, %38, %cst_142 {dimension_numbers = #tpu.dot_dimension_numbers<[1], [0], [0], [1], [0, 0, 1, 1], [], []>} : vector<2x8xf32>, vector<8x128xf32>, vector<2x128xf32> -> vector<2x128xf32>
    %285 = vector.extract_strided_slice %284 {offsets = [0, 0], sizes = [1, 128], strides = [1, 1]} : vector<2x128xf32> to vector<1x128xf32>
    %286 = vector.broadcast %285 : vector<1x128xf32> to vector<32x128xf32>
    %287 = arith.mulf %263, %286 : vector<32x128xf32>
    %288 = vector.extract_strided_slice %284 {offsets = [1, 0], sizes = [1, 128], strides = [1, 1]} : vector<2x128xf32> to vector<1x128xf32>
    %289 = vector.broadcast %288 : vector<1x128xf32> to vector<32x128xf32>
    %290 = arith.addf %287, %289 : vector<32x128xf32>
    %cst_143 = arith.constant 5.000000e-01 : f32
    %291 = vector.broadcast %cst_143 : f32 to vector<32x128xf32>
    %292 = arith.mulf %291, %290 : vector<32x128xf32>
    %cst_144 = arith.constant 0.707106769 : f32
    %293 = vector.broadcast %cst_144 : f32 to vector<32x128xf32>
    %294 = arith.mulf %290, %293 : vector<32x128xf32>
    %cst_145 = arith.constant 0.000000e+00 : f32
    %295 = vector.broadcast %cst_145 : f32 to vector<32x128xf32>
    %296 = arith.cmpf oge, %294, %295 : vector<32x128xf32>
    %cst_146 = arith.constant 1.000000e+00 : f32
    %cst_147 = arith.constant -1.000000e+00 : f32
    %297 = vector.broadcast %cst_146 : f32 to vector<32x128xf32>
    %298 = vector.broadcast %cst_147 : f32 to vector<32x128xf32>
    %299 = arith.select %296, %297, %298 : vector<32x128xi1>, vector<32x128xf32>
    %300 = math.absf %294 : vector<32x128xf32>
    %cst_148 = arith.constant 0.327591091 : f32
    %301 = vector.broadcast %cst_148 : f32 to vector<32x128xf32>
    %302 = arith.mulf %301, %300 : vector<32x128xf32>
    %cst_149 = arith.constant 1.000000e+00 : f32
    %303 = vector.broadcast %cst_149 : f32 to vector<32x128xf32>
    %304 = arith.addf %303, %302 : vector<32x128xf32>
    %305 = tpu.reciprocal %304 {approx = true} : vector<32x128xf32> -> vector<32x128xf32>
    %306 = arith.mulf %304, %305 : vector<32x128xf32>
    %cst_150 = arith.constant 2.000000e+00 : f32
    %307 = vector.broadcast %cst_150 : f32 to vector<32x128xf32>
    %308 = arith.subf %307, %306 : vector<32x128xf32>
    %309 = arith.mulf %305, %308 : vector<32x128xf32>
    %cst_151 = arith.constant 1.06140542 : f32
    %310 = vector.broadcast %cst_151 : f32 to vector<32x128xf32>
    %311 = arith.mulf %310, %309 : vector<32x128xf32>
    %cst_152 = arith.constant -1.45315206 : f32
    %312 = vector.broadcast %cst_152 : f32 to vector<32x128xf32>
    %313 = arith.addf %311, %312 : vector<32x128xf32>
    %314 = arith.mulf %313, %309 : vector<32x128xf32>
    %cst_153 = arith.constant 1.42141378 : f32
    %315 = vector.broadcast %cst_153 : f32 to vector<32x128xf32>
    %316 = arith.addf %314, %315 : vector<32x128xf32>
    %317 = arith.mulf %316, %309 : vector<32x128xf32>
    %cst_154 = arith.constant -0.284496725 : f32
    %318 = vector.broadcast %cst_154 : f32 to vector<32x128xf32>
    %319 = arith.addf %317, %318 : vector<32x128xf32>
    %320 = arith.mulf %319, %309 : vector<32x128xf32>
    %cst_155 = arith.constant 0.254829586 : f32
    %321 = vector.broadcast %cst_155 : f32 to vector<32x128xf32>
    %322 = arith.addf %320, %321 : vector<32x128xf32>
    %323 = arith.mulf %322, %309 : vector<32x128xf32>
    %cst_156 = arith.constant 0.000000e+00 : f32
    %324 = vector.broadcast %cst_156 : f32 to vector<32x128xf32>
    %325 = arith.subf %324, %300 : vector<32x128xf32>
    %326 = arith.mulf %325, %300 : vector<32x128xf32>
    %327 = math.exp %326 : vector<32x128xf32>
    %328 = arith.mulf %323, %327 : vector<32x128xf32>
    %cst_157 = arith.constant 1.000000e+00 : f32
    %329 = vector.broadcast %cst_157 : f32 to vector<32x128xf32>
    %330 = arith.subf %329, %328 : vector<32x128xf32>
    %331 = arith.mulf %299, %330 : vector<32x128xf32>
    %cst_158 = arith.constant 1.000000e+00 : f32
    %332 = vector.broadcast %cst_158 : f32 to vector<32x128xf32>
    %333 = arith.addf %332, %331 : vector<32x128xf32>
    %334 = arith.mulf %292, %333 : vector<32x128xf32>
    %335 = vector.shape_cast %334 : vector<32x128xf32> to vector<2x16x128xf32>
    %cst_159 = arith.constant 0.000000e+00 : bf16
    %336 = vector.broadcast %cst_159 : bf16 to vector<2x1x128xbf16>
    %337 = arith.truncf %335 : vector<2x16x128xf32> to vector<2x16x128xbf16>
    %338 = tpu.concatenate %336, %337, %336 in 1 : vector<2x1x128xbf16>, vector<2x16x128xbf16>, vector<2x1x128xbf16> -> vector<2x18x128xbf16>
    %339 = vector.extract_strided_slice %338 {offsets = [0, 0, 0], sizes = [2, 16, 128], strides = [1, 1, 1]} : vector<2x18x128xbf16> to vector<2x16x128xbf16>
    %340 = vector.shape_cast %339 : vector<2x16x128xbf16> to vector<32x128xbf16>
    %c0_160 = arith.constant 0 : index
    %c0_161 = arith.constant 0 : index
    %c0_162 = arith.constant 0 : index
    %341 = vector.load %arg18[%c0_160, %c0_161, %c0_162] : memref<3x128x128xbf16, #tpu.memory_space<vmem>>, vector<1x128x128xbf16>
    %342 = vector.shape_cast %341 : vector<1x128x128xbf16> to vector<128x128xbf16>
    %cst_163 = arith.constant dense<0.000000e+00> : vector<32x128xf32>
    %343 = tpu.matmul %340, %342, %cst_163 {dimension_numbers = #tpu.dot_dimension_numbers<[1], [0], [0], [1], [0, 0, 1, 1], [], []>} : vector<32x128xbf16>, vector<128x128xbf16>, vector<32x128xf32> -> vector<32x128xf32>
    %344 = vector.extract_strided_slice %338 {offsets = [0, 1, 0], sizes = [2, 16, 128], strides = [1, 1, 1]} : vector<2x18x128xbf16> to vector<2x16x128xbf16>
    %345 = vector.shape_cast %344 : vector<2x16x128xbf16> to vector<32x128xbf16>
    %c1_164 = arith.constant 1 : index
    %c0_165 = arith.constant 0 : index
    %c0_166 = arith.constant 0 : index
    %346 = vector.load %arg18[%c1_164, %c0_165, %c0_166] : memref<3x128x128xbf16, #tpu.memory_space<vmem>>, vector<1x128x128xbf16>
    %347 = vector.shape_cast %346 : vector<1x128x128xbf16> to vector<128x128xbf16>
    %cst_167 = arith.constant dense<0.000000e+00> : vector<32x128xf32>
    %348 = tpu.matmul %345, %347, %cst_167 {dimension_numbers = #tpu.dot_dimension_numbers<[1], [0], [0], [1], [0, 0, 1, 1], [], []>} : vector<32x128xbf16>, vector<128x128xbf16>, vector<32x128xf32> -> vector<32x128xf32>
    %349 = arith.addf %343, %348 : vector<32x128xf32>
    %350 = vector.extract_strided_slice %338 {offsets = [0, 2, 0], sizes = [2, 16, 128], strides = [1, 1, 1]} : vector<2x18x128xbf16> to vector<2x16x128xbf16>
    %351 = vector.shape_cast %350 : vector<2x16x128xbf16> to vector<32x128xbf16>
    %c2_168 = arith.constant 2 : index
    %c0_169 = arith.constant 0 : index
    %c0_170 = arith.constant 0 : index
    %352 = vector.load %arg18[%c2_168, %c0_169, %c0_170] : memref<3x128x128xbf16, #tpu.memory_space<vmem>>, vector<1x128x128xbf16>
    %353 = vector.shape_cast %352 : vector<1x128x128xbf16> to vector<128x128xbf16>
    %cst_171 = arith.constant dense<0.000000e+00> : vector<32x128xf32>
    %354 = tpu.matmul %351, %353, %cst_171 {dimension_numbers = #tpu.dot_dimension_numbers<[1], [0], [0], [1], [0, 0, 1, 1], [], []>} : vector<32x128xbf16>, vector<128x128xbf16>, vector<32x128xf32> -> vector<32x128xf32>
    %355 = arith.addf %349, %354 : vector<32x128xf32>
    %356 = vector.broadcast %239 : vector<1x128xf32> to vector<32x128xf32>
    %357 = arith.addf %355, %356 : vector<32x128xf32>
    %cst_172 = arith.constant dense<0.000000e+00> : vector<128xf32>
    %358 = vector.multi_reduction <add>, %357, %cst_172 [0] : vector<32x128xf32> to vector<128xf32>
    %359 = vector.shape_cast %358 : vector<128xf32> to vector<1x128xf32>
    %360 = arith.mulf %357, %357 : vector<32x128xf32>
    %cst_173 = arith.constant dense<0.000000e+00> : vector<128xf32>
    %361 = vector.multi_reduction <add>, %360, %cst_173 [0] : vector<32x128xf32> to vector<128xf32>
    %362 = vector.shape_cast %361 : vector<128xf32> to vector<1x128xf32>
    %363 = tpu.concatenate %359, %362 in 0 : vector<1x128xf32>, vector<1x128xf32> -> vector<2x128xf32>
    %cst_174 = arith.constant dense<0.000000e+00> : vector<2x8xf32>
    %364 = tpu.matmul %363, %37, %cst_174 {dimension_numbers = #tpu.dot_dimension_numbers<[1], [0], [0], [1], [0, 0, 1, 1], [], []>} : vector<2x128xf32>, vector<128x8xf32>, vector<2x8xf32> -> vector<2x8xf32>
    %cst_175 = arith.constant 0.001953125 : f32
    %365 = vector.broadcast %cst_175 : f32 to vector<2x8xf32>
    %366 = arith.mulf %364, %365 : vector<2x8xf32>
    %367 = vector.extract_strided_slice %366 {offsets = [0, 0], sizes = [1, 8], strides = [1, 1]} : vector<2x8xf32> to vector<1x8xf32>
    %368 = vector.extract_strided_slice %366 {offsets = [1, 0], sizes = [1, 8], strides = [1, 1]} : vector<2x8xf32> to vector<1x8xf32>
    %369 = arith.mulf %367, %367 : vector<1x8xf32>
    %370 = arith.subf %368, %369 : vector<1x8xf32>
    %cst_176 = arith.constant 9.99999974E-6 : f32
    %371 = vector.broadcast %cst_176 : f32 to vector<1x8xf32>
    %372 = arith.addf %370, %371 : vector<1x8xf32>
    %373 = math.rsqrt %372 : vector<1x8xf32>
    %374 = arith.mulf %240, %373 : vector<1x8xf32>
    %375 = arith.mulf %367, %374 : vector<1x8xf32>
    %376 = arith.subf %241, %375 : vector<1x8xf32>
    %377 = tpu.concatenate %374, %376 in 0 : vector<1x8xf32>, vector<1x8xf32> -> vector<2x8xf32>
    %cst_177 = arith.constant dense<0.000000e+00> : vector<2x128xf32>
    %378 = tpu.matmul %377, %38, %cst_177 {dimension_numbers = #tpu.dot_dimension_numbers<[1], [0], [0], [1], [0, 0, 1, 1], [], []>} : vector<2x8xf32>, vector<8x128xf32>, vector<2x128xf32> -> vector<2x128xf32>
    %379 = vector.extract_strided_slice %378 {offsets = [0, 0], sizes = [1, 128], strides = [1, 1]} : vector<2x128xf32> to vector<1x128xf32>
    %380 = vector.broadcast %379 : vector<1x128xf32> to vector<32x128xf32>
    %381 = arith.mulf %357, %380 : vector<32x128xf32>
    %382 = vector.extract_strided_slice %378 {offsets = [1, 0], sizes = [1, 128], strides = [1, 1]} : vector<2x128xf32> to vector<1x128xf32>
    %383 = vector.broadcast %382 : vector<1x128xf32> to vector<32x128xf32>
    %384 = arith.addf %381, %383 : vector<32x128xf32>
    %cst_178 = arith.constant 5.000000e-01 : f32
    %385 = vector.broadcast %cst_178 : f32 to vector<32x128xf32>
    %386 = arith.mulf %385, %384 : vector<32x128xf32>
    %cst_179 = arith.constant 0.707106769 : f32
    %387 = vector.broadcast %cst_179 : f32 to vector<32x128xf32>
    %388 = arith.mulf %384, %387 : vector<32x128xf32>
    %cst_180 = arith.constant 0.000000e+00 : f32
    %389 = vector.broadcast %cst_180 : f32 to vector<32x128xf32>
    %390 = arith.cmpf oge, %388, %389 : vector<32x128xf32>
    %cst_181 = arith.constant 1.000000e+00 : f32
    %cst_182 = arith.constant -1.000000e+00 : f32
    %391 = vector.broadcast %cst_181 : f32 to vector<32x128xf32>
    %392 = vector.broadcast %cst_182 : f32 to vector<32x128xf32>
    %393 = arith.select %390, %391, %392 : vector<32x128xi1>, vector<32x128xf32>
    %394 = math.absf %388 : vector<32x128xf32>
    %cst_183 = arith.constant 0.327591091 : f32
    %395 = vector.broadcast %cst_183 : f32 to vector<32x128xf32>
    %396 = arith.mulf %395, %394 : vector<32x128xf32>
    %cst_184 = arith.constant 1.000000e+00 : f32
    %397 = vector.broadcast %cst_184 : f32 to vector<32x128xf32>
    %398 = arith.addf %397, %396 : vector<32x128xf32>
    %399 = tpu.reciprocal %398 {approx = true} : vector<32x128xf32> -> vector<32x128xf32>
    %400 = arith.mulf %398, %399 : vector<32x128xf32>
    %cst_185 = arith.constant 2.000000e+00 : f32
    %401 = vector.broadcast %cst_185 : f32 to vector<32x128xf32>
    %402 = arith.subf %401, %400 : vector<32x128xf32>
    %403 = arith.mulf %399, %402 : vector<32x128xf32>
    %cst_186 = arith.constant 1.06140542 : f32
    %404 = vector.broadcast %cst_186 : f32 to vector<32x128xf32>
    %405 = arith.mulf %404, %403 : vector<32x128xf32>
    %cst_187 = arith.constant -1.45315206 : f32
    %406 = vector.broadcast %cst_187 : f32 to vector<32x128xf32>
    %407 = arith.addf %405, %406 : vector<32x128xf32>
    %408 = arith.mulf %407, %403 : vector<32x128xf32>
    %cst_188 = arith.constant 1.42141378 : f32
    %409 = vector.broadcast %cst_188 : f32 to vector<32x128xf32>
    %410 = arith.addf %408, %409 : vector<32x128xf32>
    %411 = arith.mulf %410, %403 : vector<32x128xf32>
    %cst_189 = arith.constant -0.284496725 : f32
    %412 = vector.broadcast %cst_189 : f32 to vector<32x128xf32>
    %413 = arith.addf %411, %412 : vector<32x128xf32>
    %414 = arith.mulf %413, %403 : vector<32x128xf32>
    %cst_190 = arith.constant 0.254829586 : f32
    %415 = vector.broadcast %cst_190 : f32 to vector<32x128xf32>
    %416 = arith.addf %414, %415 : vector<32x128xf32>
    %417 = arith.mulf %416, %403 : vector<32x128xf32>
    %cst_191 = arith.constant 0.000000e+00 : f32
    %418 = vector.broadcast %cst_191 : f32 to vector<32x128xf32>
    %419 = arith.subf %418, %394 : vector<32x128xf32>
    %420 = arith.mulf %419, %394 : vector<32x128xf32>
    %421 = math.exp %420 : vector<32x128xf32>
    %422 = arith.mulf %417, %421 : vector<32x128xf32>
    %cst_192 = arith.constant 1.000000e+00 : f32
    %423 = vector.broadcast %cst_192 : f32 to vector<32x128xf32>
    %424 = arith.subf %423, %422 : vector<32x128xf32>
    %425 = arith.mulf %393, %424 : vector<32x128xf32>
    %cst_193 = arith.constant 1.000000e+00 : f32
    %426 = vector.broadcast %cst_193 : f32 to vector<32x128xf32>
    %427 = arith.addf %426, %425 : vector<32x128xf32>
    %428 = arith.mulf %386, %427 : vector<32x128xf32>
    %429 = vector.shape_cast %428 : vector<32x128xf32> to vector<2x16x128xf32>
    %430 = arith.addf %235, %429 : vector<2x16x128xf32>
    %cst_194 = arith.constant 0.70721358 : f32
    %431 = vector.broadcast %cst_194 : f32 to vector<2x16x128xf32>
    %432 = arith.mulf %430, %431 : vector<2x16x128xf32>
    %433 = vector.shape_cast %432 : vector<2x16x128xf32> to vector<32x128xf32>
    %434 = arith.truncf %433 : vector<32x128xf32> to vector<32x128xbf16>
    %c0_195 = arith.constant 0 : index
    %c0_196 = arith.constant 0 : index
    %c0_197 = arith.constant 0 : index
    %435 = vector.load %arg24[%c0_195, %c0_196, %c0_197] : memref<4x16x32xbf16, #tpu.memory_space<vmem>>, vector<1x16x32xbf16>
    %436 = vector.shape_cast %435 : vector<1x16x32xbf16> to vector<16x32xbf16>
    %cst_198 = arith.constant dense<0.000000e+00> : vector<16x128xf32>
    %437 = tpu.matmul %436, %434, %cst_198 {dimension_numbers = #tpu.dot_dimension_numbers<[1], [0], [0], [1], [0, 0, 1, 1], [], []>} : vector<16x32xbf16>, vector<32x128xbf16>, vector<16x128xf32> -> vector<16x128xf32>
    %438 = arith.truncf %437 : vector<16x128xf32> to vector<16x128xbf16>
    %c1_199 = arith.constant 1 : index
    %c0_200 = arith.constant 0 : index
    %c0_201 = arith.constant 0 : index
    %439 = vector.load %arg24[%c1_199, %c0_200, %c0_201] : memref<4x16x32xbf16, #tpu.memory_space<vmem>>, vector<1x16x32xbf16>
    %440 = vector.shape_cast %439 : vector<1x16x32xbf16> to vector<16x32xbf16>
    %cst_202 = arith.constant dense<0.000000e+00> : vector<16x128xf32>
    %441 = tpu.matmul %440, %434, %cst_202 {dimension_numbers = #tpu.dot_dimension_numbers<[1], [0], [0], [1], [0, 0, 1, 1], [], []>} : vector<16x32xbf16>, vector<32x128xbf16>, vector<16x128xf32> -> vector<16x128xf32>
    %442 = arith.truncf %441 : vector<16x128xf32> to vector<16x128xbf16>
    %c2_203 = arith.constant 2 : index
    %c0_204 = arith.constant 0 : index
    %c0_205 = arith.constant 0 : index
    %443 = vector.load %arg24[%c2_203, %c0_204, %c0_205] : memref<4x16x32xbf16, #tpu.memory_space<vmem>>, vector<1x16x32xbf16>
    %444 = vector.shape_cast %443 : vector<1x16x32xbf16> to vector<16x32xbf16>
    %cst_206 = arith.constant dense<0.000000e+00> : vector<16x128xf32>
    %445 = tpu.matmul %444, %434, %cst_206 {dimension_numbers = #tpu.dot_dimension_numbers<[1], [0], [0], [1], [0, 0, 1, 1], [], []>} : vector<16x32xbf16>, vector<32x128xbf16>, vector<16x128xf32> -> vector<16x128xf32>
    %446 = arith.truncf %445 : vector<16x128xf32> to vector<16x128xbf16>
    %c3 = arith.constant 3 : index
    %c0_207 = arith.constant 0 : index
    %c0_208 = arith.constant 0 : index
    %447 = vector.load %arg24[%c3, %c0_207, %c0_208] : memref<4x16x32xbf16, #tpu.memory_space<vmem>>, vector<1x16x32xbf16>
    %448 = vector.shape_cast %447 : vector<1x16x32xbf16> to vector<16x32xbf16>
    %cst_209 = arith.constant dense<0.000000e+00> : vector<16x128xf32>
    %449 = tpu.matmul %448, %434, %cst_209 {dimension_numbers = #tpu.dot_dimension_numbers<[1], [0], [0], [1], [0, 0, 1, 1], [], []>} : vector<16x32xbf16>, vector<32x128xbf16>, vector<16x128xf32> -> vector<16x128xf32>
    %450 = arith.truncf %449 : vector<16x128xf32> to vector<16x128xbf16>
    %451 = tpu.concatenate %438, %442, %446, %450 in 1 : vector<16x128xbf16>, vector<16x128xbf16>, vector<16x128xbf16>, vector<16x128xbf16> -> vector<16x512xbf16>
    %c0_210 = arith.constant 0 : index
    %c0_211 = arith.constant 0 : index
    %452 = vector.load %arg25[%c0_210, %c0_211] : memref<512x64xbf16, #tpu.memory_space<vmem>>, vector<512x64xbf16>
    %cst_212 = arith.constant dense<0.000000e+00> : vector<16x64xf32>
    %453 = tpu.matmul %451, %452, %cst_212 {dimension_numbers = #tpu.dot_dimension_numbers<[1], [0], [0], [1], [0, 0, 1, 1], [], []>} : vector<16x512xbf16>, vector<512x64xbf16>, vector<16x64xf32> -> vector<16x64xf32>
    %c0_213 = arith.constant 0 : index
    %c0_214 = arith.constant 0 : index
    %454 = vector.load %arg26[%c0_213, %c0_214] : memref<1x64xf32, #tpu.memory_space<vmem>>, vector<1x64xf32>
    %455 = vector.broadcast %454 : vector<1x64xf32> to vector<16x64xf32>
    %456 = arith.addf %453, %455 : vector<16x64xf32>
    %457 = vector.extract_strided_slice %456 {offsets = [0, 0], sizes = [8, 64], strides = [1, 1]} : vector<16x64xf32> to vector<8x64xf32>
    %458 = vector.extract_strided_slice %456 {offsets = [8, 0], sizes = [8, 64], strides = [1, 1]} : vector<16x64xf32> to vector<8x64xf32>
    %459 = tpu.concatenate %457, %458 in 1 : vector<8x64xf32>, vector<8x64xf32> -> vector<8x128xf32>
    %c0_215 = arith.constant 0 : index
    %c0_216 = arith.constant 0 : index
    %460 = vector.load %arg27[%c0_215, %c0_216] : memref<8x128xf32, #tpu.memory_space<vmem>>, vector<8x128xf32>
    tpu.vector_store %arg27[%c0_215, %c0_216], %459 {strides = array<i32>} : memref<8x128xf32, #tpu.memory_space<vmem>>, vector<8x128xf32>,
    return
  }
}

</mosaic_0001>

<bundles_post_ra>
// kernel: tile.63
= control target key start
LH: loop header
LB: loop body
LE: loop exit
PB: predicated region body
PF: predicated region fallthrough
CT: control target
= control target key end

     0   :  { %s22_s0 = inlined_call_operand.vmem [shape: f32[8], index: 0, kind: input, shape index: {}]   ;;  %s23_s1 = inlined_call_operand.vmem [shape: f32[8,8], index: 1, kind: output, shape index: {}]  }
   0x1   :  { %v4_v0 = vld [vmem:[%s22_s0] ss:$0 sm:$0xff] }
   0x2   :  { %5 = vst [vmem:[%s23_s1] sm:$0xff] %v4_v0 }

// kernel: tile.64
= control target key start
LH: loop header
LB: loop body
LE: loop exit
PB: predicated region body
PF: predicated region fallthrough
CT: control target
= control target key end

     0   :  { %s67_s10 = smov 56   ;;  %s68_s11 = smov 40   ;;  %vm3_vm0 = vcmask 64512   ;;  %vm9_vm1 = vcmask 523712   ;;  %vm15_vm2 = vcmask 458112   ;;  %vm21_vm3 = vcmask 392512   ;;  %s111_s0 = inlined_call_operand.vmem [shape: f32[8,8], index: 0, kind: input, shape index: {}]   ;;  %s112_s1 = inlined_call_operand.vmem [shape: f32[1,64], index: 1, kind: output, shape index: {}]  }
   0x1   :  { %v53_v0 = vld [vmem:[%s111_s0 + $0x7] sm:$0x1]   ;;  %v55_v1 = vld [vmem:[%s111_s0 + $0x5] sm:$0x1]   ;;  %v54_v2 = vld [vmem:[%s111_s0 + $0x6] sm:$0x1]  }
   0x2   :  { %7 = vrot.lane.b32.xlu0 %v53_v0, %s67_s10  ;;  %19 = vrot.lane.b32.xlu1 %v55_v1, %s68_s11  ;;  %v56_v3 = vld [vmem:[%s111_s0 + $0x4] sm:$0x1]   ;;  %v2_v4 = vld [vmem:[%s111_s0] sm:$0x1]   ;;  %s69_s18 = smov 48   ;;  %s70_s19 = smov 32  }
   0x3   :  { %4 = vst.msk [vmem:[#allocation0] sm:$0x1] %vm3_vm0, %v2_v4   ;;  %v57_v5 = vld [vmem:[%s111_s0 + $0x3] sm:$0x1]   ;;  %v58_v6 = vld [vmem:[%s111_s0 + $0x2] sm:$0x1]  }
   0x4   :  { %s71_s24 = smov 24   ;;  %s72_s25 = smov 16   ;;  %v59_v7 = vld [vmem:[%s111_s0 + $0x1] sm:$0x1]   ;;  %vm27_vm4 = vcmask 326912   ;;  %vm33_vm5 = vcmask 261312  }
   0x5   :  { %s73_s0 = smov 8   ;;  %vm39_vm6 = vcmask 195712   ;;  %vm45_vm7 = vcmask 130112  }
   0x6   :  { %13 = vrot.lane.b32.xlu0 %v54_v2, %s69_s18  ;;  %25 = vrot.lane.b32.xlu1 %v56_v3, %s70_s19 }
   0xa   :  { %31 = vrot.lane.b32.xlu0 %v57_v5, %s71_s24  ;;  %37 = vrot.lane.b32.xlu1 %v58_v6, %s72_s25 }
   0xe   :  { %43 = vrot.lane.b32.xlu0 %v59_v7, %s73_s0 }
  0x74   :  { %v8_v8 = vpop.permute.xlu0 %7   ;;  %v20_v9 = vpop.permute.xlu1 %19  }
  0x75   :  { %10 = vst.msk [vmem:[#allocation0] sm:$0x1] %vm9_vm1, %v8_v8  }
  0x78   :  { %v14_v10 = vpop.permute.xlu0 %13   ;;  %v26_v11 = vpop.permute.xlu1 %25  }
  0x79   :  { %16 = vst.msk [vmem:[#allocation0] sm:$0x1] %vm15_vm2, %v14_v10  }
  0x7a   :  { %22 = vst.msk [vmem:[#allocation0] sm:$0x1] %vm21_vm3, %v20_v9  }
  0x7b   :  { %28 = vst.msk [vmem:[#allocation0] sm:$0x1] %vm27_vm4, %v26_v11  }
  0x7c   :  { %v32_v12 = vpop.permute.xlu0 %31   ;;  %v38_v13 = vpop.permute.xlu1 %37  }
  0x7d   :  { %34 = vst.msk [vmem:[#allocation0] sm:$0x1] %vm33_vm5, %v32_v12  }
  0x7e   :  { %40 = vst.msk [vmem:[#allocation0] sm:$0x1] %vm39_vm6, %v38_v13  }
  0x80   :  { %v44_v14 = vpop.permute.xlu0 %43  }
  0x81   :  { %46 = vst.msk [vmem:[#allocation0] sm:$0x1] %vm45_vm7, %v44_v14  }
  0x88   :  { %v50_v15 = vld [vmem:[#allocation0] sm:$0x1] }
  0x89   :  { %52 = vst [vmem:[%s112_s1] sm:$0x1] %v50_v15 }

// kernel: tile.38
= control target key start
LH: loop header
LB: loop body
LE: loop exit
PB: predicated region body
PF: predicated region fallthrough
CT: control target
= control target key end

     0   :  { %s28_s0 = inlined_call_operand.vmem [shape: f32[8], index: 0, kind: input, shape index: {}]   ;;  %s29_s1 = inlined_call_operand.vmem [shape: f32[16,8], index: 1, kind: output, shape index: {}]  }
   0x1   :  { %v4_v0 = vld [vmem:[%s28_s0] ss:$0 sm:$0xff] }
   0x2   :  { %5 = vst [vmem:[%s29_s1] sm:$0xff] %v4_v0  ;;  %8 = vst [vmem:[%s29_s1 + $0x8] sm:$0xff] %v4_v0 }

// kernel: tile.39
= control target key start
LH: loop header
LB: loop body
LE: loop exit
PB: predicated region body
PF: predicated region fallthrough
CT: control target
= control target key end

     0   :  { %s131_s10 = smov 120   ;;  %s132_s11 = smov 104   ;;  %vm3_vm0 = vcmask 64512   ;;  %vm9_vm1 = vcmask 1048512   ;;  %vm15_vm2 = vcmask 982912   ;;  %vm21_vm3 = vcmask 917312   ;;  %s207_s0 = inlined_call_operand.vmem [shape: f32[16,8], index: 0, kind: input, shape index: {}]   ;;  %s208_s1 = inlined_call_operand.vmem [shape: f32[1,128], index: 1, kind: output, shape index: {}]  }
   0x1   :  { %v101_v0 = vld [vmem:[%s207_s0 + $0xf] sm:$0x1]   ;;  %v103_v1 = vld [vmem:[%s207_s0 + $0xd] sm:$0x1]   ;;  %v102_v2 = vld [vmem:[%s207_s0 + $0xe] sm:$0x1]  }
   0x2   :  { %7 = vrot.lane.b32.xlu0 %v101_v0, %s131_s10  ;;  %19 = vrot.lane.b32.xlu1 %v103_v1, %s132_s11  ;;  %v104_v3 = vld [vmem:[%s207_s0 + $0xc] sm:$0x1]   ;;  %s133_s16 = smov 112   ;;  %s134_s17 = smov 96   ;;  %v105_v4 = vld [vmem:[%s207_s0 + $0xb] sm:$0x1]  }
   0x3   :  { %v106_v5 = vld [vmem:[%s207_s0 + $0xa] sm:$0x1]   ;;  %v2_v6 = vld [vmem:[%s207_s0] sm:$0x1]   ;;  %s135_s24 = smov 88   ;;  %s136_s25 = smov 80  }
   0x4   :  { %4 = vst.msk [vmem:[#allocation0] sm:$0x1] %vm3_vm0, %v2_v6   ;;  %v107_v7 = vld [vmem:[%s207_s0 + $0x9] sm:$0x1]   ;;  %v108_v8 = vld [vmem:[%s207_s0 + $0x8] sm:$0x1]  }
   0x5   :  { %s137_s30 = smov 72   ;;  %s138_s2 = smov 64   ;;  %v109_v9 = vld [vmem:[%s207_s0 + $0x7] sm:$0x1]   ;;  %v110_v10 = vld [vmem:[%s207_s0 + $0x6] sm:$0x1]  }
   0x6   :  { %13 = vrot.lane.b32.xlu0 %v102_v2, %s133_s16  ;;  %25 = vrot.lane.b32.xlu1 %v104_v3, %s134_s17  ;;  %s139_s7 = smov 56   ;;  %s140_s8 = smov 48   ;;  %v111_v11 = vld [vmem:[%s207_s0 + $0x5] sm:$0x1]   ;;  %v112_v12 = vld [vmem:[%s207_s0 + $0x4] sm:$0x1]  }
   0x7   :  { %s141_s13 = smov 40   ;;  %s142_s14 = smov 32   ;;  %v113_v13 = vld [vmem:[%s207_s0 + $0x3] sm:$0x1]   ;;  %v114_v14 = vld [vmem:[%s207_s0 + $0x2] sm:$0x1]  }
   0x8   :  { %s143_s19 = smov 24   ;;  %s144_s20 = smov 16   ;;  %v115_v15 = vld [vmem:[%s207_s0 + $0x1] sm:$0x1]   ;;  %vm27_vm4 = vcmask 851712   ;;  %vm33_vm5 = vcmask 786112  }
   0x9   :  { %s145_s0 = smov 8   ;;  %vm39_vm6 = vcmask 720512   ;;  %vm45_vm7 = vcmask 654912   ;;  %vm51_vm8 = vcmask 589312   ;;  %vm57_vm9 = vcmask 523712  }
   0xa   :  { %31 = vrot.lane.b32.xlu0 %v105_v4, %s135_s24  ;;  %37 = vrot.lane.b32.xlu1 %v106_v5, %s136_s25  ;;  %vm63_vm10 = vcmask 458112   ;;  %vm69_vm11 = vcmask 392512   ;;  %vm75_vm12 = vcmask 326912   ;;  %vm81_vm13 = vcmask 261312  }
   0xb   :  { %vm87_vm14 = vcmask 195712   ;;  %vm93_vm15 = vcmask 130112  }
   0xe   :  { %43 = vrot.lane.b32.xlu0 %v107_v7, %s137_s30  ;;  %49 = vrot.lane.b32.xlu1 %v108_v8, %s138_s2 }
  0x12   :  { %55 = vrot.lane.b32.xlu0 %v109_v9, %s139_s7  ;;  %61 = vrot.lane.b32.xlu1 %v110_v10, %s140_s8 }
  0x16   :  { %67 = vrot.lane.b32.xlu0 %v111_v11, %s141_s13  ;;  %73 = vrot.lane.b32.xlu1 %v112_v12, %s142_s14 }
  0x1a   :  { %79 = vrot.lane.b32.xlu0 %v113_v13, %s143_s19  ;;  %85 = vrot.lane.b32.xlu1 %v114_v14, %s144_s20 }
  0x1e   :  { %91 = vrot.lane.b32.xlu0 %v115_v15, %s145_s0 }
  0x74   :  { %v8_v16 = vpop.permute.xlu0 %7   ;;  %v20_v17 = vpop.permute.xlu1 %19  }
  0x75   :  { %10 = vst.msk [vmem:[#allocation0] sm:$0x1] %vm9_vm1, %v8_v16  }
  0x78   :  { %v14_v18 = vpop.permute.xlu0 %13   ;;  %v26_v19 = vpop.permute.xlu1 %25  }
  0x79   :  { %16 = vst.msk [vmem:[#allocation0] sm:$0x1] %vm15_vm2, %v14_v18  }
  0x7a   :  { %22 = vst.msk [vmem:[#allocation0] sm:$0x1] %vm21_vm3, %v20_v17  }
  0x7b   :  { %28 = vst.msk [vmem:[#allocation0] sm:$0x1] %vm27_vm4, %v26_v19  }
  0x7c   :  { %v32_v20 = vpop.permute.xlu0 %31   ;;  %v38_v21 = vpop.permute.xlu1 %37  }
  0x7d   :  { %34 = vst.msk [vmem:[#allocation0] sm:$0x1] %vm33_vm5, %v32_v20  }
  0x7e   :  { %40 = vst.msk [vmem:[#allocation0] sm:$0x1] %vm39_vm6, %v38_v21  }
  0x80   :  { %v44_v22 = vpop.permute.xlu0 %43   ;;  %v50_v23 = vpop.permute.xlu1 %49  }
  0x81   :  { %46 = vst.msk [vmem:[#allocation0] sm:$0x1] %vm45_vm7, %v44_v22  }
  0x82   :  { %52 = vst.msk [vmem:[#allocation0] sm:$0x1] %vm51_vm8, %v50_v23  }
  0x84   :  { %v56_v24 = vpop.permute.xlu0 %55   ;;  %v62_v25 = vpop.permute.xlu1 %61  }
  0x85   :  { %58 = vst.msk [vmem:[#allocation0] sm:$0x1] %vm57_vm9, %v56_v24  }
  0x86   :  { %64 = vst.msk [vmem:[#allocation0] sm:$0x1] %vm63_vm10, %v62_v25  }
  0x88   :  { %v68_v26 = vpop.permute.xlu0 %67   ;;  %v74_v27 = vpop.permute.xlu1 %73  }
  0x89   :  { %70 = vst.msk [vmem:[#allocation0] sm:$0x1] %vm69_vm11, %v68_v26  }
  0x8a   :  { %76 = vst.msk [vmem:[#allocation0] sm:$0x1] %vm75_vm12, %v74_v27  }
  0x8c   :  { %v80_v28 = vpop.permute.xlu0 %79   ;;  %v86_v29 = vpop.permute.xlu1 %85  }
  0x8d   :  { %82 = vst.msk [vmem:[#allocation0] sm:$0x1] %vm81_vm13, %v80_v28  }
  0x8e   :  { %88 = vst.msk [vmem:[#allocation0] sm:$0x1] %vm87_vm14, %v86_v29  }
  0x90   :  { %v92_v30 = vpop.permute.xlu0 %91  }
  0x91   :  { %94 = vst.msk [vmem:[#allocation0] sm:$0x1] %vm93_vm15, %v92_v30  }
  0x98   :  { %v98_v31 = vld [vmem:[#allocation0] sm:$0x1] }
  0x99   :  { %100 = vst [vmem:[%s208_s1] sm:$0x1] %v98_v31 }

// kernel: tile.69
= control target key start
LH: loop header
LB: loop body
LE: loop exit
PB: predicated region body
PF: predicated region fallthrough
CT: control target
= control target key end

     0   :  { %vm6_vm0 = vcmask 1043458   ;;  %vm10_vm1 = vcmask 1045508   ;;  %vm14_vm2 = vcmask 1047558   ;;  %s19_s6 = smov 3  ;;  %s22_s7 = smov 12  ;;  %vm16_vm3 = vcmask 64512   ;;  %s736_s0 = inlined_call_operand.vmem [shape: f32[16,8,8], index: 0, kind: input, shape index: {}]   ;;  %s737_s1 = inlined_call_operand.vmem [shape: f32[128,8], index: 1, kind: output, shape index: {}]  }
   0x1   :  { %v348_v0 = vld [vmem:[%s736_s0 + $0xf] ss:$16 sm:%s19_s6]   ;;  %s27_s12 = smov 48  ;;  %s32_s13 = smov 192  ;;  %vm38_vm4 = vcmask 1048512   ;;  %vm60_vm5 = vcmask 982912  }
   0x2   :  { %v349_v1 = vld [vmem:[%s736_s0 + $0xf] ss:$16 sm:%s22_s7]   ;;  %s63_s18 = smov 3  ;;  %s66_s21 = smov 12  ;;  %vm82_vm6 = vcmask 917312   ;;  %vm104_vm7 = vcmask 851712  }
   0x3   :  { %v25_v2 = vsel %vm6_vm0, %v349_v1, %v348_v0  ;;  %v350_v3 = vld [vmem:[%s736_s0 + $0xf] ss:$16 sm:%s27_s12]   ;;  %v356_v6 = vld [vmem:[%s736_s0 + $0xd] ss:$16 sm:%s63_s18]   ;;  %s71_s22 = smov 48  ;;  %s76_s27 = smov 192 }
   0x4   :  { %v351_v4 = vld [vmem:[%s736_s0 + $0xf] ss:$16 sm:%s32_s13]   ;;  %v30_v5 = vsel %vm10_vm1, %v350_v3, %v25_v2  ;;  %v357_v8 = vld [vmem:[%s736_s0 + $0xd] ss:$16 sm:%s66_s21]   ;;  %s423_s28 = smov 120   ;;  %s41_s2 = smov 3 }
   0x5   :  { %v35_v7 = vsel %vm14_vm2, %v351_v4, %v30_v5  ;;  %v358_v9 = vld [vmem:[%s736_s0 + $0xd] ss:$16 sm:%s71_s22]   ;;  %v69_v10 = vsel %vm6_vm0, %v357_v8, %v356_v6  ;;  %s44_s3 = smov 12  ;;  %v352_v13 = vld [vmem:[%s736_s0 + $0xe] ss:$16 sm:%s41_s2]   ;;  %s49_s8 = smov 48 }
   0x6   :  { %36 = vrot.lane.b32.xlu0 %v35_v7, %s423_s28  ;;  %v359_v11 = vld [vmem:[%s736_s0 + $0xd] ss:$16 sm:%s76_s27]   ;;  %v74_v12 = vsel %vm10_vm1, %v358_v9, %v69_v10  ;;  %s54_s9 = smov 192  ;;  %s85_s14 = smov 3  ;;  %vm126_vm8 = vcmask 786112   ;;  %vm148_vm9 = vcmask 720512  }
   0x7   :  { %v353_v14 = vld [vmem:[%s736_s0 + $0xe] ss:$16 sm:%s44_s3]   ;;  %v79_v15 = vsel %vm14_vm2, %v359_v11, %v74_v12  ;;  %s424_s15 = smov 104   ;;  %v360_v20 = vld [vmem:[%s736_s0 + $0xc] ss:$16 sm:%s85_s14]   ;;  %s88_s18 = smov 12 }
   0x8   :  { %v47_v16 = vsel %vm6_vm0, %v353_v14, %v352_v13  ;;  %v354_v17 = vld [vmem:[%s736_s0 + $0xe] ss:$16 sm:%s49_s8]   ;;  %80 = vrot.lane.b32.xlu1 %v79_v15, %s424_s15  ;;  %s93_s19 = smov 48  ;;  %s98_s24 = smov 192  ;;  %vm170_vm10 = vcmask 654912   ;;  %vm192_vm11 = vcmask 589312  }
   0x9   :  { %v355_v18 = vld [vmem:[%s736_s0 + $0xe] ss:$16 sm:%s54_s9]   ;;  %v52_v19 = vsel %vm10_vm1, %v354_v17, %v47_v16  ;;  %v361_v22 = vld [vmem:[%s736_s0 + $0xc] ss:$16 sm:%s88_s18]   ;;  %s425_s25 = smov 112   ;;  %s107_s28 = smov 3 }
   0xa   :  { %v57_v21 = vsel %vm14_vm2, %v355_v18, %v52_v19  ;;  %v362_v23 = vld [vmem:[%s736_s0 + $0xc] ss:$16 sm:%s93_s19]   ;;  %v91_v24 = vsel %vm6_vm0, %v361_v22, %v360_v20  ;;  %s110_s29 = smov 12  ;;  %v364_v27 = vld [vmem:[%s736_s0 + $0xb] ss:$16 sm:%s107_s28]   ;;  %s115_s5 = smov 48 }
   0xb   :  { %58 = vrot.lane.b32.xlu0 %v57_v21, %s425_s25  ;;  %v363_v25 = vld [vmem:[%s736_s0 + $0xc] ss:$16 sm:%s98_s24]   ;;  %v96_v26 = vsel %vm10_vm1, %v362_v23, %v91_v24  ;;  %s120_s6 = smov 192  ;;  %s129_s11 = smov 3  ;;  %vm214_vm12 = vcmask 523712   ;;  %vm236_vm13 = vcmask 458112  }
   0xc   :  { %v365_v28 = vld [vmem:[%s736_s0 + $0xb] ss:$16 sm:%s110_s29]   ;;  %v101_v29 = vsel %vm14_vm2, %v363_v25, %v96_v26  ;;  %s426_s12 = smov 96   ;;  %v368_v34 = vld [vmem:[%s736_s0 + $0xa] ss:$16 sm:%s129_s11]   ;;  %s132_s15 = smov 12 }
   0xd   :  { %v113_v30 = vsel %vm6_vm0, %v365_v28, %v364_v27  ;;  %v366_v31 = vld [vmem:[%s736_s0 + $0xb] ss:$16 sm:%s115_s5]   ;;  %102 = vrot.lane.b32.xlu1 %v101_v29, %s426_s12  ;;  %s137_s16 = smov 48  ;;  %s142_s21 = smov 192  ;;  %vm258_vm14 = vcmask 392512   ;;  %vm280_vm15 = vcmask 326912  }
   0xe   :  { %v367_v32 = vld [vmem:[%s736_s0 + $0xb] ss:$16 sm:%s120_s6]   ;;  %v118_v33 = vsel %vm10_vm1, %v366_v31, %v113_v30  ;;  %v369_v36 = vld [vmem:[%s736_s0 + $0xa] ss:$16 sm:%s132_s15]   ;;  %s427_s22 = smov 88   ;;  %s151_s25 = smov 3 }
   0xf   :  { %v123_v35 = vsel %vm14_vm2, %v367_v32, %v118_v33  ;;  %v370_v37 = vld [vmem:[%s736_s0 + $0xa] ss:$16 sm:%s137_s16]   ;;  %v135_v38 = vsel %vm6_vm0, %v369_v36, %v368_v34  ;;  %s154_s26 = smov 12  ;;  %v372_v41 = vld [vmem:[%s736_s0 + $0x9] ss:$16 sm:%s151_s25]   ;;  %s159_s2 = smov 48 }
  0x10   :  { %124 = vrot.lane.b32.xlu0 %v123_v35, %s427_s22  ;;  %v371_v39 = vld [vmem:[%s736_s0 + $0xa] ss:$16 sm:%s142_s21]   ;;  %v140_v40 = vsel %vm10_vm1, %v370_v37, %v135_v38  ;;  %s164_s3 = smov 192  ;;  %s173_s8 = smov 3 }
  0x11   :  { %v373_v42 = vld [vmem:[%s736_s0 + $0x9] ss:$16 sm:%s154_s26]   ;;  %v145_v43 = vsel %vm14_vm2, %v371_v39, %v140_v40  ;;  %s428_s9 = smov 80   ;;  %v376_v48 = vld [vmem:[%s736_s0 + $0x8] ss:$16 sm:%s173_s8]   ;;  %s176_s12 = smov 12 }
  0x12   :  { %v157_v44 = vsel %vm6_vm0, %v373_v42, %v372_v41  ;;  %v374_v45 = vld [vmem:[%s736_s0 + $0x9] ss:$16 sm:%s159_s2]   ;;  %146 = vrot.lane.b32.xlu1 %v145_v43, %s428_s9  ;;  %s181_s13 = smov 48  ;;  %s186_s18 = smov 192 }
  0x13   :  { %v375_v46 = vld [vmem:[%s736_s0 + $0x9] ss:$16 sm:%s164_s3]   ;;  %v162_v47 = vsel %vm10_vm1, %v374_v45, %v157_v44  ;;  %v377_v50 = vld [vmem:[%s736_s0 + $0x8] ss:$16 sm:%s176_s12]   ;;  %s429_s19 = smov 72   ;;  %s195_s22 = smov 3 }
  0x14   :  { %v167_v49 = vsel %vm14_vm2, %v375_v46, %v162_v47  ;;  %v378_v51 = vld [vmem:[%s736_s0 + $0x8] ss:$16 sm:%s181_s13]   ;;  %v179_v52 = vsel %vm6_vm0, %v377_v50, %v376_v48  ;;  %s198_s23 = smov 12  ;;  %v380_v55 = vld [vmem:[%s736_s0 + $0x7] ss:$16 sm:%s195_s22]   ;;  %s203_s28 = smov 48 }
  0x15   :  { %168 = vrot.lane.b32.xlu0 %v167_v49, %s429_s19  ;;  %v379_v53 = vld [vmem:[%s736_s0 + $0x8] ss:$16 sm:%s186_s18]   ;;  %v184_v54 = vsel %vm10_vm1, %v378_v51, %v179_v52  ;;  %s208_s29 = smov 192  ;;  %s217_s5 = smov 3 }
  0x16   :  { %v381_v56 = vld [vmem:[%s736_s0 + $0x7] ss:$16 sm:%s198_s23]   ;;  %v189_v57 = vsel %vm14_vm2, %v379_v53, %v184_v54  ;;  %s430_s6 = smov 64   ;;  %v384_v62 = vld [vmem:[%s736_s0 + $0x6] ss:$16 sm:%s217_s5]   ;;  %s220_s9 = smov 12 }
  0x17   :  { %v201_v58 = vsel %vm6_vm0, %v381_v56, %v380_v55  ;;  %v382_v59 = vld [vmem:[%s736_s0 + $0x7] ss:$16 sm:%s203_s28]   ;;  %190 = vrot.lane.b32.xlu1 %v189_v57, %s430_s6  ;;  %s225_s10 = smov 48  ;;  %s230_s15 = smov 192 }
  0x18   :  { %v383_v60 = vld [vmem:[%s736_s0 + $0x7] ss:$16 sm:%s208_s29]   ;;  %v206_v61 = vsel %vm10_vm1, %v382_v59, %v201_v58  ;;  %v385_v0 = vld [vmem:[%s736_s0 + $0x6] ss:$16 sm:%s220_s9]   ;;  %s431_s16 = smov 56   ;;  %s239_s19 = smov 3 }
  0x19   :  { %v211_v63 = vsel %vm14_vm2, %v383_v60, %v206_v61  ;;  %v386_v1 = vld [vmem:[%s736_s0 + $0x6] ss:$16 sm:%s225_s10]   ;;  %v223_v2 = vsel %vm6_vm0, %v385_v0, %v384_v62  ;;  %s242_s20 = smov 12  ;;  %v388_v5 = vld [vmem:[%s736_s0 + $0x5] ss:$16 sm:%s239_s19]   ;;  %s247_s25 = smov 48 }
  0x1a   :  { %212 = vrot.lane.b32.xlu0 %v211_v63, %s431_s16  ;;  %v387_v3 = vld [vmem:[%s736_s0 + $0x6] ss:$16 sm:%s230_s15]   ;;  %v228_v4 = vsel %vm10_vm1, %v386_v1, %v223_v2  ;;  %s252_s26 = smov 192  ;;  %s261_s2 = smov 3 }
  0x1b   :  { %v389_v6 = vld [vmem:[%s736_s0 + $0x5] ss:$16 sm:%s242_s20]   ;;  %v233_v7 = vsel %vm14_vm2, %v387_v3, %v228_v4  ;;  %s432_s3 = smov 48   ;;  %v392_v12 = vld [vmem:[%s736_s0 + $0x4] ss:$16 sm:%s261_s2]   ;;  %s264_s6 = smov 12 }
  0x1c   :  { %v245_v8 = vsel %vm6_vm0, %v389_v6, %v388_v5  ;;  %v390_v9 = vld [vmem:[%s736_s0 + $0x5] ss:$16 sm:%s247_s25]   ;;  %234 = vrot.lane.b32.xlu1 %v233_v7, %s432_s3  ;;  %s269_s7 = smov 48  ;;  %s274_s12 = smov 192 }
  0x1d   :  { %v391_v10 = vld [vmem:[%s736_s0 + $0x5] ss:$16 sm:%s252_s26]   ;;  %v250_v11 = vsel %vm10_vm1, %v390_v9, %v245_v8  ;;  %v393_v14 = vld [vmem:[%s736_s0 + $0x4] ss:$16 sm:%s264_s6]   ;;  %s433_s13 = smov 40   ;;  %s283_s16 = smov 3 }
  0x1e   :  { %v255_v13 = vsel %vm14_vm2, %v391_v10, %v250_v11  ;;  %v394_v15 = vld [vmem:[%s736_s0 + $0x4] ss:$16 sm:%s269_s7]   ;;  %v267_v16 = vsel %vm6_vm0, %v393_v14, %v392_v12  ;;  %s286_s17 = smov 12  ;;  %v396_v19 = vld [vmem:[%s736_s0 + $0x3] ss:$16 sm:%s283_s16]   ;;  %s291_s22 = smov 48 }
  0x1f   :  { %256 = vrot.lane.b32.xlu0 %v255_v13, %s433_s13  ;;  %v395_v17 = vld [vmem:[%s736_s0 + $0x4] ss:$16 sm:%s274_s12]   ;;  %v272_v18 = vsel %vm10_vm1, %v394_v15, %v267_v16  ;;  %s296_s23 = smov 192  ;;  %s305_s28 = smov 3 }
  0x20   :  { %v397_v20 = vld [vmem:[%s736_s0 + $0x3] ss:$16 sm:%s286_s17]   ;;  %v277_v21 = vsel %vm14_vm2, %v395_v17, %v272_v18  ;;  %s434_s29 = smov 32   ;;  %v400_v26 = vld [vmem:[%s736_s0 + $0x2] ss:$16 sm:%s305_s28]   ;;  %s308_s3 = smov 12 }
  0x21   :  { %v289_v22 = vsel %vm6_vm0, %v397_v20, %v396_v19  ;;  %v398_v23 = vld [vmem:[%s736_s0 + $0x3] ss:$16 sm:%s291_s22]   ;;  %278 = vrot.lane.b32.xlu1 %v277_v21, %s434_s29  ;;  %s313_s4 = smov 48  ;;  %s318_s9 = smov 192 }
  0x22   :  { %v399_v24 = vld [vmem:[%s736_s0 + $0x3] ss:$16 sm:%s296_s23]   ;;  %v294_v25 = vsel %vm10_vm1, %v398_v23, %v289_v22  ;;  %v401_v28 = vld [vmem:[%s736_s0 + $0x2] ss:$16 sm:%s308_s3]   ;;  %s435_s10 = smov 24   ;;  %s327_s13 = smov 3 }
  0x23   :  { %v299_v27 = vsel %vm14_vm2, %v399_v24, %v294_v25  ;;  %v402_v29 = vld [vmem:[%s736_s0 + $0x2] ss:$16 sm:%s313_s4]   ;;  %v311_v30 = vsel %vm6_vm0, %v401_v28, %v400_v26  ;;  %s330_s14 = smov 12  ;;  %v404_v33 = vld [vmem:[%s736_s0 + $0x1] ss:$16 sm:%s327_s13]   ;;  %s335_s19 = smov 48 }
  0x24   :  { %300 = vrot.lane.b32.xlu0 %v299_v27, %s435_s10  ;;  %v403_v31 = vld [vmem:[%s736_s0 + $0x2] ss:$16 sm:%s318_s9]   ;;  %v316_v32 = vsel %vm10_vm1, %v402_v29, %v311_v30  ;;  %s340_s20 = smov 192  ;;  %s2_s25 = smov 3 }
  0x25   :  { %v405_v34 = vld [vmem:[%s736_s0 + $0x1] ss:$16 sm:%s330_s14]   ;;  %v321_v35 = vsel %vm14_vm2, %v403_v31, %v316_v32  ;;  %s436_s26 = smov 16   ;;  %s4_s27 = smov 12  ;;  %v3_v40 = vld [vmem:[%s736_s0] ss:$16 sm:%s2_s25]  }
  0x26   :  { %v333_v36 = vsel %vm6_vm0, %v405_v34, %v404_v33  ;;  %v406_v37 = vld [vmem:[%s736_s0 + $0x1] ss:$16 sm:%s335_s19]   ;;  %322 = vrot.lane.b32.xlu1 %v321_v35, %s436_s26  ;;  %s8_s28 = smov 48  ;;  %s12_s2 = smov 192 }
  0x27   :  { %v407_v38 = vld [vmem:[%s736_s0 + $0x1] ss:$16 sm:%s340_s20]   ;;  %v338_v39 = vsel %vm10_vm1, %v406_v37, %v333_v36  ;;  %v5_v42 = vld [vmem:[%s736_s0] ss:$16 sm:%s4_s27]   ;;  %s437_s7 = smov 8  }
  0x28   :  { %v343_v41 = vsel %vm14_vm2, %v407_v38, %v338_v39  ;;  %v9_v43 = vld [vmem:[%s736_s0] ss:$16 sm:%s8_s28]   ;;  %v7_v44 = vsel %vm6_vm0, %v5_v42, %v3_v40  ;;  %vm302_vm0 = vcmask 261312  }
  0x29   :  { %344 = vrot.lane.b32.xlu0 %v343_v41, %s437_s7  ;;  %v13_v45 = vld [vmem:[%s736_s0] ss:$16 sm:%s12_s2]   ;;  %v11_v46 = vsel %vm10_vm1, %v9_v43, %v7_v44  ;;  %vm324_vm1 = vcmask 195712  }
  0x2a   :  { %v15_v47 = vsel %vm14_vm2, %v13_v45, %v11_v46  ;;  %vm346_vm2 = vcmask 130112  }
  0x2b   :  { %17 = vst.msk [vmem:[%s737_s1] sm:$0xff] %vm16_vm3, %v15_v47  }
  0x78   :  { %v37_v48 = vpop.permute.xlu0 %36  }
  0x79   :  { %39 = vst.msk [vmem:[%s737_s1] sm:$0xff] %vm38_vm4, %v37_v48  }
  0x7a   :  { %v81_v49 = vpop.permute.xlu1 %80  }
  0x7d   :  { %v59_v50 = vpop.permute.xlu0 %58  }
  0x7e   :  { %61 = vst.msk [vmem:[%s737_s1] sm:$0xff] %vm60_vm5, %v59_v50  }
  0x7f   :  { %83 = vst.msk [vmem:[%s737_s1] sm:$0xff] %vm82_vm6, %v81_v49   ;;  %v103_v51 = vpop.permute.xlu1 %102  }
  0x80   :  { %105 = vst.msk [vmem:[%s737_s1] sm:$0xff] %vm104_vm7, %v103_v51  }
  0x82   :  { %v125_v52 = vpop.permute.xlu0 %124  }
  0x83   :  { %127 = vst.msk [vmem:[%s737_s1] sm:$0xff] %vm126_vm8, %v125_v52  }
  0x84   :  { %v147_v53 = vpop.permute.xlu1 %146  }
  0x85   :  { %149 = vst.msk [vmem:[%s737_s1] sm:$0xff] %vm148_vm9, %v147_v53  }
  0x87   :  { %v169_v54 = vpop.permute.xlu0 %168  }
  0x88   :  { %171 = vst.msk [vmem:[%s737_s1] sm:$0xff] %vm170_vm10, %v169_v54  }
  0x89   :  { %v191_v55 = vpop.permute.xlu1 %190  }
  0x8a   :  { %193 = vst.msk [vmem:[%s737_s1] sm:$0xff] %vm192_vm11, %v191_v55  }
  0x8c   :  { %v213_v56 = vpop.permute.xlu0 %212  }
  0x8d   :  { %215 = vst.msk [vmem:[%s737_s1] sm:$0xff] %vm214_vm12, %v213_v56  }
  0x8e   :  { %v235_v57 = vpop.permute.xlu1 %234  }
  0x8f   :  { %237 = vst.msk [vmem:[%s737_s1] sm:$0xff] %vm236_vm13, %v235_v57  }
  0x91   :  { %v257_v58 = vpop.permute.xlu0 %256  }
  0x92   :  { %259 = vst.msk [vmem:[%s737_s1] sm:$0xff] %vm258_vm14, %v257_v58  }
  0x93   :  { %v279_v59 = vpop.permute.xlu1 %278  }
  0x94   :  { %281 = vst.msk [vmem:[%s737_s1] sm:$0xff] %vm280_vm15, %v279_v59  }
  0x96   :  { %v301_v60 = vpop.permute.xlu0 %300  }
  0x97   :  { %303 = vst.msk [vmem:[%s737_s1] sm:$0xff] %vm302_vm0, %v301_v60  }
  0x98   :  { %v323_v61 = vpop.permute.xlu1 %322  }
  0x99   :  { %325 = vst.msk [vmem:[%s737_s1] sm:$0xff] %vm324_vm1, %v323_v61  }
  0x9b   :  { %v345_v62 = vpop.permute.xlu0 %344  }
  0x9c   :  { %347 = vst.msk [vmem:[%s737_s1] sm:$0xff] %vm346_vm2, %v345_v62  }

// kernel: unet_block_forward.1
= control target key start
LH: loop header
LB: loop body
LE: loop exit
PB: predicated region body
PF: predicated region fallthrough
CT: control target
= control target key end

     0   :  { %v5699_v0 = vmov 0.0|0.0   ;;  %vm5700_vm0 = vmmov 0   ;;  %v5701_v4 = vmov 0.0   ;;  %vm451_vm1 = vcmask 261120   ;;  %s6948_s2 = inlined_call_operand.vmem [shape: f32[32,8], index: 2, kind: input, shape index: {}]   ;;  %s6949_s4 = inlined_call_operand.vmem [shape: bf16[3,64,128], index: 4, kind: input, shape index: {}]   ;;  %s6950_s0 = inlined_call_operand.vmem [shape: bf16[2,16,64], index: 0, kind: input, shape index: {}]   ;;  %s6951_s1 = inlined_call_operand.vmem [shape: f32[2,32], index: 1, kind: input, shape index: {}]   ;;  %s6952_s23 = inlined_call_operand.vmem [shape: f32[8,128], index: 23, kind: input, shape index: {}]   ;;  %s6953_s6 = inlined_call_operand.vmem [shape: bf16[3,128,128], index: 6, kind: input, shape index: {}]   ;;  %s6954_s3 = inlined_call_operand.vmem [shape: f32[1,8], index: 3, kind: input, shape index: {}]   ;;  %s6955_s22 = inlined_call_operand.vmem [shape: f32[128,8], index: 22, kind: input, shape index: {}]   ;;  %s6956_s5 = inlined_call_operand.vmem [shape: f32[1,128], index: 5, kind: input, shape index: {}]   ;;  %s6957_s7 = inlined_call_operand.vmem [shape: f32[1,128], index: 7, kind: input, shape index: {}]   ;;  %s6958_s8 = inlined_call_operand.vmem [shape: f32[1,8], index: 8, kind: input, shape index: {}]   ;;  %s6959_s9 = inlined_call_operand.vmem [shape: f32[1,8], index: 9, kind: input, shape index: {}]   ;;  %s6960_s10 = inlined_call_operand.vmem [shape: bf16[3,128,128], index: 10, kind: input, shape index: {}]   ;;  %s6961_s11 = inlined_call_operand.vmem [shape: f32[1,128], index: 11, kind: input, shape index: {}]   ;;  %s6962_s12 = inlined_call_operand.vmem [shape: f32[1,8], index: 12, kind: input, shape index: {}]   ;;  %s6963_s13 = inlined_call_operand.vmem [shape: f32[1,8], index: 13, kind: input, shape index: {}]   ;;  %s6964_s14 = inlined_call_operand.vmem [shape: bf16[3,128,128], index: 14, kind: input, shape index: {}]   ;;  %s6965_s15 = inlined_call_operand.vmem [shape: f32[1,128], index: 15, kind: input, shape index: {}]   ;;  %s6966_s16 = inlined_call_operand.vmem [shape: f32[1,8], index: 16, kind: input, shape index: {}]   ;;  %s6967_s17 = inlined_call_operand.vmem [shape: f32[1,8], index: 17, kind: input, shape index: {}]   ;;  %s6968_s18 = inlined_call_operand.vmem [shape: bf16[3,128,128], index: 18, kind: input, shape index: {}]   ;;  %s6969_s19 = inlined_call_operand.vmem [shape: f32[1,128], index: 19, kind: input, shape index: {}]   ;;  %s6970_s20 = inlined_call_operand.vmem [shape: f32[1,8], index: 20, kind: input, shape index: {}]   ;;  %s6971_s21 = inlined_call_operand.vmem [shape: f32[1,8], index: 21, kind: input, shape index: {}]   ;;  %s6972_s24 = inlined_call_operand.vmem [shape: bf16[4,16,32], index: 24, kind: input, shape index: {}]   ;;  %s6973_s25 = inlined_call_operand.vmem [shape: bf16[512,64], index: 25, kind: input, shape index: {}]   ;;  %s6974_s26 = inlined_call_operand.vmem [shape: f32[1,64], index: 26, kind: input, shape index: {}]   ;;  %s6975_s27 = inlined_call_operand.vmem [shape: f32[8,128], index: 27, kind: output, shape index: {}]  }
   0x1   :  { %6982 = sst [smem:[#allocation2_spill]] %s6948_s2  ;;  %5331 = vmatprep.subr.bf16.mxu1 %v5699_v0  ;;  %4891 = vmatprep.mubr.msk.f32.mxu1 %vm5700_vm0, %v5701_v4  ;;  %vm120_vm2 = vcmask 1040384   ;;  %vm121_vm3 = vsmask.f32 256  ;;  %vm135_vm5 = vsmask.f32 7424 }
   0x2   :  { %6983 = sst [smem:[#allocation3_spill]] %s6949_s4  ;;  %vm5885_vm4 = vmand %vm120_vm2, %vm121_vm3  ;;  %vm193_vm6 = vcmask 523264   ;;  %vm330_vm7 = vcmask 1046528   ;;  %vm527_vm8 = vcmask 64512   ;;  %v5574_v18 = vld [vmem:[%s6968_s18 + $0x8] sm:$0xff]  }
   0x3   :  { %6984 = sst [smem:[#allocation4_spill]] %s6950_s0 }
   0x4   :  { %6985 = sst [smem:[#allocation5_spill]] %s6951_s1  ;;  %s6996_s30 = sld [smem:[#allocation4_spill]] }
   0x5   :  { %6986 = sst [smem:[#allocation6_spill]] %s6952_s23  ;;  %s6994_s23 = sld [smem:[#allocation2_spill]] }
   0x6   :  { %6987 = sst [smem:[#allocation7_spill]] %s6953_s6  ;;  %s6997_s28 = sld [smem:[#allocation5_spill]] }
   0x7   :  { %6988 = sst [smem:[#allocation8_spill]] %s6954_s3  ;;  %s6995_s3 = sld [smem:[#allocation3_spill]] }
   0x8   :  { %6989 = sst [smem:[#allocation9_spill]] %s6955_s22  ;;  %s7000_s22 = sld [smem:[#allocation6_spill]] }
   0x9   :  { %6990 = sst [smem:[#allocation10_spill]] %s6956_s5  ;;  %s7003_s0 = sld [smem:[#allocation9_spill]] }
   0xa   :  { %6991 = sst [smem:[#allocation11_spill]] %s6957_s7  ;;  %v5483_v11 = vld [vmem:[%s6996_s30] sm:$0xff]   ;;  %v5485_v15 = vld [vmem:[%s6996_s30 + $0x8] sm:$0xff]   ;;  %s7001_s30 = sld [smem:[#allocation7_spill]] }
   0xb   :  { %6992 = sst [smem:[#allocation12_spill]] %s6958_s8  ;;  %v440_v1 = vld [vmem:[%s6994_s23] sm:$0xff]  ;;  %v441_v2 = vld [vmem:[%s6994_s23 + $0x8] sm:$0xff]  ;;  %v442_v3 = vld [vmem:[%s6994_s23 + $0x10] sm:$0xff]  ;;  %v103_v13 = vshrl.u32 %v5483_v11, 16  ;;  %v106_v14 = vshll.u32 %v5483_v11, 16 }
   0xc   :  { %6993 = sst [smem:[#allocation13_spill]] %s6959_s9  ;;  %v5332_v5 = vpack.c.bf16 %v441_v2, %v440_v1  ;;  %v443_v6 = vld [vmem:[%s6994_s23 + $0x18] sm:$0xff]  ;;  %v439_v12 = vld [vmem:[%s6997_s28] sm:$0x3]  ;;  %v110_v19 = vshrl.u32 %v5485_v15, 16  ;;  %v113_v20 = vshll.u32 %v5485_v15, 16 }
   0xd   :  { %v5479_v7 = vld [vmem:[%s6995_s3 + $0x20] sm:$0xff]   ;;  %v5335_v8 = vpack.c.bf16 %v443_v6, %v442_v3  ;;  %v5480_v9 = vld [vmem:[%s6995_s3 + $0x28] sm:$0xff]   ;;  %v5481_v10 = vld [vmem:[%s6995_s3 + $0x30] sm:$0xff]   ;;  %v105_v17 = vrot.slane %v103_v13, 7  ;;  %s7002_s28 = sld [smem:[#allocation8_spill]]  ;;  %s7004_s7 = sld [smem:[#allocation10_spill]] }
   0xe   :  { %5333 = vmatpush3.bf16.msra.mxu1 %v5332_v5  ;;  %4847 = vmatprep.subr.bf16.mxu0 %v5479_v7  ;;  %v5482_v16 = vld [vmem:[%s6995_s3 + $0x38] sm:$0xff]   ;;  %v112_v24 = vrot.slane %v110_v19, 7  ;;  %v5484_v26 = vld [vmem:[%s6995_s3] sm:$0xff]   ;;  %v5486_v42 = vld [vmem:[%s6995_s3 + $0x8] sm:$0xff]   ;;  %v605_v19 = vlaneseq  ;;  %s7007_s1 = sld [smem:[#allocation13_spill]] }
   0xf   :  { %5334 = vmatprep.subr.bf16.mxu1 %v5699_v0  ;;  %4848 = vmatpush3.bf16.msra.mxu0 %v5479_v7  ;;  %v108_v21 = vor.u32 %v106_v14, %v105_v17  ;;  %v125_v22 = vsel %vm5885_vm4, %v105_v17, 0  ;;  %v5487_v44 = vld [vmem:[%s6995_s3 + $0x10] sm:$0xff]   ;;  %v5488_v45 = vld [vmem:[%s6995_s3 + $0x18] sm:$0xff]   ;;  %v5489_v47 = vld [vmem:[%s6995_s3 + $0x40] sm:$0xff]  }
  0x10   :  { %4849 = vmatprep.subr.bf16.mxu0 %v5480_v9  ;;  %v144_v23 = vshll.u32 %v125_v22, 16  ;;  %v115_v29 = vor.u32 %v113_v20, %v112_v24  ;;  %v126_v30 = vsel %vm5885_vm4, %v112_v24, 0  ;;  %v332_v46 = vrot.slane %v125_v22, 1  ;;  %v5490_v49 = vld [vmem:[%s6995_s3 + $0x48] sm:$0xff]   ;;  %v5491_v51 = vld [vmem:[%s6995_s3 + $0x50] sm:$0xff]   ;;  %v5492_v52 = vld [vmem:[%s6995_s3 + $0x58] sm:$0xff]  }
  0x11   :  { %v123_v25 = vsel %vm5885_vm4, 0, %v108_v21  ;;  %v156_v34 = vshll.u32 %v126_v30, 16  ;;  %v335_v54 = vrot.slane %v126_v30, 1  ;;  %v5939_v56 = vld [vmem:[%s7000_s22] sm:$0xff]  ;;  %v5494_v63 = vld [vmem:[%s7001_s30 + $0x48] sm:$0xff]   ;;  %v5495_v6 = vld [vmem:[%s7001_s30 + $0x50] sm:$0xff]  }
  0x12   :  { %5336 = vmatpush3.bf16.msra.mxu1 %v5335_v8  ;;  %v137_v27 = vshrl.u32 %v123_v25, 16  ;;  %v139_v28 = vshll.u32 %v123_v25, 16  ;;  %v146_v32 = vrot.slane %v144_v23, 1  ;;  %v124_v33 = vsel %vm5885_vm4, 0, %v115_v29  ;;  %v5493_v57 = vld [vmem:[%s7001_s30 + $0x40] sm:$0xff]   ;;  %v5496_v7 = vld [vmem:[%s7001_s30 + $0x58] sm:$0xff]  }
  0x13   :  { %4894 = vmatprep.subr.mxu1 %v5701_v4  ;;  %4850 = vmatpush3.bf16.msra.mxu0 %v5480_v9  ;;  %v149_v35 = vshrl.u32 %v124_v33, 16  ;;  %v151_v36 = vshll.u32 %v124_v33, 16  ;;  %v158_v39 = vrot.slane %v156_v34, 1  ;;  %v331_v48 = vrot.slane %v123_v25, 1  ;;  %v4288_v58 = vld [vmem:[%s7002_s28] ss:$0 sm:$0xff] }
  0x14   :  { %4851 = vmatprep.subr.bf16.mxu0 %v5481_v10  ;;  %v141_v31 = vrot.slane %v139_v28, 1  ;;  %v334_v53 = vrot.slane %v124_v33, 1  ;;  %v5497_v8 = vld [vmem:[%s7001_s30 + $0x60] sm:$0xff]   ;;  %v5498_v9 = vld [vmem:[%s7001_s30 + $0x68] sm:$0xff]   ;;  %v5500_v11 = vld [vmem:[%s7001_s30 + $0x78] sm:$0xff]   ;;  %v5986_v21 = vshrl.u32 %v605_v19, 7 }
  0x15   :  { %4892 = vmatmul.mubr.msk.f32.vlgmr.msra.gmra.mrb[0].mxu1 %vm451_vm1, %v439_v12  ;;  %v153_v38 = vrot.slane %v151_v36, 1  ;;  %v333_v50 = vsel %vm330_vm7, %v331_v48, %v332_v46  ;;  %v5973_v12 = vld [vmem:[%s7001_s30] sm:$0xff]   ;;  %v639_v14 = vld [vmem:[%s7003_s0 + $0x8] sm:$0xff]  ;;  %v5508_v19 = vld [vmem:[%s7001_s30 + $0x38] sm:$0xff]   ;;  %s7005_s3 = sld [smem:[#allocation11_spill]] }
  0x16   :  { %4896 = vmatprep.mubr.msk.f32.mxu1 %vm5700_vm0, %v5701_v4  ;;  %v142_v37 = vor.u32 %v141_v31, %v137_v27  ;;  %v336_v55 = vsel %vm330_vm7, %v334_v53, %v335_v54  ;;  %4895 = vmatpush3.msra.mxu1 %v5939_v56  ;;  %v638_v13 = vld [vmem:[%s7003_s0] sm:$0xff] }
  0x17   :  { %4852 = vmatpush3.bf16.msra.mxu0 %v5481_v10  ;;  %v154_v41 = vor.u32 %v153_v38, %v149_v35  ;;  %4899 = vmatprep.subr.bf16.mxu1 %v5493_v57  ;;  %v5499_v10 = vld [vmem:[%s7001_s30 + $0x70] sm:$0xff]   ;;  %v5982_v15 = vpack.c.bf16 %v639_v14, %v638_v13  ;;  %v4287_v27 = vld [vmem:[%s7004_s7] ss:$0 sm:$0xff]  ;;  %v5504_v14 = vld [vmem:[%s7001_s30 + $0x18] sm:$0xff]   ;;  %s7006_s7 = sld [smem:[#allocation12_spill]] }
  0x18   :  { %4853 = vmatprep.subr.bf16.mxu0 %v5482_v16  ;;  %v147_v40 = vsel %vm135_vm5, %v142_v37, %v146_v32  ;;  %v5503_v13 = vld [vmem:[%s7001_s30 + $0x10] sm:$0xff]  }
  0x19   :  { %4855 = vmatprep.mubr.msk.bf16.mxu0 %vm193_vm6, %v147_v40  ;;  %v159_v43 = vsel %vm135_vm5, %v154_v41, %v158_v39 }
  0x1b   :  { %4854 = vmatpush3.bf16.msra.mxu0 %v5482_v16  ;;  %v5702_v16 = vmov 1966171168  }
  0x1c   :  { %4859 = vmatprep.subr.bf16.mxu0 %v5484_v26  ;;  %v603_v17 = vunpack.c.l.s4 %v5702_v16  ;;  %v5505_v16 = vld [vmem:[%s7001_s30 + $0x20] sm:$0xff]  }
  0x1e   :  { %4856 = vmatmul.mubr.msk.bf16.vlgmr.msra.gmra.mrb[0].mxu0 %vm193_vm6, %v159_v43  ;;  %v604_v20 = vunpack.c.0.s8 %v603_v17  ;;  %v5507_v17 = vld [vmem:[%s7001_s30 + $0x30] sm:$0xff]  }
  0x1f   :  { %4860 = vmatpush3.bf16.msra.mxu0 %v5484_v26  ;;  %4867 = vmatprep.mubr.msk.bf16.mxu0 %vm193_vm6, %v123_v25  ;;  %v5993_v25 = vsub.s32 0, %v5986_v21 }
  0x20   :  { %4861 = vmatprep.subr.bf16.mxu0 %v5486_v42  ;;  %v5989_v22 = vsub.s32 %v604_v20, %v5986_v21  ;;  %v5509_v20 = vld [vmem:[%s7001_s30 + $0x80] sm:$0xff]  }
  0x23   :  { %4862 = vmatpush3.bf16.msra.mxu0 %v5486_v42 }
  0x24   :  { %4863 = vmatprep.subr.bf16.mxu0 %v5487_v44 }
  0x27   :  { %4864 = vmatpush3.bf16.msra.mxu0 %v5487_v44 }
  0x28   :  { %4865 = vmatprep.subr.bf16.mxu0 %v5488_v45 }
  0x2b   :  { %4866 = vmatpush3.bf16.msra.mxu0 %v5488_v45 }
  0x2c   :  { %4871 = vmatprep.subr.bf16.mxu0 %v5489_v47 }
  0x2e   :  { %4868 = vmatmul.mubr.msk.bf16.vlgmr.msra.gmra.mrb[0].mxu0 %vm193_vm6, %v124_v33 }
  0x2f   :  { %4872 = vmatpush3.bf16.msra.mxu0 %v5489_v47  ;;  %4879 = vmatprep.mubr.msk.bf16.mxu0 %vm193_vm6, %v333_v50 }
  0x30   :  { %4873 = vmatprep.subr.bf16.mxu0 %v5490_v49 }
  0x33   :  { %4874 = vmatpush3.bf16.msra.mxu0 %v5490_v49 }
  0x34   :  { %4875 = vmatprep.subr.bf16.mxu0 %v5491_v51 }
  0x37   :  { %4876 = vmatpush3.bf16.msra.mxu0 %v5491_v51 }
  0x38   :  { %4877 = vmatprep.subr.bf16.mxu0 %v5492_v52 }
  0x3b   :  { %4878 = vmatpush3.bf16.msra.mxu0 %v5492_v52 }
  0x3c   :  { %5337 = vmatprep.subr.bf16.mxu0 %v5699_v0 }
  0x3e   :  { %4880 = vmatmul.mubr.msk.bf16.vlgmr.msra.gmra.mrb[0].mxu0 %vm193_vm6, %v336_v55 }
  0x3f   :  { %4991 = vmatprep.mubr.msk.f32.mxu0 %vm5700_vm0, %v5701_v4  ;;  %5339 = vmatpush3.bf16.msra.mxu0 %v5982_v15 }
  0x40   :  { %5340 = vmatprep.subr.bf16.mxu0 %v5699_v0 }
  0xe8   :  { %v521_v59 = vpop.f32.mrb[0].mxu1 }
  0xe9   :  { %v522_v60 = vadd.f32 %v4288_v58, %v521_v59  ;;  %v4893_v61 = vpop.f32.mrb[1].mxu1 }
  0xeb   :  { %v525_v62 = vmax.f32 %v522_v60, 0.0 }
  0xed   :  { %4897 = vmatmul.mubr.msk.f32.vlgmr.msra.gmra.mrb[2].mxu1 %vm527_vm8, %v525_v62 }
  0xee   :  { %4900 = vmatpush3.bf16.msra.mxu1 %v5493_v57 }
  0xef   :  { %4901 = vmatprep.subr.bf16.mxu1 %v5494_v63 }
  0xf2   :  { %4902 = vmatpush3.bf16.msra.mxu1 %v5494_v63 }
  0xf3   :  { %4903 = vmatprep.subr.bf16.mxu1 %v5495_v6 }
  0xf6   :  { %4904 = vmatpush3.bf16.msra.mxu1 %v5495_v6 }
  0xf7   :  { %4905 = vmatprep.subr.bf16.mxu1 %v5496_v7 }
  0xfa   :  { %4906 = vmatpush3.bf16.msra.mxu1 %v5496_v7 }
  0xfb   :  { %4907 = vmatprep.subr.bf16.mxu1 %v5497_v8 }
  0xfe   :  { %4908 = vmatpush3.bf16.msra.mxu1 %v5497_v8 }
  0xff   :  { %4909 = vmatprep.subr.bf16.mxu1 %v5498_v9 }
 0x102   :  { %4910 = vmatpush3.bf16.msra.mxu1 %v5498_v9 }
 0x103   :  { %4911 = vmatprep.subr.bf16.mxu1 %v5499_v10 }
 0x106   :  { %4912 = vmatpush3.bf16.msra.mxu1 %v5499_v10  ;;  %v5502_v10 = vld [vmem:[%s7001_s30 + $0x8] sm:$0xff]  }
 0x107   :  { %4913 = vmatprep.subr.bf16.mxu1 %v5500_v11 }
 0x10a   :  { %4914 = vmatpush3.bf16.msra.mxu1 %v5500_v11 }
 0x10b   :  { %4919 = vmatprep.subr.bf16.mxu1 %v5973_v12 }
 0x111   :  { %v4881_v1 = vpop.f32.mrb[0].mxu0 }
 0x112   :  { %v410_v2 = vpop.f32.mrb[1].mxu0  ;;  %v437_v34 = vadd.f32 %v4881_v1, %v4287_v27 }
 0x113   :  { %v4882_v3 = vpop.f32.mrb[2].mxu0  ;;  %v435_v30 = vadd.f32 %v4287_v27, %v410_v2 }
 0x114   :  { %v413_v5 = vpop.f32.mrb[3].mxu0  ;;  %v438_v35 = vadd.f32 %v4882_v3, %v4287_v27 }
 0x115   :  { %v436_v31 = vadd.f32 %v4287_v27, %v413_v5 }
 0x1c0   :  { %v597_v23 = vpop.f32.mrb[2].mxu1 }
 0x1c1   :  { %v608_v24 = vrot.slane %v597_v23, %v5989_v22  ;;  %v4898_v26 = vpop.f32.mrb[3].mxu1 }
 0x1c2   :  { %v5510_v26 = vld [vmem:[%s7001_s30 + $0x88] sm:$0xff]  }
 0x1c3   :  { %v609_v28 = vcombine.high %v608_v24, %v608_v24  ;;  %v616_v29 = vrot.slane %v608_v24, %v5989_v22 }
 0x1c5   :  { %v623_v32 = vrot.slane %v609_v28, %v5989_v22  ;;  %v627_v33 = vrot.slane %v616_v29, %v5993_v25  ;;  %v5511_v28 = vld [vmem:[%s7001_s30 + $0x90] sm:$0xff]   ;;  %v5512_v29 = vld [vmem:[%s7001_s30 + $0x98] sm:$0xff]  }
 0x1c7   :  { %v631_v36 = vrot.slane %v623_v32, %v5993_v25  ;;  %v6002_v37 = vadd.f32 %v627_v33, %v435_v30  ;;  %v6004_v38 = vadd.f32 %v627_v33, %v436_v31  ;;  %v5513_v30 = vld [vmem:[%s7001_s30 + $0xa0] sm:$0xff]   ;;  %v5514_v31 = vld [vmem:[%s7001_s30 + $0xa8] sm:$0xff]   ;;  %v5515_v32 = vld [vmem:[%s7001_s30 + $0xb0] sm:$0xff]  }
 0x1c8   :  { %v5516_v33 = vld [vmem:[%s7001_s30 + $0xb8] sm:$0xff]  }
 0x1c9   :  { %v6006_v39 = vadd.f32 %v631_v36, %v437_v34  ;;  %v6008_v40 = vadd.f32 %v631_v36, %v438_v35  ;;  %v660_v41 = vpack.c.bf16 %v6004_v38, %v6002_v37  ;;  %v640_v34 = vld [vmem:[%s7003_s0 + $0x10] sm:$0xff]  ;;  %v641_v35 = vld [vmem:[%s7003_s0 + $0x18] sm:$0xff] }
 0x1ca   :  { %v6083_v36 = vpack.c.bf16 %v641_v35, %v640_v34 }
 0x1cb   :  { %v661_v42 = vpack.c.bf16 %v6008_v40, %v6006_v39  ;;  %v663_v43 = vshrl.u32 %v660_v41, 16  ;;  %v666_v44 = vshll.u32 %v660_v41, 16  ;;  %v642_v41 = vld [vmem:[%s7003_s0 + $0x20] sm:$0xff] }
 0x1cc   :  { %5342 = vmatpush3.bf16.msra.mxu0 %v6083_v36 }
 0x1cd   :  { %v665_v45 = vrot.slane %v663_v43, 7  ;;  %v670_v46 = vshrl.u32 %v661_v42, 16  ;;  %v673_v47 = vshll.u32 %v661_v42, 16  ;;  %5343 = vmatprep.subr.bf16.mxu0 %v5699_v0  ;;  %v643_v42 = vld [vmem:[%s7003_s0 + $0x28] sm:$0xff] }
 0x1ce   :  { %v6095_v43 = vpack.c.bf16 %v643_v42, %v642_v41 }
 0x1cf   :  { %v668_v48 = vor.u32 %v666_v44, %v665_v45  ;;  %v682_v49 = vsel %vm5885_vm4, %v665_v45, 0  ;;  %v672_v50 = vrot.slane %v670_v46, 7  ;;  %v644_v44 = vld [vmem:[%s7003_s0 + $0x30] sm:$0xff]  ;;  %v645_v45 = vld [vmem:[%s7003_s0 + $0x38] sm:$0xff] }
 0x1d0   :  { %v708_v55 = vshll.u32 %v682_v49, 16  ;;  %v942_v24 = vrot.slane %v682_v49, 1  ;;  %5345 = vmatpush3.bf16.msra.mxu0 %v6095_v43  ;;  %v6107_v46 = vpack.c.bf16 %v645_v45, %v644_v44 }
 0x1d1   :  { %v680_v51 = vsel %vm5885_vm4, 0, %v668_v48  ;;  %v675_v52 = vor.u32 %v673_v47, %v672_v50  ;;  %v683_v53 = vsel %vm5885_vm4, %v672_v50, 0  ;;  %5346 = vmatprep.subr.bf16.mxu0 %v5699_v0  ;;  %v646_v47 = vld [vmem:[%s7003_s0 + $0x40] sm:$0xff]  ;;  %v647_v48 = vld [vmem:[%s7003_s0 + $0x48] sm:$0xff]  ;;  %v648_v50 = vld [vmem:[%s7003_s0 + $0x50] sm:$0xff] }
 0x1d2   :  { %v703_v54 = vshll.u32 %v680_v51, 16  ;;  %v701_v58 = vshrl.u32 %v680_v51, 16  ;;  %v720_v61 = vshll.u32 %v683_v53, 16  ;;  %v945_v63 = vrot.slane %v683_v53, 1  ;;  %v650_v53 = vld [vmem:[%s7003_s0 + $0x60] sm:$0xff] }
 0x1d3   :  { %v681_v57 = vsel %vm5885_vm4, 0, %v675_v52  ;;  %v710_v2 = vrot.slane %v708_v55, 1  ;;  %v941_v23 = vrot.slane %v680_v51, 1  ;;  %v6119_v49 = vpack.c.bf16 %v647_v48, %v646_v47 }
 0x1d4   :  { %v705_v59 = vrot.slane %v703_v54, 1  ;;  %v715_v60 = vshll.u32 %v681_v57, 16  ;;  %v944_v62 = vrot.slane %v681_v57, 1  ;;  %v713_v3 = vshrl.u32 %v681_v57, 16  ;;  %5348 = vmatpush3.bf16.msra.mxu0 %v6107_v46  ;;  %v651_v54 = vld [vmem:[%s7003_s0 + $0x68] sm:$0xff] }
 0x1d5   :  { %v722_v9 = vrot.slane %v720_v61, 1  ;;  %v943_v27 = vsel %vm330_vm7, %v941_v23, %v942_v24  ;;  %5349 = vmatprep.subr.bf16.mxu0 %v5699_v0  ;;  %v6140_v55 = vpack.c.bf16 %v651_v54, %v650_v53  ;;  %v655_v54 = vld [vmem:[%s7006_s7] sm:$0x1] }
 0x1d6   :  { %v706_v1 = vor.u32 %v705_v59, %v701_v58  ;;  %v717_v5 = vrot.slane %v715_v60, 1  ;;  %v946_v6 = vsel %vm330_vm7, %v944_v62, %v945_v63  ;;  %v653_v58 = vld [vmem:[%s7003_s0 + $0x78] sm:$0xff]  ;;  %v4347_v60 = vld [vmem:[%s7005_s3] ss:$0 sm:$0xff] }
 0x1d8   :  { %v711_v7 = vsel %vm135_vm5, %v706_v1, %v710_v2  ;;  %v718_v8 = vor.u32 %v717_v5, %v713_v3  ;;  %5351 = vmatpush3.bf16.msra.mxu0 %v6119_v49 }
 0x1d9   :  { %4915 = vmatprep.mubr.bf16.mxu1 %v711_v7  ;;  %5352 = vmatprep.subr.bf16.mxu0 %v5699_v0 }
 0x1da   :  { %v723_v11 = vsel %vm135_vm5, %v718_v8, %v722_v9 }
 0x1db   :  { %4916 = vmatmul.mubr.bf16.vlgmr.msra.gmra.mrb[4].mxu1 %v723_v11 }
 0x1dc   :  { %4920 = vmatpush3.bf16.msra.mxu1 %v5973_v12  ;;  %4935 = vmatprep.mubr.bf16.mxu1 %v680_v51  ;;  %v5506_v12 = vld [vmem:[%s7001_s30 + $0x28] sm:$0xff]   ;;  %v649_v51 = vld [vmem:[%s7003_s0 + $0x58] sm:$0xff] }
 0x1dd   :  { %4921 = vmatprep.subr.bf16.mxu1 %v5502_v10  ;;  %v6131_v52 = vpack.c.bf16 %v649_v51, %v648_v50 }
 0x1df   :  { %5354 = vmatpush3.bf16.msra.mxu0 %v6131_v52 }
 0x1e0   :  { %4922 = vmatpush3.bf16.msra.mxu1 %v5502_v10  ;;  %5355 = vmatprep.subr.bf16.mxu0 %v5699_v0 }
 0x1e1   :  { %4923 = vmatprep.subr.bf16.mxu1 %v5503_v13 }
 0x1e3   :  { %5357 = vmatpush3.bf16.msra.mxu0 %v6140_v55 }
 0x1e4   :  { %4924 = vmatpush3.bf16.msra.mxu1 %v5503_v13  ;;  %5358 = vmatprep.subr.bf16.mxu0 %v5699_v0 }
 0x1e5   :  { %4925 = vmatprep.subr.bf16.mxu1 %v5504_v14 }
 0x1e8   :  { %4926 = vmatpush3.bf16.msra.mxu1 %v5504_v14 }
 0x1e9   :  { %4927 = vmatprep.subr.bf16.mxu1 %v5505_v16 }
 0x1ec   :  { %4928 = vmatpush3.bf16.msra.mxu1 %v5505_v16 }
 0x1ed   :  { %4929 = vmatprep.subr.bf16.mxu1 %v5506_v12 }
 0x1f0   :  { %4930 = vmatpush3.bf16.msra.mxu1 %v5506_v12 }
 0x1f1   :  { %4931 = vmatprep.subr.bf16.mxu1 %v5507_v17 }
 0x1f4   :  { %4932 = vmatpush3.bf16.msra.mxu1 %v5507_v17 }
 0x1f5   :  { %4933 = vmatprep.subr.bf16.mxu1 %v5508_v19 }
 0x1f8   :  { %4934 = vmatpush3.bf16.msra.mxu1 %v5508_v19 }
 0x1f9   :  { %4939 = vmatprep.subr.bf16.mxu1 %v5509_v20 }
 0x1fb   :  { %4936 = vmatmul.mubr.bf16.vlgmr.msra.gmra.mrb[4].mxu1 %v681_v57  ;;  %v652_v57 = vld [vmem:[%s7003_s0 + $0x70] sm:$0xff] }
 0x1fc   :  { %4940 = vmatpush3.bf16.msra.mxu1 %v5509_v20  ;;  %4955 = vmatprep.mubr.bf16.mxu1 %v943_v27  ;;  %v6152_v59 = vpack.c.bf16 %v653_v58, %v652_v57  ;;  %v656_v58 = vld [vmem:[%s7007_s1] sm:$0x1] }
 0x1fd   :  { %4941 = vmatprep.subr.bf16.mxu1 %v5510_v26 }
 0x1fe   :  { %5360 = vmatpush3.bf16.msra.mxu0 %v6152_v59 }
 0x1ff   :  { %4994 = vmatprep.subr.mxu0 %v5701_v4 }
 0x200   :  { %4942 = vmatpush3.bf16.msra.mxu1 %v5510_v26 }
 0x201   :  { %4943 = vmatprep.subr.bf16.mxu1 %v5511_v28 }
 0x204   :  { %4944 = vmatpush3.bf16.msra.mxu1 %v5511_v28 }
 0x205   :  { %4945 = vmatprep.subr.bf16.mxu1 %v5512_v29 }
 0x208   :  { %4946 = vmatpush3.bf16.msra.mxu1 %v5512_v29 }
 0x209   :  { %4947 = vmatprep.subr.bf16.mxu1 %v5513_v30 }
 0x20c   :  { %4948 = vmatpush3.bf16.msra.mxu1 %v5513_v30 }
 0x20d   :  { %4949 = vmatprep.subr.bf16.mxu1 %v5514_v31 }
 0x210   :  { %4950 = vmatpush3.bf16.msra.mxu1 %v5514_v31 }
 0x211   :  { %4951 = vmatprep.subr.bf16.mxu1 %v5515_v32 }
 0x214   :  { %4952 = vmatpush3.bf16.msra.mxu1 %v5515_v32 }
 0x215   :  { %4953 = vmatprep.subr.bf16.mxu1 %v5516_v33 }
 0x218   :  { %4954 = vmatpush3.bf16.msra.mxu1 %v5516_v33 }
 0x219   :  { %5361 = vmatprep.subr.bf16.mxu1 %v5699_v0 }
 0x21b   :  { %4956 = vmatmul.mubr.bf16.vlgmr.msra.gmra.mrb[4].mxu1 %v946_v6 }
 0x21c   :  { %5363 = vmatpush3.bf16.msra.mxu1 %v5982_v15  ;;  %5091 = vmatprep.mubr.msk.f32.mxu1 %vm5700_vm0, %v5701_v4 }
 0x21d   :  { %5364 = vmatprep.subr.bf16.mxu1 %v5699_v0 }
 0x220   :  { %5366 = vmatpush3.bf16.msra.mxu1 %v6083_v36 }
 0x221   :  { %5367 = vmatprep.subr.bf16.mxu1 %v5699_v0 }
 0x224   :  { %5369 = vmatpush3.bf16.msra.mxu1 %v6095_v43 }
 0x225   :  { %5370 = vmatprep.subr.bf16.mxu1 %v5699_v0 }
 0x228   :  { %5372 = vmatpush3.bf16.msra.mxu1 %v6107_v46 }
 0x229   :  { %5373 = vmatprep.subr.bf16.mxu1 %v5699_v0 }
 0x22c   :  { %5375 = vmatpush3.bf16.msra.mxu1 %v6119_v49 }
 0x22d   :  { %5376 = vmatprep.subr.bf16.mxu1 %v5699_v0 }
 0x230   :  { %5378 = vmatpush3.bf16.msra.mxu1 %v6131_v52 }
 0x231   :  { %5379 = vmatprep.subr.bf16.mxu1 %v5699_v0 }
 0x234   :  { %5381 = vmatpush3.bf16.msra.mxu1 %v6140_v55 }
 0x235   :  { %5382 = vmatprep.subr.bf16.mxu1 %v5699_v0 }
 0x238   :  { %5384 = vmatpush3.bf16.msra.mxu1 %v6152_v59 }
 0x239   :  { %5094 = vmatprep.subr.mxu1 %v5701_v4 }
 0x2ee   :  { %v4957_v61 = vpop.f32.mrb[4].mxu1 }
 0x2ef   :  { %v1048_v62 = vpop.f32.mrb[5].mxu1  ;;  %v6166_v3 = vadd.f32 %v4957_v61, %v4347_v60 }
 0x2f0   :  { %v6164_v63 = vadd.f32 %v4347_v60, %v1048_v62  ;;  %v4958_v1 = vpop.f32.mrb[6].mxu1 }
 0x2f1   :  { %v1051_v2 = vpop.f32.mrb[7].mxu1  ;;  %v6172_v7 = vadd.f32 %v4958_v1, %v4347_v60  ;;  %v1088_v10 = vmul.f32 %v6166_v3, %v6166_v3 }
 0x2f2   :  { %v6168_v5 = vadd.f32 %v4347_v60, %v1051_v2  ;;  %v1086_v6 = vmul.f32 %v6164_v63, %v6164_v63  ;;  %v5517_v2 = vld [vmem:[%s6960_s10 + $0x40] sm:$0xff]  }
 0x2f3   :  { %v1089_v14 = vmul.f32 %v6172_v7, %v6172_v7 }
 0x2f4   :  { %v1077_v8 = vadd.f32 %v6168_v5, %v6164_v63  ;;  %v1087_v9 = vmul.f32 %v6168_v5, %v6168_v5 }
 0x2f6   :  { %v1078_v11 = vadd.f32 %v1077_v8, %v6166_v3  ;;  %v1090_v13 = vadd.f32 %v1087_v9, %v1086_v6  ;;  %v5518_v6 = vld [vmem:[%s6960_s10 + $0x48] sm:$0xff]   ;;  %v5519_v8 = vld [vmem:[%s6960_s10 + $0x50] sm:$0xff]   ;;  %v5520_v9 = vld [vmem:[%s6960_s10 + $0x58] sm:$0xff]  }
 0x2f8   :  { %v1079_v16 = vadd.f32 %v1078_v11, %v6172_v7  ;;  %v1091_v12 = vadd.f32 %v1090_v13, %v1088_v10  ;;  %v5521_v10 = vld [vmem:[%s6960_s10 + $0x60] sm:$0xff]   ;;  %v5522_v11 = vld [vmem:[%s6960_s10 + $0x68] sm:$0xff]   ;;  %v5523_v13 = vld [vmem:[%s6960_s10 + $0x70] sm:$0xff]  }
 0x2fa   :  { %v1080_v17 = vrot.slane %v1079_v16, 4  ;;  %v1092_v19 = vadd.f32 %v1091_v12, %v1089_v14  ;;  %v5524_v14 = vld [vmem:[%s6960_s10 + $0x78] sm:$0xff]   ;;  %v6230_v12 = vsub.s32 1, %v5986_v21 }
 0x2fc   :  { %v1081_v20 = vadd.f32 %v1080_v17, %v1079_v16  ;;  %v1093_v23 = vrot.slane %v1092_v19, 4  ;;  %v6226_v16 = vld [vmem:[%s6960_s10] sm:$0xff]  }
 0x2fe   :  { %v1082_v24 = vrot.slane %v1081_v20, 2  ;;  %v1094_v26 = vadd.f32 %v1093_v23, %v1092_v19 }
 0x300   :  { %v1083_v27 = vadd.f32 %v1082_v24, %v1081_v20  ;;  %v1095_v28 = vrot.slane %v1094_v26, 2 }
 0x302   :  { %v1084_v29 = vrot.slane %v1083_v27, 1  ;;  %v1096_v30 = vadd.f32 %v1095_v28, %v1094_v26 }
 0x304   :  { %v1097_v31 = vrot.slane %v1096_v30, 1  ;;  %v1085_v32 = vadd.f32 %v1084_v29, %v1083_v27 }
 0x306   :  { %v1098_v33 = vadd.f32 %v1097_v31, %v1096_v30 }
 0x308   :  { %v1100_v34 = vsel %vm120_vm2, %v1085_v32, %v1098_v33 }
 0x309   :  { %4992 = vmatmul.mubr.f32.vlgmr.msra.gmra.mrb[4].mxu0 %v1100_v34 }
 0x30a   :  { %4995 = vmatpush3.msra.mxu0 %v5939_v56  ;;  %4996 = vmatprep.mubr.msk.f32.mxu0 %vm5700_vm0, %v5701_v4 }
 0x30b   :  { %4999 = vmatprep.subr.bf16.mxu0 %v5517_v2 }
 0x3dc   :  { %v1167_v35 = vpop.f32.mrb[4].mxu0 }
 0x3dd   :  { %v1171_v41 = vmul.f32 0.001953125, %v1167_v35  ;;  %v4993_v42 = vpop.f32.mrb[5].mxu0 }
 0x3df   :  { %v1172_v44 = vmul.f32 %v1171_v41, %v1171_v41 }
 0x3e1   :  { %v1174_v45 = vrot.slane %v1172_v44, 7 }
 0x3e3   :  { %v1176_v47 = vsub.f32 %v1171_v41, %v1174_v45 }
 0x3e5   :  { %v1177_v48 = vadd.f32 1e-05, %v1176_v47 }
 0x3e7   :  { %5625 = vrsqrt.f32 %v1177_v48 }
 0x3f1   :  { %v5626_v50 = vpop.eup %5625 }
 0x3f2   :  { %v1186_v51 = vrot.slane %v5626_v50, %v5989_v22 }
 0x3f4   :  { %v1187_v53 = vcombine.high %v1186_v51, %v1186_v51 }
 0x3f6   :  { %v1194_v56 = vrot.slane %v1187_v53, %v5989_v22 }
 0x3f8   :  { %v1196_v57 = vmul.f32 %v1194_v56, %v655_v54 }
 0x3fa   :  { %v1197_v60 = vmul.f32 %v1196_v57, %v1171_v41 }
 0x3fc   :  { %v1198_v61 = vsub.f32 %v656_v58, %v1197_v60 }
 0x3fe   :  { %v1203_v62 = vrot.slane %v1198_v61, %v5993_v25 }
 0x400   :  { %v1205_v1 = vsel %vm120_vm2, %v1196_v57, %v1203_v62 }
 0x401   :  { %4997 = vmatmul.mubr.msk.f32.vlgmr.msra.gmra.mrb[6].mxu0 %vm527_vm8, %v1205_v1 }
 0x402   :  { %5000 = vmatpush3.bf16.msra.mxu0 %v5517_v2 }
 0x403   :  { %5001 = vmatprep.subr.bf16.mxu0 %v5518_v6 }
 0x406   :  { %5002 = vmatpush3.bf16.msra.mxu0 %v5518_v6 }
 0x407   :  { %5003 = vmatprep.subr.bf16.mxu0 %v5519_v8 }
 0x40a   :  { %5004 = vmatpush3.bf16.msra.mxu0 %v5519_v8 }
 0x40b   :  { %5005 = vmatprep.subr.bf16.mxu0 %v5520_v9 }
 0x40e   :  { %5006 = vmatpush3.bf16.msra.mxu0 %v5520_v9 }
 0x40f   :  { %5007 = vmatprep.subr.bf16.mxu0 %v5521_v10 }
 0x412   :  { %5008 = vmatpush3.bf16.msra.mxu0 %v5521_v10 }
 0x413   :  { %5009 = vmatprep.subr.bf16.mxu0 %v5522_v11 }
 0x416   :  { %5010 = vmatpush3.bf16.msra.mxu0 %v5522_v11 }
 0x417   :  { %5011 = vmatprep.subr.bf16.mxu0 %v5523_v13 }
 0x41a   :  { %5012 = vmatpush3.bf16.msra.mxu0 %v5523_v13 }
 0x41b   :  { %5013 = vmatprep.subr.bf16.mxu0 %v5524_v14 }
 0x41e   :  { %5014 = vmatpush3.bf16.msra.mxu0 %v5524_v14 }
 0x41f   :  { %5019 = vmatprep.subr.bf16.mxu0 %v6226_v16 }
 0x4d4   :  { %v1275_v17 = vpop.f32.mrb[6].mxu0 }
 0x4d5   :  { %v1282_v19 = vrot.slane %v1275_v17, %v5993_v25  ;;  %v4998_v20 = vpop.f32.mrb[7].mxu0  ;;  %v1290_v23 = vrot.slane %v1275_v17, %v6230_v12 }
 0x4d7   :  { %v1283_v24 = vmul.f32 %v1282_v19, %v6164_v63  ;;  %v1284_v26 = vmul.f32 %v1282_v19, %v6168_v5  ;;  %v1285_v27 = vmul.f32 %v1282_v19, %v6166_v3  ;;  %v1286_v28 = vmul.f32 %v1282_v19, %v6172_v7 }
 0x4d9   :  { %v6238_v29 = vadd.f32 %v1290_v23, %v1283_v24  ;;  %v6240_v30 = vadd.f32 %v1290_v23, %v1284_v26  ;;  %v6242_v21 = vadd.f32 %v1290_v23, %v1285_v27  ;;  %v6244_v31 = vadd.f32 %v1290_v23, %v1286_v28 }
 0x4db   :  { %v6247_v32 = vmul.f32 0.70710677, %v6238_v29  ;;  %v6250_v33 = vmul.f32 0.70710677, %v6240_v30  ;;  %v6253_v63 = vmul.f32 0.70710677, %v6242_v21 }
 0x4dc   :  { %v6256_v3 = vmul.f32 0.70710677, %v6244_v31 }
 0x4dd   :  { %v1311_v5 = vand.u32 2147483647, %v6247_v32  ;;  %v1312_v7 = vand.u32 2147483647, %v6250_v33  ;;  %v1313_v34 = vand.u32 2147483647, %v6253_v63 }
 0x4de   :  { %v1314_v35 = vand.u32 2147483647, %v6256_v3  ;;  %vm1303_vm9 = vcmp.ge.f32.partialorder %v6247_v32, 0.0  ;;  %vm1304_vm10 = vcmp.ge.f32.partialorder %v6250_v33, 0.0  ;;  %vm1305_vm11 = vcmp.ge.f32.partialorder %v6253_v63, 0.0 }
 0x4df   :  { %v1315_v41 = vmul.f32 0.3275911, %v1311_v5  ;;  %v1316_v42 = vmul.f32 0.3275911, %v1312_v7  ;;  %v1317_v44 = vmul.f32 0.3275911, %v1313_v34 }
 0x4e0   :  { %v1318_v45 = vmul.f32 0.3275911, %v1314_v35  ;;  %v1375_v60 = vsub.f32 0.0, %v1311_v5  ;;  %v1376_v2 = vsub.f32 0.0, %v1312_v7  ;;  %v1377_v9 = vsub.f32 0.0, %v1313_v34 }
 0x4e1   :  { %v1319_v47 = vadd.f32 1.0, %v1315_v41  ;;  %v1320_v48 = vadd.f32 1.0, %v1316_v42  ;;  %v1321_v50 = vadd.f32 1.0, %v1317_v44  ;;  %v1378_v13 = vsub.f32 0.0, %v1314_v35 }
 0x4e2   :  { %v1322_v51 = vadd.f32 1.0, %v1318_v45  ;;  %v1379_v19 = vmul.f32 %v1375_v60, %v1311_v5  ;;  %v1380_v24 = vmul.f32 %v1376_v2, %v1312_v7  ;;  %v1381_v28 = vmul.f32 %v1377_v9, %v1313_v34 }
 0x4e3   :  { %5627 = vrcp.f32 %v1319_v47  ;;  %v1382_v44 = vmul.f32 %v1378_v13, %v1314_v35  ;;  %vm1306_vm12 = vcmp.ge.f32.partialorder %v6256_v3, 0.0  ;;  %v1296_v3 = vmul.f32 0.5, %v6240_v30 }
 0x4e4   :  { %5629 = vrcp.f32 %v1320_v48 }
 0x4e5   :  { %5631 = vrcp.f32 %v1321_v50 }
 0x4e6   :  { %5633 = vrcp.f32 %v1322_v51 }
 0x4ed   :  { %v5628_v53 = vpop.eup %5627 }
 0x4ee   :  { %v5630_v54 = vpop.eup %5629  ;;  %v1327_v56 = vmul.f32 %v5628_v53, %v1319_v47 }
 0x4ef   :  { %v5632_v57 = vpop.eup %5631  ;;  %v1328_v58 = vmul.f32 %v5630_v54, %v1320_v48  ;;  %v1383_v48 = vmul.f32 1.442695, %v1379_v19 }
 0x4f0   :  { %v5634_v61 = vpop.eup %5633  ;;  %v1329_v62 = vmul.f32 %v5632_v57, %v1321_v50  ;;  %v1331_v1 = vsub.f32 2.0, %v1327_v56  ;;  %v1385_v56 = vmul.f32 1.442695, %v1380_v24 }
 0x4f1   :  { %v1330_v6 = vmul.f32 %v5634_v61, %v1322_v51  ;;  %v1332_v8 = vsub.f32 2.0, %v1328_v58  ;;  %5635 = vpow2.f32 %v1383_v48 }
 0x4f2   :  { %v1333_v10 = vsub.f32 2.0, %v1329_v62  ;;  %v1335_v11 = vmul.f32 %v5628_v53, %v1331_v1  ;;  %v1387_v62 = vmul.f32 1.442695, %v1381_v28  ;;  %5637 = vpow2.f32 %v1385_v56 }
 0x4f3   :  { %v1334_v14 = vsub.f32 2.0, %v1330_v6  ;;  %v1336_v17 = vmul.f32 %v5630_v54, %v1332_v8 }
 0x4f4   :  { %v1337_v20 = vmul.f32 %v5632_v57, %v1333_v10  ;;  %v1339_v23 = vmul.f32 1.0614054, %v1335_v11  ;;  %v1389_v57 = vmul.f32 1.442695, %v1382_v44  ;;  %5639 = vpow2.f32 %v1387_v62 }
 0x4f5   :  { %v1338_v26 = vmul.f32 %v5634_v61, %v1334_v14  ;;  %v1340_v27 = vmul.f32 1.0614054, %v1336_v17 }
 0x4f6   :  { %v1341_v41 = vmul.f32 1.0614054, %v1337_v20  ;;  %v1343_v42 = vadd.f32 -1.4531521, %v1339_v23  ;;  %5641 = vpow2.f32 %v1389_v57 }
 0x4f7   :  { %v1342_v45 = vmul.f32 1.0614054, %v1338_v26  ;;  %v1344_v47 = vadd.f32 -1.4531521, %v1340_v27 }
 0x4f8   :  { %v1345_v50 = vadd.f32 -1.4531521, %v1341_v41  ;;  %v1347_v51 = vmul.f32 %v1343_v42, %v1335_v11 }
 0x4f9   :  { %v1346_v53 = vadd.f32 -1.4531521, %v1342_v45  ;;  %v1348_v58 = vmul.f32 %v1344_v47, %v1336_v17 }
 0x4fa   :  { %v1349_v54 = vmul.f32 %v1345_v50, %v1337_v20  ;;  %v1351_v5 = vadd.f32 1.4214138, %v1347_v51 }
 0x4fb   :  { %v1350_v60 = vmul.f32 %v1346_v53, %v1338_v26  ;;  %v1352_v7 = vadd.f32 1.4214138, %v1348_v58  ;;  %v5636_v44 = vpop.eup %5635 }
 0x4fc   :  { %v1353_v61 = vadd.f32 1.4214138, %v1349_v54  ;;  %v1355_v34 = vmul.f32 %v1351_v5, %v1335_v11  ;;  %v5638_v48 = vpop.eup %5637 }
 0x4fd   :  { %v1354_v1 = vadd.f32 1.4214138, %v1350_v60  ;;  %v1356_v35 = vmul.f32 %v1352_v7, %v1336_v17 }
 0x4fe   :  { %v1357_v2 = vmul.f32 %v1353_v61, %v1337_v20  ;;  %v1359_v6 = vadd.f32 -0.28449672, %v1355_v34  ;;  %v5640_v56 = vpop.eup %5639  ;;  %v1295_v34 = vmul.f32 0.5, %v6238_v29 }
 0x4ff   :  { %v1358_v8 = vmul.f32 %v1354_v1, %v1338_v26  ;;  %v1360_v9 = vadd.f32 -0.28449672, %v1356_v35 }
 0x500   :  { %v1361_v10 = vadd.f32 -0.28449672, %v1357_v2  ;;  %v1363_v13 = vmul.f32 %v1359_v6, %v1335_v11  ;;  %v5642_v62 = vpop.eup %5641 }
 0x501   :  { %v1362_v14 = vadd.f32 -0.28449672, %v1358_v8  ;;  %v1364_v19 = vmul.f32 %v1360_v9, %v1336_v17  ;;  %v1297_v8 = vmul.f32 0.5, %v6242_v21 }
 0x502   :  { %v1365_v23 = vmul.f32 %v1361_v10, %v1337_v20  ;;  %v1367_v24 = vadd.f32 0.2548296, %v1363_v13  ;;  %v1298_v13 = vmul.f32 0.5, %v6244_v31 }
 0x503   :  { %v1366_v27 = vmul.f32 %v1362_v14, %v1338_v26  ;;  %v1368_v28 = vadd.f32 0.2548296, %v1364_v19 }
 0x504   :  { %v1369_v41 = vadd.f32 0.2548296, %v1365_v23  ;;  %v1371_v42 = vmul.f32 %v1367_v24, %v1335_v11  ;;  %v5703_v11 = vmov -1.0  }
 0x505   :  { %v1370_v45 = vadd.f32 0.2548296, %v1366_v27  ;;  %v1372_v47 = vmul.f32 %v1368_v28, %v1336_v17  ;;  %v1307_v17 = vsel %vm1303_vm9, 1.0, %v5703_v11  ;;  %v1308_v32 = vsel %vm1304_vm10, 1.0, %v5703_v11 }
 0x506   :  { %v1373_v50 = vmul.f32 %v1369_v41, %v1337_v20  ;;  %v1391_v51 = vmul.f32 %v5636_v44, %v1371_v42  ;;  %v1309_v33 = vsel %vm1305_vm11, 1.0, %v5703_v11  ;;  %v1310_v63 = vsel %vm1306_vm12, 1.0, %v5703_v11 }
 0x507   :  { %v1374_v53 = vmul.f32 %v1370_v45, %v1338_v26  ;;  %v1392_v58 = vmul.f32 %v5638_v48, %v1372_v47 }
 0x508   :  { %v1393_v54 = vmul.f32 %v5640_v56, %v1373_v50  ;;  %v1395_v5 = vsub.f32 1.0, %v1391_v51 }
 0x509   :  { %v1394_v57 = vmul.f32 %v5642_v62, %v1374_v53  ;;  %v1396_v60 = vsub.f32 1.0, %v1392_v58 }
 0x50a   :  { %v1397_v20 = vsub.f32 1.0, %v1393_v54  ;;  %v1399_v7 = vmul.f32 %v1395_v5, %v1307_v17 }
 0x50b   :  { %v1398_v26 = vsub.f32 1.0, %v1394_v57  ;;  %v1400_v61 = vmul.f32 %v1396_v60, %v1308_v32 }
 0x50c   :  { %v1401_v1 = vmul.f32 %v1397_v20, %v1309_v33  ;;  %v1403_v35 = vadd.f32 1.0, %v1399_v7 }
 0x50d   :  { %v1402_v2 = vmul.f32 %v1398_v26, %v1310_v63  ;;  %v1404_v6 = vadd.f32 1.0, %v1400_v61  ;;  %v5526_v63 = vld [vmem:[%s6960_s10 + $0x8] sm:$0xff]  }
 0x50e   :  { %v1405_v9 = vadd.f32 1.0, %v1401_v1  ;;  %v1407_v10 = vmul.f32 %v1403_v35, %v1295_v34  ;;  %v5527_v35 = vld [vmem:[%s6960_s10 + $0x10] sm:$0xff]  }
 0x50f   :  { %v1406_v14 = vadd.f32 1.0, %v1402_v2  ;;  %v1408_v19 = vmul.f32 %v1404_v6, %v1296_v3  ;;  %v5528_v3 = vld [vmem:[%s6960_s10 + $0x18] sm:$0xff]   ;;  %v5529_v2 = vld [vmem:[%s6960_s10 + $0x20] sm:$0xff]   ;;  %v5531_v6 = vld [vmem:[%s6960_s10 + $0x30] sm:$0xff]  }
 0x510   :  { %v1409_v23 = vmul.f32 %v1405_v9, %v1297_v8  ;;  %v5532_v8 = vld [vmem:[%s6960_s10 + $0x38] sm:$0xff]   ;;  %v5533_v9 = vld [vmem:[%s6960_s10 + $0x80] sm:$0xff]  }
 0x511   :  { %v1410_v24 = vmul.f32 %v1406_v14, %v1298_v13  ;;  %v1411_v27 = vpack.c.bf16 %v1408_v19, %v1407_v10  ;;  %v5534_v14 = vld [vmem:[%s6960_s10 + $0x88] sm:$0xff]  }
 0x513   :  { %v1414_v29 = vshrl.u32 %v1411_v27, 16  ;;  %v1412_v28 = vpack.c.bf16 %v1410_v24, %v1409_v23  ;;  %v1417_v42 = vshll.u32 %v1411_v27, 16  ;;  %v5535_v23 = vld [vmem:[%s6960_s10 + $0x90] sm:$0xff]   ;;  %v5536_v24 = vld [vmem:[%s6960_s10 + $0x98] sm:$0xff]   ;;  %v5537_v27 = vld [vmem:[%s6960_s10 + $0xa0] sm:$0xff]  }
 0x515   :  { %v1416_v41 = vrot.slane %v1414_v29, 7  ;;  %v1421_v44 = vshrl.u32 %v1412_v28, 16  ;;  %v1424_v21 = vshll.u32 %v1412_v28, 16  ;;  %v5538_v29 = vld [vmem:[%s6960_s10 + $0xa8] sm:$0xff]   ;;  %v5539_v28 = vld [vmem:[%s6960_s10 + $0xb0] sm:$0xff]  }
 0x517   :  { %v1419_v45 = vor.u32 %v1417_v42, %v1416_v41  ;;  %v1433_v30 = vsel %vm5885_vm4, %v1416_v41, 0  ;;  %v1423_v47 = vrot.slane %v1421_v44, 7  ;;  %v5540_v41 = vld [vmem:[%s6960_s10 + $0xb8] sm:$0xff]   ;;  %v4405_v42 = vld [vmem:[%s6961_s11] ss:$0 sm:$0xff] }
 0x518   :  { %v1459_v56 = vshll.u32 %v1433_v30, 16  ;;  %v1693_v13 = vrot.slane %v1433_v30, 1 }
 0x519   :  { %v1431_v48 = vsel %vm5885_vm4, 0, %v1419_v45  ;;  %v1426_v31 = vor.u32 %v1424_v21, %v1423_v47  ;;  %v1434_v50 = vsel %vm5885_vm4, %v1423_v47, 0 }
 0x51a   :  { %v1454_v51 = vshll.u32 %v1431_v48, 16  ;;  %v1452_v58 = vshrl.u32 %v1431_v48, 16  ;;  %v1471_v5 = vshll.u32 %v1434_v50, 16  ;;  %v1696_v57 = vrot.slane %v1434_v50, 1 }
 0x51b   :  { %v1432_v53 = vsel %vm5885_vm4, 0, %v1426_v31  ;;  %v1461_v32 = vrot.slane %v1459_v56, 1  ;;  %v1692_v10 = vrot.slane %v1431_v48, 1 }
 0x51c   :  { %v1456_v62 = vrot.slane %v1454_v51, 1  ;;  %v1466_v54 = vshll.u32 %v1432_v53, 16  ;;  %v1695_v17 = vrot.slane %v1432_v53, 1  ;;  %v1464_v20 = vshrl.u32 %v1432_v53, 16 }
 0x51d   :  { %v1473_v34 = vrot.slane %v1471_v5, 1  ;;  %v1694_v19 = vsel %vm330_vm7, %v1692_v10, %v1693_v13 }
 0x51e   :  { %v1457_v60 = vor.u32 %v1456_v62, %v1452_v58  ;;  %v1468_v7 = vrot.slane %v1466_v54, 1  ;;  %v1697_v33 = vsel %vm330_vm7, %v1695_v17, %v1696_v57 }
 0x520   :  { %v1462_v26 = vsel %vm135_vm5, %v1457_v60, %v1461_v32  ;;  %v1469_v61 = vor.u32 %v1468_v7, %v1464_v20 }
 0x521   :  { %5015 = vmatprep.mubr.bf16.mxu0 %v1462_v26 }
 0x522   :  { %v1474_v1 = vsel %vm135_vm5, %v1469_v61, %v1473_v34 }
 0x523   :  { %5016 = vmatmul.mubr.bf16.vlgmr.msra.gmra.mrb[8].mxu0 %v1474_v1 }
 0x524   :  { %5020 = vmatpush3.bf16.msra.mxu0 %v6226_v16  ;;  %5035 = vmatprep.mubr.bf16.mxu0 %v1431_v48  ;;  %v5530_v16 = vld [vmem:[%s6960_s10 + $0x28] sm:$0xff]  }
 0x525   :  { %5021 = vmatprep.subr.bf16.mxu0 %v5526_v63 }
 0x528   :  { %5022 = vmatpush3.bf16.msra.mxu0 %v5526_v63 }
 0x529   :  { %5023 = vmatprep.subr.bf16.mxu0 %v5527_v35 }
 0x52c   :  { %5024 = vmatpush3.bf16.msra.mxu0 %v5527_v35 }
 0x52d   :  { %5025 = vmatprep.subr.bf16.mxu0 %v5528_v3 }
 0x530   :  { %5026 = vmatpush3.bf16.msra.mxu0 %v5528_v3 }
 0x531   :  { %5027 = vmatprep.subr.bf16.mxu0 %v5529_v2 }
 0x534   :  { %5028 = vmatpush3.bf16.msra.mxu0 %v5529_v2 }
 0x535   :  { %5029 = vmatprep.subr.bf16.mxu0 %v5530_v16 }
 0x538   :  { %5030 = vmatpush3.bf16.msra.mxu0 %v5530_v16 }
 0x539   :  { %5031 = vmatprep.subr.bf16.mxu0 %v5531_v6 }
 0x53c   :  { %5032 = vmatpush3.bf16.msra.mxu0 %v5531_v6  ;;  %v6378_v6 = vld [vmem:[%s7000_s22] sm:$0xff] }
 0x53d   :  { %5033 = vmatprep.subr.bf16.mxu0 %v5532_v8 }
 0x540   :  { %5034 = vmatpush3.bf16.msra.mxu0 %v5532_v8 }
 0x541   :  { %5039 = vmatprep.subr.bf16.mxu0 %v5533_v9 }
 0x543   :  { %5036 = vmatmul.mubr.bf16.vlgmr.msra.gmra.mrb[8].mxu0 %v1432_v53 }
 0x544   :  { %5040 = vmatpush3.bf16.msra.mxu0 %v5533_v9  ;;  %5055 = vmatprep.mubr.bf16.mxu0 %v1694_v19 }
 0x545   :  { %5041 = vmatprep.subr.bf16.mxu0 %v5534_v14 }
 0x548   :  { %5042 = vmatpush3.bf16.msra.mxu0 %v5534_v14 }
 0x549   :  { %5043 = vmatprep.subr.bf16.mxu0 %v5535_v23 }
 0x54c   :  { %5044 = vmatpush3.bf16.msra.mxu0 %v5535_v23 }
 0x54d   :  { %5045 = vmatprep.subr.bf16.mxu0 %v5536_v24 }
 0x550   :  { %5046 = vmatpush3.bf16.msra.mxu0 %v5536_v24 }
 0x551   :  { %5047 = vmatprep.subr.bf16.mxu0 %v5537_v27 }
 0x554   :  { %5048 = vmatpush3.bf16.msra.mxu0 %v5537_v27 }
 0x555   :  { %5049 = vmatprep.subr.bf16.mxu0 %v5538_v29 }
 0x558   :  { %5050 = vmatpush3.bf16.msra.mxu0 %v5538_v29 }
 0x559   :  { %5051 = vmatprep.subr.bf16.mxu0 %v5539_v28 }
 0x55c   :  { %5052 = vmatpush3.bf16.msra.mxu0 %v5539_v28  ;;  %v658_v28 = vld [vmem:[%s6962_s12] sm:$0x1] }
 0x55d   :  { %5053 = vmatprep.subr.bf16.mxu0 %v5540_v41 }
 0x560   :  { %5054 = vmatpush3.bf16.msra.mxu0 %v5540_v41 }
 0x561   :  { %5385 = vmatprep.subr.bf16.mxu0 %v5699_v0 }
 0x563   :  { %5056 = vmatmul.mubr.bf16.vlgmr.msra.gmra.mrb[8].mxu0 %v1697_v33 }
 0x564   :  { %5387 = vmatpush3.bf16.msra.mxu0 %v5982_v15  ;;  %5191 = vmatprep.mubr.msk.f32.mxu0 %vm5700_vm0, %v5701_v4 }
 0x565   :  { %5388 = vmatprep.subr.bf16.mxu0 %v5699_v0 }
 0x568   :  { %5390 = vmatpush3.bf16.msra.mxu0 %v6083_v36 }
 0x569   :  { %5391 = vmatprep.subr.bf16.mxu0 %v5699_v0 }
 0x56c   :  { %5393 = vmatpush3.bf16.msra.mxu0 %v6095_v43 }
 0x56d   :  { %5394 = vmatprep.subr.bf16.mxu0 %v5699_v0 }
 0x570   :  { %5396 = vmatpush3.bf16.msra.mxu0 %v6107_v46 }
 0x571   :  { %5397 = vmatprep.subr.bf16.mxu0 %v5699_v0 }
 0x574   :  { %5399 = vmatpush3.bf16.msra.mxu0 %v6119_v49 }
 0x575   :  { %5400 = vmatprep.subr.bf16.mxu0 %v5699_v0 }
 0x578   :  { %5402 = vmatpush3.bf16.msra.mxu0 %v6131_v52 }
 0x579   :  { %5403 = vmatprep.subr.bf16.mxu0 %v5699_v0 }
 0x57c   :  { %5405 = vmatpush3.bf16.msra.mxu0 %v6140_v55 }
 0x57d   :  { %5406 = vmatprep.subr.bf16.mxu0 %v5699_v0 }
 0x580   :  { %5408 = vmatpush3.bf16.msra.mxu0 %v6152_v59 }
 0x581   :  { %5194 = vmatprep.subr.mxu0 %v5701_v4 }
 0x636   :  { %v5057_v44 = vpop.f32.mrb[8].mxu0 }
 0x637   :  { %v1799_v45 = vpop.f32.mrb[9].mxu0  ;;  %v6356_v48 = vadd.f32 %v5057_v44, %v4405_v42  ;;  %v659_v44 = vld [vmem:[%s6963_s13] sm:$0x1] }
 0x638   :  { %v6354_v30 = vadd.f32 %v4405_v42, %v1799_v45  ;;  %v5058_v47 = vpop.f32.mrb[10].mxu0 }
 0x639   :  { %v1802_v21 = vpop.f32.mrb[11].mxu0  ;;  %v6362_v51 = vadd.f32 %v5058_v47, %v4405_v42  ;;  %v1839_v58 = vmul.f32 %v6356_v48, %v6356_v48 }
 0x63a   :  { %v6358_v31 = vadd.f32 %v4405_v42, %v1802_v21  ;;  %v1837_v50 = vmul.f32 %v6354_v30, %v6354_v30 }
 0x63b   :  { %v1840_v5 = vmul.f32 %v6362_v51, %v6362_v51 }
 0x63c   :  { %v1828_v56 = vadd.f32 %v6358_v31, %v6354_v30  ;;  %v1838_v53 = vmul.f32 %v6358_v31, %v6358_v31 }
 0x63e   :  { %v1829_v62 = vadd.f32 %v1828_v56, %v6356_v48  ;;  %v1841_v54 = vadd.f32 %v1838_v53, %v1837_v50  ;;  %v5541_v56 = vld [vmem:[%s6964_s14 + $0x40] sm:$0xff]   ;;  %v5542_v53 = vld [vmem:[%s6964_s14 + $0x48] sm:$0xff]  }
 0x640   :  { %v1830_v17 = vadd.f32 %v1829_v62, %v6362_v51  ;;  %v1842_v57 = vadd.f32 %v1841_v54, %v1839_v58  ;;  %v5543_v58 = vld [vmem:[%s6964_s14 + $0x50] sm:$0xff]   ;;  %v5544_v62 = vld [vmem:[%s6964_s14 + $0x58] sm:$0xff]   ;;  %v5545_v54 = vld [vmem:[%s6964_s14 + $0x60] sm:$0xff]  }
 0x642   :  { %v1831_v60 = vrot.slane %v1830_v17, 4  ;;  %v1843_v32 = vadd.f32 %v1842_v57, %v1840_v5  ;;  %v5546_v5 = vld [vmem:[%s6964_s14 + $0x68] sm:$0xff]   ;;  %v5548_v57 = vld [vmem:[%s6964_s14 + $0x78] sm:$0xff]  }
 0x644   :  { %v1832_v20 = vadd.f32 %v1831_v60, %v1830_v17  ;;  %v1844_v7 = vrot.slane %v1843_v32, 4  ;;  %v5547_v17 = vld [vmem:[%s6964_s14 + $0x70] sm:$0xff]   ;;  %v6421_v60 = vld [vmem:[%s6964_s14] sm:$0xff]  }
 0x646   :  { %v1833_v33 = vrot.slane %v1832_v20, 2  ;;  %v1845_v26 = vadd.f32 %v1844_v7, %v1843_v32 }
 0x648   :  { %v1834_v61 = vadd.f32 %v1833_v33, %v1832_v20  ;;  %v1846_v34 = vrot.slane %v1845_v26, 2 }
 0x64a   :  { %v1835_v63 = vrot.slane %v1834_v61, 1  ;;  %v1847_v1 = vadd.f32 %v1846_v34, %v1845_v26 }
 0x64c   :  { %v1848_v35 = vrot.slane %v1847_v1, 1  ;;  %v1836_v3 = vadd.f32 %v1835_v63, %v1834_v61 }
 0x64e   :  { %v1849_v2 = vadd.f32 %v1848_v35, %v1847_v1 }
 0x650   :  { %v1850_v16 = vsel %vm120_vm2, %v1836_v3, %v1849_v2 }
 0x651   :  { %5092 = vmatmul.mubr.f32.vlgmr.msra.gmra.mrb[8].mxu1 %v1850_v16 }
 0x652   :  { %5095 = vmatpush3.msra.mxu1 %v6378_v6  ;;  %5096 = vmatprep.mubr.msk.f32.mxu1 %vm5700_vm0, %v5701_v4 }
 0x653   :  { %5099 = vmatprep.subr.bf16.mxu1 %v5541_v56 }
 0x724   :  { %v1917_v8 = vpop.f32.mrb[8].mxu1 }
 0x725   :  { %v1921_v9 = vmul.f32 0.001953125, %v1917_v8  ;;  %v5093_v10 = vpop.f32.mrb[9].mxu1 }
 0x727   :  { %v1922_v13 = vmul.f32 %v1921_v9, %v1921_v9 }
 0x729   :  { %v1924_v14 = vrot.slane %v1922_v13, 7 }
 0x72b   :  { %v1926_v19 = vsub.f32 %v1921_v9, %v1924_v14 }
 0x72d   :  { %v1927_v23 = vadd.f32 1e-05, %v1926_v19 }
 0x72f   :  { %5643 = vrsqrt.f32 %v1927_v23 }
 0x739   :  { %v5644_v24 = vpop.eup %5643 }
 0x73a   :  { %v1936_v27 = vrot.slane %v5644_v24, %v5989_v22 }
 0x73c   :  { %v1937_v29 = vcombine.high %v1936_v27, %v1936_v27 }
 0x73e   :  { %v1944_v41 = vrot.slane %v1937_v29, %v5989_v22 }
 0x740   :  { %v1946_v42 = vmul.f32 %v1944_v41, %v658_v28 }
 0x742   :  { %v1947_v45 = vmul.f32 %v1946_v42, %v1921_v9 }
 0x744   :  { %v1948_v47 = vsub.f32 %v659_v44, %v1947_v45 }
 0x746   :  { %v1953_v21 = vrot.slane %v1948_v47, %v5993_v25 }
 0x748   :  { %v1955_v50 = vsel %vm120_vm2, %v1946_v42, %v1953_v21 }
 0x749   :  { %5097 = vmatmul.mubr.msk.f32.vlgmr.msra.gmra.mrb[10].mxu1 %vm527_vm8, %v1955_v50 }
 0x74a   :  { %5100 = vmatpush3.bf16.msra.mxu1 %v5541_v56 }
 0x74b   :  { %5101 = vmatprep.subr.bf16.mxu1 %v5542_v53 }
 0x74e   :  { %5102 = vmatpush3.bf16.msra.mxu1 %v5542_v53 }
 0x74f   :  { %5103 = vmatprep.subr.bf16.mxu1 %v5543_v58 }
 0x752   :  { %5104 = vmatpush3.bf16.msra.mxu1 %v5543_v58 }
 0x753   :  { %5105 = vmatprep.subr.bf16.mxu1 %v5544_v62 }
 0x756   :  { %5106 = vmatpush3.bf16.msra.mxu1 %v5544_v62 }
 0x757   :  { %5107 = vmatprep.subr.bf16.mxu1 %v5545_v54 }
 0x75a   :  { %5108 = vmatpush3.bf16.msra.mxu1 %v5545_v54 }
 0x75b   :  { %5109 = vmatprep.subr.bf16.mxu1 %v5546_v5 }
 0x75e   :  { %5110 = vmatpush3.bf16.msra.mxu1 %v5546_v5 }
 0x75f   :  { %5111 = vmatprep.subr.bf16.mxu1 %v5547_v17 }
 0x762   :  { %5112 = vmatpush3.bf16.msra.mxu1 %v5547_v17 }
 0x763   :  { %5113 = vmatprep.subr.bf16.mxu1 %v5548_v57 }
 0x766   :  { %5114 = vmatpush3.bf16.msra.mxu1 %v5548_v57 }
 0x767   :  { %5119 = vmatprep.subr.bf16.mxu1 %v6421_v60 }
 0x81c   :  { %v2025_v32 = vpop.f32.mrb[10].mxu1 }
 0x81d   :  { %v2032_v20 = vrot.slane %v2025_v32, %v5993_v25  ;;  %v5098_v7 = vpop.f32.mrb[11].mxu1  ;;  %v2040_v33 = vrot.slane %v2025_v32, %v6230_v12 }
 0x81f   :  { %v2033_v26 = vmul.f32 %v2032_v20, %v6354_v30  ;;  %v2034_v61 = vmul.f32 %v2032_v20, %v6358_v31  ;;  %v2035_v34 = vmul.f32 %v2032_v20, %v6356_v48  ;;  %v2036_v63 = vmul.f32 %v2032_v20, %v6362_v51 }
 0x821   :  { %v6430_v1 = vadd.f32 %v2040_v33, %v2033_v26  ;;  %v6432_v35 = vadd.f32 %v2040_v33, %v2034_v61  ;;  %v6434_v3 = vadd.f32 %v2040_v33, %v2035_v34  ;;  %v6436_v2 = vadd.f32 %v2040_v33, %v2036_v63 }
 0x823   :  { %v6439_v16 = vmul.f32 0.70710677, %v6430_v1  ;;  %v6442_v8 = vmul.f32 0.70710677, %v6432_v35  ;;  %v6445_v30 = vmul.f32 0.70710677, %v6434_v3 }
 0x824   :  { %v6448_v48 = vmul.f32 0.70710677, %v6436_v2 }
 0x825   :  { %v2061_v31 = vand.u32 2147483647, %v6439_v16  ;;  %v2062_v51 = vand.u32 2147483647, %v6442_v8  ;;  %v2063_v9 = vand.u32 2147483647, %v6445_v30 }
 0x826   :  { %v2064_v10 = vand.u32 2147483647, %v6448_v48  ;;  %vm2053_vm13 = vcmp.ge.f32.partialorder %v6439_v16, 0.0  ;;  %vm2054_vm14 = vcmp.ge.f32.partialorder %v6442_v8, 0.0  ;;  %vm2055_vm15 = vcmp.ge.f32.partialorder %v6445_v30, 0.0 }
 0x827   :  { %v2065_v13 = vmul.f32 0.3275911, %v2061_v31  ;;  %v2066_v14 = vmul.f32 0.3275911, %v2062_v51  ;;  %v2067_v19 = vmul.f32 0.3275911, %v2063_v9 }
 0x828   :  { %v2068_v23 = vmul.f32 0.3275911, %v2064_v10  ;;  %v2125_v21 = vsub.f32 0.0, %v2061_v31  ;;  %v2126_v58 = vsub.f32 0.0, %v2062_v51  ;;  %v2127_v5 = vsub.f32 0.0, %v2063_v9 }
 0x829   :  { %v2069_v24 = vadd.f32 1.0, %v2065_v13  ;;  %v2070_v27 = vadd.f32 1.0, %v2066_v14  ;;  %v2071_v29 = vadd.f32 1.0, %v2067_v19  ;;  %v2128_v32 = vsub.f32 0.0, %v2064_v10 }
 0x82a   :  { %v2072_v28 = vadd.f32 1.0, %v2068_v23  ;;  %v2129_v33 = vmul.f32 %v2125_v21, %v2061_v31  ;;  %v2130_v34 = vmul.f32 %v2126_v58, %v2062_v51  ;;  %v2131_v14 = vmul.f32 %v2127_v5, %v2063_v9 }
 0x82b   :  { %5645 = vrcp.f32 %v2069_v24  ;;  %vm2056_vm3 = vcmp.ge.f32.partialorder %v6448_v48, 0.0  ;;  %v2058_v16 = vsel %vm2054_vm14, 1.0, %v5703_v11  ;;  %v2046_v48 = vmul.f32 0.5, %v6432_v35 }
 0x82c   :  { %5647 = vrcp.f32 %v2070_v27  ;;  %v2060_v30 = vsel %vm2056_vm3, 1.0, %v5703_v11 }
 0x82d   :  { %5649 = vrcp.f32 %v2071_v29 }
 0x82e   :  { %5651 = vrcp.f32 %v2072_v28 }
 0x835   :  { %v5646_v41 = vpop.eup %5645 }
 0x836   :  { %v5648_v42 = vpop.eup %5647  ;;  %v2077_v44 = vmul.f32 %v5646_v41, %v2069_v24  ;;  %v2132_v24 = vmul.f32 %v2128_v32, %v2064_v10 }
 0x837   :  { %v5650_v45 = vpop.eup %5649  ;;  %v2078_v47 = vmul.f32 %v5648_v42, %v2070_v27 }
 0x838   :  { %v5652_v50 = vpop.eup %5651  ;;  %v2079_v56 = vmul.f32 %v5650_v45, %v2071_v29  ;;  %v2081_v53 = vsub.f32 2.0, %v2077_v44 }
 0x839   :  { %v2080_v62 = vmul.f32 %v5652_v50, %v2072_v28  ;;  %v2082_v54 = vsub.f32 2.0, %v2078_v47  ;;  %v2133_v28 = vmul.f32 1.442695, %v2129_v33 }
 0x83a   :  { %v2083_v17 = vsub.f32 2.0, %v2079_v56  ;;  %v2085_v57 = vmul.f32 %v5646_v41, %v2081_v53  ;;  %v2135_v56 = vmul.f32 1.442695, %v2130_v34 }
 0x83b   :  { %v2084_v20 = vsub.f32 2.0, %v2080_v62  ;;  %v2086_v7 = vmul.f32 %v5648_v42, %v2082_v54  ;;  %v2137_v62 = vmul.f32 1.442695, %v2131_v14  ;;  %5653 = vpow2.f32 %v2133_v28 }
 0x83c   :  { %v2087_v26 = vmul.f32 %v5650_v45, %v2083_v17  ;;  %v2089_v61 = vmul.f32 1.0614054, %v2085_v57  ;;  %v2139_v45 = vmul.f32 1.442695, %v2132_v24  ;;  %5655 = vpow2.f32 %v2135_v56 }
 0x83d   :  { %v2088_v63 = vmul.f32 %v5652_v50, %v2084_v20  ;;  %v2090_v13 = vmul.f32 1.0614054, %v2086_v7  ;;  %5657 = vpow2.f32 %v2137_v62 }
 0x83e   :  { %v2091_v19 = vmul.f32 1.0614054, %v2087_v26  ;;  %v2093_v23 = vadd.f32 -1.4531521, %v2089_v61  ;;  %5659 = vpow2.f32 %v2139_v45 }
 0x83f   :  { %v2092_v27 = vmul.f32 1.0614054, %v2088_v63  ;;  %v2094_v29 = vadd.f32 -1.4531521, %v2090_v13 }
 0x840   :  { %v2095_v44 = vadd.f32 -1.4531521, %v2091_v19  ;;  %v2097_v47 = vmul.f32 %v2093_v23, %v2085_v57 }
 0x841   :  { %v2096_v41 = vadd.f32 -1.4531521, %v2092_v27  ;;  %v2098_v53 = vmul.f32 %v2094_v29, %v2086_v7 }
 0x842   :  { %v2099_v42 = vmul.f32 %v2095_v44, %v2087_v26  ;;  %v2101_v31 = vadd.f32 1.4214138, %v2097_v47 }
 0x843   :  { %v2100_v21 = vmul.f32 %v2096_v41, %v2088_v63  ;;  %v2102_v51 = vadd.f32 1.4214138, %v2098_v53 }
 0x844   :  { %v2103_v50 = vadd.f32 1.4214138, %v2099_v42  ;;  %v2105_v9 = vmul.f32 %v2101_v31, %v2085_v57 }
 0x845   :  { %v2104_v58 = vadd.f32 1.4214138, %v2100_v21  ;;  %v2106_v10 = vmul.f32 %v2102_v51, %v2086_v7  ;;  %v5654_v29 = vpop.eup %5653 }
 0x846   :  { %v2107_v54 = vmul.f32 %v2103_v50, %v2087_v26  ;;  %v2109_v5 = vadd.f32 -0.28449672, %v2105_v9  ;;  %v5656_v47 = vpop.eup %5655  ;;  %v2059_v9 = vsel %vm2055_vm15, 1.0, %v5703_v11 }
 0x847   :  { %v2108_v17 = vmul.f32 %v2104_v58, %v2088_v63  ;;  %v2110_v32 = vadd.f32 -0.28449672, %v2106_v10  ;;  %v5658_v53 = vpop.eup %5657  ;;  %v2045_v58 = vmul.f32 0.5, %v6430_v1 }
 0x848   :  { %v2111_v20 = vadd.f32 -0.28449672, %v2107_v54  ;;  %v2113_v33 = vmul.f32 %v2109_v5, %v2085_v57  ;;  %v5660_v31 = vpop.eup %5659 }
 0x849   :  { %v2112_v61 = vadd.f32 -0.28449672, %v2108_v17  ;;  %v2114_v34 = vmul.f32 %v2110_v32, %v2086_v7  ;;  %v2047_v32 = vmul.f32 0.5, %v6434_v3 }
 0x84a   :  { %v2115_v13 = vmul.f32 %v2111_v20, %v2087_v26  ;;  %v2117_v14 = vadd.f32 0.2548296, %v2113_v33 }
 0x84b   :  { %v2116_v19 = vmul.f32 %v2112_v61, %v2088_v63  ;;  %v2118_v23 = vadd.f32 0.2548296, %v2114_v34  ;;  %v2048_v61 = vmul.f32 0.5, %v6436_v2 }
 0x84c   :  { %v2119_v24 = vadd.f32 0.2548296, %v2115_v13  ;;  %v2121_v27 = vmul.f32 %v2117_v14, %v2085_v57  ;;  %v2057_v57 = vsel %vm2053_vm13, 1.0, %v5703_v11 }
 0x84d   :  { %v2120_v28 = vadd.f32 0.2548296, %v2116_v19  ;;  %v2122_v44 = vmul.f32 %v2118_v23, %v2086_v7 }
 0x84e   :  { %v2123_v56 = vmul.f32 %v2119_v24, %v2087_v26  ;;  %v2141_v41 = vmul.f32 %v5654_v29, %v2121_v27 }
 0x84f   :  { %v2124_v62 = vmul.f32 %v2120_v28, %v2088_v63  ;;  %v2142_v42 = vmul.f32 %v5656_v47, %v2122_v44 }
 0x850   :  { %v2143_v45 = vmul.f32 %v5658_v53, %v2123_v56  ;;  %v2145_v21 = vsub.f32 1.0, %v2141_v41 }
 0x851   :  { %v2144_v7 = vmul.f32 %v5660_v31, %v2124_v62  ;;  %v2146_v51 = vsub.f32 1.0, %v2142_v42 }
 0x852   :  { %v2147_v26 = vsub.f32 1.0, %v2143_v45  ;;  %v2149_v50 = vmul.f32 %v2145_v21, %v2057_v57 }
 0x853   :  { %v2148_v8 = vsub.f32 1.0, %v2144_v7  ;;  %v2150_v63 = vmul.f32 %v2146_v51, %v2058_v16 }
 0x854   :  { %v2151_v10 = vmul.f32 %v2147_v26, %v2059_v9  ;;  %v2153_v54 = vadd.f32 1.0, %v2149_v50 }
 0x855   :  { %v2152_v5 = vmul.f32 %v2148_v8, %v2060_v30  ;;  %v2154_v17 = vadd.f32 1.0, %v2150_v63 }
 0x856   :  { %v2155_v20 = vadd.f32 1.0, %v2151_v10  ;;  %v2157_v33 = vmul.f32 %v2153_v54, %v2045_v58 }
 0x857   :  { %v2156_v34 = vadd.f32 1.0, %v2152_v5  ;;  %v2158_v13 = vmul.f32 %v2154_v17, %v2046_v48  ;;  %v5550_v17 = vld [vmem:[%s6964_s14 + $0x8] sm:$0xff]  }
 0x858   :  { %v2159_v14 = vmul.f32 %v2155_v20, %v2047_v32  ;;  %v2161_v19 = vadd.f32 %v2157_v33, %v6002_v37  ;;  %v5551_v20 = vld [vmem:[%s6964_s14 + $0x10] sm:$0xff]   ;;  %v5552_v33 = vld [vmem:[%s6964_s14 + $0x18] sm:$0xff]  }
 0x859   :  { %v2160_v1 = vmul.f32 %v2156_v34, %v2048_v61  ;;  %v2162_v23 = vadd.f32 %v2158_v13, %v6004_v38  ;;  %v5553_v61 = vld [vmem:[%s6964_s14 + $0x20] sm:$0xff]   ;;  %v5555_v34 = vld [vmem:[%s6964_s14 + $0x30] sm:$0xff]   ;;  %v5556_v13 = vld [vmem:[%s6964_s14 + $0x38] sm:$0xff]  }
 0x85a   :  { %v2163_v24 = vadd.f32 %v2159_v14, %v6006_v39  ;;  %v6469_v27 = vmul.f32 0.7072136, %v2161_v19  ;;  %v5557_v14 = vld [vmem:[%s6964_s14 + $0x80] sm:$0xff]  }
 0x85b   :  { %v2164_v35 = vadd.f32 %v2160_v1, %v6008_v40  ;;  %v6472_v29 = vmul.f32 0.7072136, %v2162_v23  ;;  %v5558_v23 = vld [vmem:[%s6964_s14 + $0x88] sm:$0xff]  }
 0x85c   :  { %v6474_v3 = vmul.f32 0.7072136, %v2163_v24 }
 0x85d   :  { %v2175_v2 = vpack.c.bf16 %v6472_v29, %v6469_v27  ;;  %v6478_v28 = vmul.f32 0.7072136, %v2164_v35  ;;  %v5559_v35 = vld [vmem:[%s6964_s14 + $0x90] sm:$0xff]  }
 0x85f   :  { %v2178_v44 = vshrl.u32 %v2175_v2, 16  ;;  %v2176_v37 = vpack.c.bf16 %v6478_v28, %v6474_v3  ;;  %v2181_v47 = vshll.u32 %v2175_v2, 16  ;;  %v5560_v2 = vld [vmem:[%s6964_s14 + $0x98] sm:$0xff]  }
 0x861   :  { %v2180_v38 = vrot.slane %v2178_v44, 7  ;;  %v2185_v39 = vshrl.u32 %v2176_v37, 16  ;;  %v2188_v53 = vshll.u32 %v2176_v37, 16  ;;  %v5561_v44 = vld [vmem:[%s6964_s14 + $0xa0] sm:$0xff]   ;;  %v5562_v37 = vld [vmem:[%s6964_s14 + $0xa8] sm:$0xff]  }
 0x863   :  { %v2183_v56 = vor.u32 %v2181_v47, %v2180_v38  ;;  %v2197_v40 = vsel %vm5885_vm4, %v2180_v38, 0  ;;  %v2187_v41 = vrot.slane %v2185_v39, 7  ;;  %v5563_v38 = vld [vmem:[%s6964_s14 + $0xb0] sm:$0xff]   ;;  %v5564_v47 = vld [vmem:[%s6964_s14 + $0xb8] sm:$0xff]  }
 0x864   :  { %v2223_v21 = vshll.u32 %v2197_v40, 16  ;;  %v2457_v1 = vrot.slane %v2197_v40, 1 }
 0x865   :  { %v2195_v62 = vsel %vm5885_vm4, 0, %v2183_v56  ;;  %v2190_v42 = vor.u32 %v2188_v53, %v2187_v41  ;;  %v2198_v31 = vsel %vm5885_vm4, %v2187_v41, 0 }
 0x866   :  { %v2218_v45 = vshll.u32 %v2195_v62, 16  ;;  %v2216_v7 = vshrl.u32 %v2195_v62, 16  ;;  %v2235_v26 = vshll.u32 %v2198_v31, 16  ;;  %v2460_v9 = vrot.slane %v2198_v31, 1 }
 0x867   :  { %v2196_v57 = vsel %vm5885_vm4, 0, %v2190_v42  ;;  %v2225_v63 = vrot.slane %v2223_v21, 1  ;;  %v2456_v19 = vrot.slane %v2195_v62, 1 }
 0x868   :  { %v2220_v51 = vrot.slane %v2218_v45, 1  ;;  %v2230_v16 = vshll.u32 %v2196_v57, 16  ;;  %v2459_v50 = vrot.slane %v2196_v57, 1  ;;  %v2228_v58 = vshrl.u32 %v2196_v57, 16 }
 0x869   :  { %v2237_v5 = vrot.slane %v2235_v26, 1  ;;  %v2458_v24 = vsel %vm330_vm7, %v2456_v19, %v2457_v1  ;;  %v2171_v1 = vld [vmem:[%s6967_s17] sm:$0x1] }
 0x86a   :  { %v2221_v8 = vor.u32 %v2220_v51, %v2216_v7  ;;  %v2232_v30 = vrot.slane %v2230_v16, 1  ;;  %v2461_v10 = vsel %vm330_vm7, %v2459_v50, %v2460_v9 }
 0x86c   :  { %v2226_v54 = vsel %vm135_vm5, %v2221_v8, %v2225_v63  ;;  %v2233_v48 = vor.u32 %v2232_v30, %v2228_v58 }
 0x86d   :  { %5115 = vmatprep.mubr.bf16.mxu1 %v2226_v54 }
 0x86e   :  { %v2238_v32 = vsel %vm135_vm5, %v2233_v48, %v2237_v5 }
 0x86f   :  { %5116 = vmatmul.mubr.bf16.vlgmr.msra.gmra.mrb[12].mxu1 %v2238_v32 }
 0x870   :  { %5120 = vmatpush3.bf16.msra.mxu1 %v6421_v60  ;;  %5135 = vmatprep.mubr.bf16.mxu1 %v2195_v62  ;;  %v5554_v60 = vld [vmem:[%s6964_s14 + $0x28] sm:$0xff]  }
 0x871   :  { %5121 = vmatprep.subr.bf16.mxu1 %v5550_v17 }
 0x874   :  { %5122 = vmatpush3.bf16.msra.mxu1 %v5550_v17 }
 0x875   :  { %5123 = vmatprep.subr.bf16.mxu1 %v5551_v20 }
 0x878   :  { %5124 = vmatpush3.bf16.msra.mxu1 %v5551_v20 }
 0x879   :  { %5125 = vmatprep.subr.bf16.mxu1 %v5552_v33 }
 0x87c   :  { %5126 = vmatpush3.bf16.msra.mxu1 %v5552_v33 }
 0x87d   :  { %5127 = vmatprep.subr.bf16.mxu1 %v5553_v61 }
 0x880   :  { %5128 = vmatpush3.bf16.msra.mxu1 %v5553_v61 }
 0x881   :  { %5129 = vmatprep.subr.bf16.mxu1 %v5554_v60 }
 0x884   :  { %5130 = vmatpush3.bf16.msra.mxu1 %v5554_v60 }
 0x885   :  { %5131 = vmatprep.subr.bf16.mxu1 %v5555_v34 }
 0x888   :  { %5132 = vmatpush3.bf16.msra.mxu1 %v5555_v34 }
 0x889   :  { %5133 = vmatprep.subr.bf16.mxu1 %v5556_v13 }
 0x88c   :  { %5134 = vmatpush3.bf16.msra.mxu1 %v5556_v13 }
 0x88d   :  { %5139 = vmatprep.subr.bf16.mxu1 %v5557_v14 }
 0x88f   :  { %5136 = vmatmul.mubr.bf16.vlgmr.msra.gmra.mrb[12].mxu1 %v2196_v57 }
 0x890   :  { %5140 = vmatpush3.bf16.msra.mxu1 %v5557_v14  ;;  %5155 = vmatprep.mubr.bf16.mxu1 %v2458_v24  ;;  %v2170_v14 = vld [vmem:[%s6966_s16] sm:$0x1]  ;;  %s5704_s16 = smov 64  }
 0x891   :  { %5141 = vmatprep.subr.bf16.mxu1 %v5558_v23 }
 0x894   :  { %5142 = vmatpush3.bf16.msra.mxu1 %v5558_v23 }
 0x895   :  { %5143 = vmatprep.subr.bf16.mxu1 %v5559_v35 }
 0x898   :  { %5144 = vmatpush3.bf16.msra.mxu1 %v5559_v35 }
 0x899   :  { %5145 = vmatprep.subr.bf16.mxu1 %v5560_v2 }
 0x89c   :  { %5146 = vmatpush3.bf16.msra.mxu1 %v5560_v2 }
 0x89d   :  { %5147 = vmatprep.subr.bf16.mxu1 %v5561_v44 }
 0x8a0   :  { %5148 = vmatpush3.bf16.msra.mxu1 %v5561_v44  ;;  %v5565_v44 = vld [vmem:[%s6968_s18 + $0x40] sm:$0xff]  }
 0x8a1   :  { %5149 = vmatprep.subr.bf16.mxu1 %v5562_v37 }
 0x8a4   :  { %5150 = vmatpush3.bf16.msra.mxu1 %v5562_v37  ;;  %v5566_v37 = vld [vmem:[%s6968_s18 + $0x48] sm:$0xff]  }
 0x8a5   :  { %5151 = vmatprep.subr.bf16.mxu1 %v5563_v38 }
 0x8a8   :  { %5152 = vmatpush3.bf16.msra.mxu1 %v5563_v38  ;;  %v5567_v38 = vld [vmem:[%s6968_s18 + $0x50] sm:$0xff]  }
 0x8a9   :  { %5153 = vmatprep.subr.bf16.mxu1 %v5564_v47 }
 0x8ac   :  { %5154 = vmatpush3.bf16.msra.mxu1 %v5564_v47  ;;  %v5568_v47 = vld [vmem:[%s6968_s18 + $0x58] sm:$0xff]  }
 0x8ad   :  { %5409 = vmatprep.subr.bf16.mxu1 %v5699_v0 }
 0x8af   :  { %5156 = vmatmul.mubr.bf16.vlgmr.msra.gmra.mrb[12].mxu1 %v2461_v10 }
 0x8b0   :  { %5411 = vmatpush3.bf16.msra.mxu1 %v5982_v15  ;;  %5291 = vmatprep.mubr.msk.f32.mxu1 %vm5700_vm0, %v5701_v4  ;;  %v4463_v15 = vld [vmem:[%s6965_s15] ss:$0 sm:$0xff] }
 0x8b1   :  { %5412 = vmatprep.subr.bf16.mxu1 %v5699_v0 }
 0x8b4   :  { %5414 = vmatpush3.bf16.msra.mxu1 %v6083_v36 }
 0x8b5   :  { %5415 = vmatprep.subr.bf16.mxu1 %v5699_v0 }
 0x8b8   :  { %5417 = vmatpush3.bf16.msra.mxu1 %v6095_v43 }
 0x8b9   :  { %5418 = vmatprep.subr.bf16.mxu1 %v5699_v0 }
 0x8bc   :  { %5420 = vmatpush3.bf16.msra.mxu1 %v6107_v46 }
 0x8bd   :  { %5421 = vmatprep.subr.bf16.mxu1 %v5699_v0 }
 0x8c0   :  { %5423 = vmatpush3.bf16.msra.mxu1 %v6119_v49 }
 0x8c1   :  { %5424 = vmatprep.subr.bf16.mxu1 %v5699_v0 }
 0x8c4   :  { %5426 = vmatpush3.bf16.msra.mxu1 %v6131_v52 }
 0x8c5   :  { %5427 = vmatprep.subr.bf16.mxu1 %v5699_v0 }
 0x8c8   :  { %5429 = vmatpush3.bf16.msra.mxu1 %v6140_v55 }
 0x8c9   :  { %5430 = vmatprep.subr.bf16.mxu1 %v5699_v0 }
 0x8cc   :  { %5432 = vmatpush3.bf16.msra.mxu1 %v6152_v59 }
 0x8cd   :  { %5294 = vmatprep.subr.mxu1 %v5701_v4 }
 0x982   :  { %v5157_v36 = vpop.f32.mrb[12].mxu1 }
 0x983   :  { %v2563_v43 = vpop.f32.mrb[13].mxu1  ;;  %v6564_v39 = vadd.f32 %v5157_v36, %v4463_v15  ;;  %v5570_v36 = vld [vmem:[%s6968_s18 + $0x68] sm:$0xff]  }
 0x984   :  { %v6562_v46 = vadd.f32 %v4463_v15, %v2563_v43  ;;  %v5158_v49 = vpop.f32.mrb[14].mxu1  ;;  %v5571_v43 = vld [vmem:[%s6968_s18 + $0x70] sm:$0xff]  }
 0x985   :  { %v2566_v52 = vpop.f32.mrb[15].mxu1  ;;  %v6570_v55 = vadd.f32 %v5158_v49, %v4463_v15  ;;  %v2603_v41 = vmul.f32 %v6564_v39, %v6564_v39  ;;  %v5572_v49 = vld [vmem:[%s6968_s18 + $0x78] sm:$0xff]  }
 0x986   :  { %v6566_v56 = vadd.f32 %v4463_v15, %v2566_v52  ;;  %v2601_v0 = vmul.f32 %v6562_v46, %v6562_v46  ;;  %v5569_v15 = vld [vmem:[%s6968_s18 + $0x60] sm:$0xff]  }
 0x987   :  { %v2604_v42 = vmul.f32 %v6570_v55, %v6570_v55  ;;  %v6624_v52 = vld [vmem:[%s6968_s18] sm:$0xff]  }
 0x988   :  { %v2592_v59 = vadd.f32 %v6566_v56, %v6562_v46  ;;  %v2602_v40 = vmul.f32 %v6566_v56, %v6566_v56 }
 0x98a   :  { %v2593_v53 = vadd.f32 %v2592_v59, %v6564_v39  ;;  %v2605_v62 = vadd.f32 %v2602_v40, %v2601_v0 }
 0x98c   :  { %v2594_v31 = vadd.f32 %v2593_v53, %v6570_v55  ;;  %v2606_v45 = vadd.f32 %v2605_v62, %v2603_v41 }
 0x98e   :  { %v2595_v21 = vrot.slane %v2594_v31, 4  ;;  %v2607_v57 = vadd.f32 %v2606_v45, %v2604_v42 }
 0x990   :  { %v2596_v7 = vadd.f32 %v2595_v21, %v2594_v31  ;;  %v2608_v51 = vrot.slane %v2607_v57, 4 }
 0x992   :  { %v2597_v16 = vrot.slane %v2596_v7, 2  ;;  %v2609_v26 = vadd.f32 %v2608_v51, %v2607_v57 }
 0x994   :  { %v2598_v50 = vadd.f32 %v2597_v16, %v2596_v7  ;;  %v2610_v9 = vrot.slane %v2609_v26, 2 }
 0x996   :  { %v2599_v8 = vrot.slane %v2598_v50, 1  ;;  %v2611_v63 = vadd.f32 %v2610_v9, %v2609_v26 }
 0x998   :  { %v2612_v58 = vrot.slane %v2611_v63, 1  ;;  %v2600_v30 = vadd.f32 %v2599_v8, %v2598_v50 }
 0x99a   :  { %v2613_v10 = vadd.f32 %v2612_v58, %v2611_v63 }
 0x99c   :  { %v2614_v54 = vsel %vm120_vm2, %v2600_v30, %v2613_v10 }
 0x99d   :  { %5192 = vmatmul.mubr.f32.vlgmr.msra.gmra.mrb[12].mxu0 %v2614_v54 }
 0x99e   :  { %5195 = vmatpush3.msra.mxu0 %v6378_v6  ;;  %5196 = vmatprep.mubr.msk.f32.mxu0 %vm5700_vm0, %v5701_v4 }
 0x99f   :  { %5199 = vmatprep.subr.bf16.mxu0 %v5565_v44 }
 0xa70   :  { %v2681_v48 = vpop.f32.mrb[12].mxu0 }
 0xa71   :  { %v2685_v5 = vmul.f32 0.001953125, %v2681_v48  ;;  %v5193_v17 = vpop.f32.mrb[13].mxu0 }
 0xa73   :  { %v2686_v32 = vmul.f32 %v2685_v5, %v2685_v5 }
 0xa75   :  { %v2688_v20 = vrot.slane %v2686_v32, 7 }
 0xa77   :  { %v2690_v33 = vsub.f32 %v2685_v5, %v2688_v20 }
 0xa79   :  { %v2691_v61 = vadd.f32 1e-05, %v2690_v33 }
 0xa7b   :  { %5661 = vrsqrt.f32 %v2691_v61 }
 0xa85   :  { %v5662_v60 = vpop.eup %5661 }
 0xa86   :  { %v2700_v34 = vrot.slane %v5662_v60, %v5989_v22 }
 0xa88   :  { %v2701_v13 = vcombine.high %v2700_v34, %v2700_v34 }
 0xa8a   :  { %v2708_v6 = vrot.slane %v2701_v13, %v5989_v22 }
 0xa8c   :  { %v2710_v19 = vmul.f32 %v2708_v6, %v2170_v14 }
 0xa8e   :  { %v2711_v23 = vmul.f32 %v2710_v19, %v2685_v5 }
 0xa90   :  { %v2712_v24 = vsub.f32 %v2171_v1, %v2711_v23 }
 0xa92   :  { %v2717_v35 = vrot.slane %v2712_v24, %v5993_v25 }
 0xa94   :  { %v2719_v2 = vsel %vm120_vm2, %v2710_v19, %v2717_v35 }
 0xa95   :  { %5197 = vmatmul.mubr.msk.f32.vlgmr.msra.gmra.mrb[14].mxu0 %vm527_vm8, %v2719_v2 }
 0xa96   :  { %5200 = vmatpush3.bf16.msra.mxu0 %v5565_v44 }
 0xa97   :  { %5201 = vmatprep.subr.bf16.mxu0 %v5566_v37 }
 0xa9a   :  { %5202 = vmatpush3.bf16.msra.mxu0 %v5566_v37 }
 0xa9b   :  { %5203 = vmatprep.subr.bf16.mxu0 %v5567_v38 }
 0xa9e   :  { %5204 = vmatpush3.bf16.msra.mxu0 %v5567_v38 }
 0xa9f   :  { %5205 = vmatprep.subr.bf16.mxu0 %v5568_v47 }
 0xaa2   :  { %5206 = vmatpush3.bf16.msra.mxu0 %v5568_v47 }
 0xaa3   :  { %5207 = vmatprep.subr.bf16.mxu0 %v5569_v15 }
 0xaa6   :  { %5208 = vmatpush3.bf16.msra.mxu0 %v5569_v15 }
 0xaa7   :  { %5209 = vmatprep.subr.bf16.mxu0 %v5570_v36 }
 0xaaa   :  { %5210 = vmatpush3.bf16.msra.mxu0 %v5570_v36 }
 0xaab   :  { %5211 = vmatprep.subr.bf16.mxu0 %v5571_v43 }
 0xaae   :  { %5212 = vmatpush3.bf16.msra.mxu0 %v5571_v43 }
 0xaaf   :  { %5213 = vmatprep.subr.bf16.mxu0 %v5572_v49 }
 0xab2   :  { %5214 = vmatpush3.bf16.msra.mxu0 %v5572_v49 }
 0xab3   :  { %5219 = vmatprep.subr.bf16.mxu0 %v6624_v52 }
 0xb68   :  { %v2789_v0 = vpop.f32.mrb[14].mxu0 }
 0xb69   :  { %v2796_v59 = vrot.slane %v2789_v0, %v5993_v25  ;;  %v5198_v40 = vpop.f32.mrb[15].mxu0  ;;  %v2804_v41 = vrot.slane %v2789_v0, %v6230_v12 }
 0xb6b   :  { %v2797_v53 = vmul.f32 %v2796_v59, %v6562_v46  ;;  %v2798_v62 = vmul.f32 %v2796_v59, %v6566_v56  ;;  %v2799_v42 = vmul.f32 %v2796_v59, %v6564_v39  ;;  %v2800_v31 = vmul.f32 %v2796_v59, %v6570_v55 }
 0xb6d   :  { %v6633_v45 = vadd.f32 %v2804_v41, %v2797_v53  ;;  %v6635_v21 = vadd.f32 %v2804_v41, %v2798_v62  ;;  %v6637_v57 = vadd.f32 %v2804_v41, %v2799_v42  ;;  %v6639_v7 = vadd.f32 %v2804_v41, %v2800_v31 }
 0xb6f   :  { %v6642_v51 = vmul.f32 0.70710677, %v6633_v45  ;;  %v6645_v16 = vmul.f32 0.70710677, %v6635_v21  ;;  %v6648_v46 = vmul.f32 0.70710677, %v6637_v57 }
 0xb70   :  { %v6651_v39 = vmul.f32 0.70710677, %v6639_v7 }
 0xb71   :  { %v2825_v56 = vand.u32 2147483647, %v6642_v51  ;;  %v2826_v55 = vand.u32 2147483647, %v6645_v16  ;;  %v2827_v26 = vand.u32 2147483647, %v6648_v46 }
 0xb72   :  { %v2828_v50 = vand.u32 2147483647, %v6651_v39  ;;  %vm2817_vm9 = vcmp.ge.f32.partialorder %v6642_v51, 0.0  ;;  %vm2818_vm10 = vcmp.ge.f32.partialorder %v6645_v16, 0.0  ;;  %vm2819_vm11 = vcmp.ge.f32.partialorder %v6648_v46, 0.0 }
 0xb73   :  { %v2829_v9 = vmul.f32 0.3275911, %v2825_v56  ;;  %v2830_v8 = vmul.f32 0.3275911, %v2826_v55  ;;  %v2831_v63 = vmul.f32 0.3275911, %v2827_v26 }
 0xb74   :  { %v2832_v58 = vmul.f32 0.3275911, %v2828_v50  ;;  %v2889_v61 = vsub.f32 0.0, %v2825_v56  ;;  %v2890_v14 = vsub.f32 0.0, %v2826_v55  ;;  %v2891_v1 = vsub.f32 0.0, %v2827_v26 }
 0xb75   :  { %v2833_v30 = vadd.f32 1.0, %v2829_v9  ;;  %v2834_v10 = vadd.f32 1.0, %v2830_v8  ;;  %v2835_v54 = vadd.f32 1.0, %v2831_v63  ;;  %v2892_v35 = vsub.f32 0.0, %v2828_v50 }
 0xb76   :  { %v2836_v48 = vadd.f32 1.0, %v2832_v58  ;;  %v2893_v37 = vmul.f32 %v2889_v61, %v2825_v56  ;;  %v2894_v15 = vmul.f32 %v2890_v14, %v2826_v55  ;;  %v2895_v49 = vmul.f32 %v2891_v1, %v2827_v26 }
 0xb77   :  { %5663 = vrcp.f32 %v2833_v30  ;;  %v2896_v40 = vmul.f32 %v2892_v35, %v2828_v50  ;;  %vm2820_vm12 = vcmp.ge.f32.partialorder %v6651_v39, 0.0  ;;  %v2822_v51 = vsel %vm2818_vm10, 1.0, %v5703_v11 }
 0xb78   :  { %5665 = vrcp.f32 %v2834_v10  ;;  %v2897_v62 = vmul.f32 1.442695, %v2893_v37  ;;  %v2899_v9 = vmul.f32 1.442695, %v2894_v15  ;;  %v2901_v58 = vmul.f32 1.442695, %v2895_v49 }
 0xb79   :  { %5667 = vrcp.f32 %v2835_v54  ;;  %v2824_v46 = vsel %vm2820_vm12, 1.0, %v5703_v11  ;;  %v2810_v39 = vmul.f32 0.5, %v6635_v21 }
 0xb7a   :  { %5669 = vrcp.f32 %v2836_v48 }
 0xb7b   :  { %5671 = vpow2.f32 %v2897_v62 }
 0xb7c   :  { %5673 = vpow2.f32 %v2899_v9  ;;  %v2823_v9 = vsel %vm2819_vm11, 1.0, %v5703_v11 }
 0xb7d   :  { %5675 = vpow2.f32 %v2901_v58 }
 0xb81   :  { %v5664_v5 = vpop.eup %5663 }
 0xb82   :  { %v5666_v17 = vpop.eup %5665  ;;  %v2841_v32 = vmul.f32 %v5664_v5, %v2833_v30 }
 0xb83   :  { %v5668_v20 = vpop.eup %5667  ;;  %v2842_v33 = vmul.f32 %v5666_v17, %v2834_v10  ;;  %v2903_v10 = vmul.f32 1.442695, %v2896_v40 }
 0xb84   :  { %v5670_v60 = vpop.eup %5669  ;;  %v2843_v34 = vmul.f32 %v5668_v20, %v2835_v54  ;;  %v2845_v13 = vsub.f32 2.0, %v2841_v32 }
 0xb85   :  { %v2844_v6 = vmul.f32 %v5670_v60, %v2836_v48  ;;  %v2846_v19 = vsub.f32 2.0, %v2842_v33  ;;  %5677 = vpow2.f32 %v2903_v10  ;;  %v2811_v10 = vmul.f32 0.5, %v6637_v57 }
 0xb86   :  { %v2847_v23 = vsub.f32 2.0, %v2843_v34  ;;  %v2849_v24 = vmul.f32 %v5664_v5, %v2845_v13 }
 0xb87   :  { %v2848_v2 = vsub.f32 2.0, %v2844_v6  ;;  %v2850_v44 = vmul.f32 %v5666_v17, %v2846_v19 }
 0xb88   :  { %v2851_v38 = vmul.f32 %v5668_v20, %v2847_v23  ;;  %v2853_v47 = vmul.f32 1.0614054, %v2849_v24 }
 0xb89   :  { %v2852_v36 = vmul.f32 %v5670_v60, %v2848_v2  ;;  %v2854_v43 = vmul.f32 1.0614054, %v2850_v44  ;;  %v5672_v2 = vpop.eup %5671 }
 0xb8a   :  { %v2855_v0 = vmul.f32 1.0614054, %v2851_v38  ;;  %v2857_v59 = vadd.f32 -1.4531521, %v2853_v47  ;;  %v5674_v15 = vpop.eup %5673 }
 0xb8b   :  { %v2856_v41 = vmul.f32 1.0614054, %v2852_v36  ;;  %v2858_v53 = vadd.f32 -1.4531521, %v2854_v43 }
 0xb8c   :  { %v2859_v42 = vadd.f32 -1.4531521, %v2855_v0  ;;  %v2861_v31 = vmul.f32 %v2857_v59, %v2849_v24  ;;  %v5676_v0 = vpop.eup %5675 }
 0xb8d   :  { %v2860_v8 = vadd.f32 -1.4531521, %v2856_v41  ;;  %v2862_v63 = vmul.f32 %v2858_v53, %v2850_v44 }
 0xb8e   :  { %v2863_v30 = vmul.f32 %v2859_v42, %v2851_v38  ;;  %v2865_v56 = vadd.f32 1.4214138, %v2861_v31 }
 0xb8f   :  { %v2864_v54 = vmul.f32 %v2860_v8, %v2852_v36  ;;  %v2866_v55 = vadd.f32 1.4214138, %v2862_v63  ;;  %v5678_v41 = vpop.eup %5677  ;;  %v2809_v8 = vmul.f32 0.5, %v6633_v45 }
 0xb90   :  { %v2867_v48 = vadd.f32 1.4214138, %v2863_v30  ;;  %v2869_v26 = vmul.f32 %v2865_v56, %v2849_v24 }
 0xb91   :  { %v2868_v5 = vadd.f32 1.4214138, %v2864_v54  ;;  %v2870_v50 = vmul.f32 %v2866_v55, %v2850_v44 }
 0xb92   :  { %v2871_v17 = vmul.f32 %v2867_v48, %v2851_v38  ;;  %v2873_v32 = vadd.f32 -0.28449672, %v2869_v26  ;;  %v2812_v48 = vmul.f32 0.5, %v6639_v7 }
 0xb93   :  { %v2872_v20 = vmul.f32 %v2868_v5, %v2852_v36  ;;  %v2874_v33 = vadd.f32 -0.28449672, %v2870_v50 }
 0xb94   :  { %v2875_v61 = vadd.f32 -0.28449672, %v2871_v17  ;;  %v2877_v60 = vmul.f32 %v2873_v32, %v2849_v24 }
 0xb95   :  { %v2876_v34 = vadd.f32 -0.28449672, %v2872_v20  ;;  %v2878_v13 = vmul.f32 %v2874_v33, %v2850_v44 }
 0xb96   :  { %v2879_v14 = vmul.f32 %v2875_v61, %v2851_v38  ;;  %v2881_v6 = vadd.f32 0.2548296, %v2877_v60 }
 0xb97   :  { %v2880_v19 = vmul.f32 %v2876_v34, %v2852_v36  ;;  %v2882_v1 = vadd.f32 0.2548296, %v2878_v13 }
 0xb98   :  { %v2883_v23 = vadd.f32 0.2548296, %v2879_v14  ;;  %v2885_v35 = vmul.f32 %v2881_v6, %v2849_v24  ;;  %v2821_v24 = vsel %vm2817_vm9, 1.0, %v5703_v11 }
 0xb99   :  { %v2884_v37 = vadd.f32 0.2548296, %v2880_v19  ;;  %v2886_v47 = vmul.f32 %v2882_v1, %v2850_v44 }
 0xb9a   :  { %v2887_v43 = vmul.f32 %v2883_v23, %v2851_v38  ;;  %v2905_v49 = vmul.f32 %v5672_v2, %v2885_v35 }
 0xb9b   :  { %v2888_v59 = vmul.f32 %v2884_v37, %v2852_v36  ;;  %v2906_v40 = vmul.f32 %v5674_v15, %v2886_v47 }
 0xb9c   :  { %v2907_v53 = vmul.f32 %v5676_v0, %v2887_v43  ;;  %v2909_v62 = vsub.f32 1.0, %v2905_v49 }
 0xb9d   :  { %v2908_v44 = vmul.f32 %v5678_v41, %v2888_v59  ;;  %v2910_v42 = vsub.f32 1.0, %v2906_v40 }
 0xb9e   :  { %v2911_v38 = vsub.f32 1.0, %v2907_v53  ;;  %v2913_v31 = vmul.f32 %v2909_v62, %v2821_v24 }
 0xb9f   :  { %v2912_v16 = vsub.f32 1.0, %v2908_v44  ;;  %v2914_v36 = vmul.f32 %v2910_v42, %v2822_v51  ;;  %v5575_v42 = vld [vmem:[%s6968_s18 + $0x10] sm:$0xff]   ;;  %v5576_v51 = vld [vmem:[%s6968_s18 + $0x18] sm:$0xff]  }
 0xba0   :  { %v2915_v63 = vmul.f32 %v2911_v38, %v2823_v9  ;;  %v2917_v58 = vadd.f32 1.0, %v2913_v31  ;;  %v5577_v38 = vld [vmem:[%s6968_s18 + $0x20] sm:$0xff]   ;;  %v5579_v31 = vld [vmem:[%s6968_s18 + $0x30] sm:$0xff]   ;;  %v5580_v9 = vld [vmem:[%s6968_s18 + $0x38] sm:$0xff]  }
 0xba1   :  { %v2916_v30 = vmul.f32 %v2912_v16, %v2824_v46  ;;  %v2918_v56 = vadd.f32 1.0, %v2914_v36  ;;  %v5581_v16 = vld [vmem:[%s6968_s18 + $0x80] sm:$0xff]   ;;  %v5582_v46 = vld [vmem:[%s6968_s18 + $0x88] sm:$0xff]  }
 0xba2   :  { %v2919_v54 = vadd.f32 1.0, %v2915_v63  ;;  %v2921_v55 = vmul.f32 %v2917_v58, %v2809_v8  ;;  %v5583_v58 = vld [vmem:[%s6968_s18 + $0x90] sm:$0xff]  }
 0xba3   :  { %v2920_v26 = vadd.f32 1.0, %v2916_v30  ;;  %v2922_v5 = vmul.f32 %v2918_v56, %v2810_v39  ;;  %v5584_v39 = vld [vmem:[%s6968_s18 + $0x98] sm:$0xff]   ;;  %v5585_v30 = vld [vmem:[%s6968_s18 + $0xa0] sm:$0xff]   ;;  %v5586_v56 = vld [vmem:[%s6968_s18 + $0xa8] sm:$0xff]  }
 0xba4   :  { %v2923_v50 = vmul.f32 %v2919_v54, %v2811_v10  ;;  %v5587_v10 = vld [vmem:[%s6968_s18 + $0xb0] sm:$0xff]   ;;  %v5588_v54 = vld [vmem:[%s6968_s18 + $0xb8] sm:$0xff]  }
 0xba5   :  { %v2924_v17 = vmul.f32 %v2920_v26, %v2812_v48  ;;  %v2925_v32 = vpack.c.bf16 %v2922_v5, %v2921_v55  ;;  %v4521_v55 = vld [vmem:[%s6969_s19] ss:$0 sm:$0xff] }
 0xba7   :  { %v2928_v45 = vshrl.u32 %v2925_v32, 16  ;;  %v2926_v20 = vpack.c.bf16 %v2924_v17, %v2923_v50  ;;  %v2931_v61 = vshll.u32 %v2925_v32, 16 }
 0xba9   :  { %v2930_v33 = vrot.slane %v2928_v45, 7  ;;  %v2935_v60 = vshrl.u32 %v2926_v20, 16  ;;  %v2938_v57 = vshll.u32 %v2926_v20, 16 }
 0xbab   :  { %v2933_v34 = vor.u32 %v2931_v61, %v2930_v33  ;;  %v2947_v21 = vsel %vm5885_vm4, %v2930_v33, 0  ;;  %v2937_v13 = vrot.slane %v2935_v60, 7 }
 0xbac   :  { %v2973_v1 = vshll.u32 %v2947_v21, 16  ;;  %v3207_v8 = vrot.slane %v2947_v21, 1 }
 0xbad   :  { %v2945_v14 = vsel %vm5885_vm4, 0, %v2933_v34  ;;  %v2940_v7 = vor.u32 %v2938_v57, %v2937_v13  ;;  %v2948_v6 = vsel %vm5885_vm4, %v2937_v13, 0 }
 0xbae   :  { %v2968_v19 = vshll.u32 %v2945_v14, 16  ;;  %v2966_v35 = vshrl.u32 %v2945_v14, 16  ;;  %v2985_v47 = vshll.u32 %v2948_v6, 16  ;;  %v3210_v43 = vrot.slane %v2948_v6, 1 }
 0xbaf   :  { %v2946_v23 = vsel %vm5885_vm4, 0, %v2940_v7  ;;  %v2975_v0 = vrot.slane %v2973_v1, 1  ;;  %v3206_v36 = vrot.slane %v2945_v14, 1 }
 0xbb0   :  { %v2970_v2 = vrot.slane %v2968_v19, 1  ;;  %v2980_v37 = vshll.u32 %v2946_v23, 16  ;;  %v3209_v15 = vrot.slane %v2946_v23, 1  ;;  %v2978_v59 = vshrl.u32 %v2946_v23, 16 }
 0xbb1   :  { %v2987_v24 = vrot.slane %v2985_v47, 1  ;;  %v3208_v63 = vsel %vm330_vm7, %v3206_v36, %v3207_v8  ;;  %v2174_v8 = vld [vmem:[%s6971_s21] sm:$0x1] }
 0xbb2   :  { %v2971_v49 = vor.u32 %v2970_v2, %v2966_v35  ;;  %v2982_v40 = vrot.slane %v2980_v37, 1  ;;  %v3211_v41 = vsel %vm330_vm7, %v3209_v15, %v3210_v43 }
 0xbb4   :  { %v2976_v53 = vsel %vm135_vm5, %v2971_v49, %v2975_v0  ;;  %v2983_v62 = vor.u32 %v2982_v40, %v2978_v59 }
 0xbb5   :  { %5215 = vmatprep.mubr.bf16.mxu0 %v2976_v53 }
 0xbb6   :  { %v2988_v44 = vsel %vm135_vm5, %v2983_v62, %v2987_v24 }
 0xbb7   :  { %5216 = vmatmul.mubr.bf16.vlgmr.msra.gmra.mrb[16].mxu0 %v2988_v44 }
 0xbb8   :  { %5220 = vmatpush3.bf16.msra.mxu0 %v6624_v52  ;;  %5235 = vmatprep.mubr.bf16.mxu0 %v2945_v14  ;;  %v5578_v52 = vld [vmem:[%s6968_s18 + $0x28] sm:$0xff]  }
 0xbb9   :  { %5221 = vmatprep.subr.bf16.mxu0 %v5574_v18 }
 0xbbc   :  { %5222 = vmatpush3.bf16.msra.mxu0 %v5574_v18 }
 0xbbd   :  { %5223 = vmatprep.subr.bf16.mxu0 %v5575_v42 }
 0xbc0   :  { %5224 = vmatpush3.bf16.msra.mxu0 %v5575_v42 }
 0xbc1   :  { %5225 = vmatprep.subr.bf16.mxu0 %v5576_v51 }
 0xbc4   :  { %5226 = vmatpush3.bf16.msra.mxu0 %v5576_v51 }
 0xbc5   :  { %5227 = vmatprep.subr.bf16.mxu0 %v5577_v38 }
 0xbc8   :  { %5228 = vmatpush3.bf16.msra.mxu0 %v5577_v38 }
 0xbc9   :  { %5229 = vmatprep.subr.bf16.mxu0 %v5578_v52 }
 0xbcc   :  { %5230 = vmatpush3.bf16.msra.mxu0 %v5578_v52 }
 0xbcd   :  { %5231 = vmatprep.subr.bf16.mxu0 %v5579_v31 }
 0xbd0   :  { %5232 = vmatpush3.bf16.msra.mxu0 %v5579_v31 }
 0xbd1   :  { %5233 = vmatprep.subr.bf16.mxu0 %v5580_v9 }
 0xbd4   :  { %5234 = vmatpush3.bf16.msra.mxu0 %v5580_v9  ;;  %v2173_v9 = vld [vmem:[%s6970_s20] sm:$0x1] }
 0xbd5   :  { %5239 = vmatprep.subr.bf16.mxu0 %v5581_v16 }
 0xbd7   :  { %5236 = vmatmul.mubr.bf16.vlgmr.msra.gmra.mrb[16].mxu0 %v2946_v23 }
 0xbd8   :  { %5240 = vmatpush3.bf16.msra.mxu0 %v5581_v16  ;;  %5255 = vmatprep.mubr.bf16.mxu0 %v3208_v63 }
 0xbd9   :  { %5241 = vmatprep.subr.bf16.mxu0 %v5582_v46 }
 0xbdc   :  { %5242 = vmatpush3.bf16.msra.mxu0 %v5582_v46 }
 0xbdd   :  { %5243 = vmatprep.subr.bf16.mxu0 %v5583_v58 }
 0xbe0   :  { %5244 = vmatpush3.bf16.msra.mxu0 %v5583_v58 }
 0xbe1   :  { %5245 = vmatprep.subr.bf16.mxu0 %v5584_v39 }
 0xbe4   :  { %5246 = vmatpush3.bf16.msra.mxu0 %v5584_v39 }
 0xbe5   :  { %5247 = vmatprep.subr.bf16.mxu0 %v5585_v30 }
 0xbe8   :  { %5248 = vmatpush3.bf16.msra.mxu0 %v5585_v30  ;;  %v5604_v30 = vld [vmem:[%s6973_s25 + $0x80] sm:$0xff]  }
 0xbe9   :  { %5249 = vmatprep.subr.bf16.mxu0 %v5586_v56 }
 0xbec   :  { %5250 = vmatpush3.bf16.msra.mxu0 %v5586_v56 }
 0xbed   :  { %5251 = vmatprep.subr.bf16.mxu0 %v5587_v10 }
 0xbf0   :  { %5252 = vmatpush3.bf16.msra.mxu0 %v5587_v10 }
 0xbf1   :  { %5253 = vmatprep.subr.bf16.mxu0 %v5588_v54 }
 0xbf4   :  { %5254 = vmatpush3.bf16.msra.mxu0 %v5588_v54 }
 0xbf7   :  { %5256 = vmatmul.mubr.bf16.vlgmr.msra.gmra.mrb[16].mxu0 %v3211_v41  ;;  %v5698_v41 = vld [vmem:[%s7000_s22] sm:$0xff] }
 0xcca   :  { %v5257_v48 = vpop.f32.mrb[16].mxu0 }
 0xccb   :  { %v3313_v26 = vpop.f32.mrb[17].mxu0  ;;  %v6732_v32 = vadd.f32 %v5257_v48, %v4521_v55 }
 0xccc   :  { %v6730_v5 = vadd.f32 %v4521_v55, %v3313_v26  ;;  %v5258_v50 = vpop.f32.mrb[18].mxu0 }
 0xccd   :  { %v3316_v17 = vpop.f32.mrb[19].mxu0  ;;  %v6738_v33 = vadd.f32 %v5258_v50, %v4521_v55  ;;  %v3353_v34 = vmul.f32 %v6732_v32, %v6732_v32 }
 0xcce   :  { %v6734_v45 = vadd.f32 %v4521_v55, %v3316_v17  ;;  %v3351_v20 = vmul.f32 %v6730_v5, %v6730_v5 }
 0xccf   :  { %v3354_v57 = vmul.f32 %v6738_v33, %v6738_v33 }
 0xcd0   :  { %v3342_v61 = vadd.f32 %v6734_v45, %v6730_v5  ;;  %v3352_v60 = vmul.f32 %v6734_v45, %v6734_v45 }
 0xcd2   :  { %v3343_v21 = vadd.f32 %v3342_v61, %v6732_v32  ;;  %v3355_v13 = vadd.f32 %v3352_v60, %v3351_v20 }
 0xcd4   :  { %v3344_v14 = vadd.f32 %v3343_v21, %v6738_v33  ;;  %v3356_v7 = vadd.f32 %v3355_v13, %v3353_v34 }
 0xcd6   :  { %v3345_v6 = vrot.slane %v3344_v14, 4  ;;  %v3357_v19 = vadd.f32 %v3356_v7, %v3354_v57 }
 0xcd8   :  { %v3346_v1 = vadd.f32 %v3345_v6, %v3344_v14  ;;  %v3358_v23 = vrot.slane %v3357_v19, 4 }
 0xcda   :  { %v3347_v35 = vrot.slane %v3346_v1, 2  ;;  %v3359_v2 = vadd.f32 %v3358_v23, %v3357_v19 }
 0xcdc   :  { %v3348_v37 = vadd.f32 %v3347_v35, %v3346_v1  ;;  %v3360_v47 = vrot.slane %v3359_v2, 2 }
 0xcde   :  { %v3349_v15 = vrot.slane %v3348_v37, 1  ;;  %v3361_v43 = vadd.f32 %v3360_v47, %v3359_v2 }
 0xce0   :  { %v3362_v49 = vrot.slane %v3361_v43, 1  ;;  %v3350_v0 = vadd.f32 %v3349_v15, %v3348_v37 }
 0xce2   :  { %v3363_v59 = vadd.f32 %v3362_v49, %v3361_v43 }
 0xce4   :  { %v3364_v40 = vsel %vm120_vm2, %v3350_v0, %v3363_v59 }
 0xce5   :  { %5292 = vmatmul.mubr.f32.vlgmr.msra.gmra.mrb[16].mxu1 %v3364_v40 }
 0xce6   :  { %5295 = vmatpush3.msra.mxu1 %v5698_v41  ;;  %5296 = vmatprep.mubr.msk.f32.mxu1 %vm5700_vm0, %v5701_v4 }
 0xce7   :  { %5299 = vmatprep.subr.bf16.mxu1 %v5701_v4 }
 0xdb8   :  { %v3431_v53 = vpop.f32.mrb[16].mxu1 }
 0xdb9   :  { %v3435_v62 = vmul.f32 0.001953125, %v3431_v53  ;;  %v5293_v24 = vpop.f32.mrb[17].mxu1 }
 0xdbb   :  { %v3436_v18 = vmul.f32 %v3435_v62, %v3435_v62 }
 0xdbd   :  { %v3438_v44 = vrot.slane %v3436_v18, 7 }
 0xdbf   :  { %v3440_v42 = vsub.f32 %v3435_v62, %v3438_v44 }
 0xdc1   :  { %v3441_v51 = vadd.f32 1e-05, %v3440_v42 }
 0xdc3   :  { %5679 = vrsqrt.f32 %v3441_v51 }
 0xdcd   :  { %v5680_v38 = vpop.eup %5679 }
 0xdce   :  { %v3450_v52 = vrot.slane %v5680_v38, %v5989_v22 }
 0xdd0   :  { %v3451_v31 = vcombine.high %v3450_v52, %v3450_v52 }
 0xdd2   :  { %v3458_v16 = vrot.slane %v3451_v31, %v5989_v22  ;;  %v5602_v22 = vld [vmem:[%s6973_s25 + $0xc0] sm:$0xff]  }
 0xdd3   :  { %4825 = vmatprep.subr.bf16.mxu0 %v5602_v22 }
 0xdd4   :  { %v3460_v36 = vmul.f32 %v3458_v16, %v2173_v9  ;;  %4826 = vmatpush3.bf16.msra.mxu0 %v5604_v30 }
 0xdd6   :  { %v3461_v46 = vmul.f32 %v3460_v36, %v3435_v62 }
 0xdd8   :  { %v3462_v63 = vsub.f32 %v2174_v8, %v3461_v46 }
 0xdda   :  { %v3467_v58 = vrot.slane %v3462_v63, %v5993_v25 }
 0xddc   :  { %v3469_v39 = vsel %vm120_vm2, %v3460_v36, %v3467_v58 }
 0xddd   :  { %5297 = vmatmul.mubr.msk.f32.vlgmr.msra.gmra.mrb[18].mxu1 %vm527_vm8, %v3469_v39 }
 0xdde   :  { %5303 = vmatprep.mubr.msk.bf16.mxu1 %vm5700_vm0, %v5701_v4 }
 0xeb0   :  { %v3539_v56 = vpop.f32.mrb[18].mxu1 }
 0xeb1   :  { %v3546_v10 = vrot.slane %v3539_v56, %v5993_v25  ;;  %v5298_v54 = vpop.f32.mrb[19].mxu1  ;;  %v3554_v55 = vrot.slane %v3539_v56, %v6230_v12 }
 0xeb3   :  { %v3547_v48 = vmul.f32 %v3546_v10, %v6730_v5  ;;  %v3548_v26 = vmul.f32 %v3546_v10, %v6734_v45  ;;  %v3549_v50 = vmul.f32 %v3546_v10, %v6732_v32  ;;  %v3550_v17 = vmul.f32 %v3546_v10, %v6738_v33 }
 0xeb5   :  { %v6782_v20 = vadd.f32 %v3554_v55, %v3547_v48  ;;  %v6784_v61 = vadd.f32 %v3554_v55, %v3548_v26  ;;  %v6786_v60 = vadd.f32 %v3554_v55, %v3549_v50  ;;  %v6788_v34 = vadd.f32 %v3554_v55, %v3550_v17 }
 0xeb7   :  { %v6791_v25 = vmul.f32 0.70710677, %v6782_v20  ;;  %v6794_v12 = vmul.f32 0.70710677, %v6784_v61  ;;  %v6797_v5 = vmul.f32 0.70710677, %v6786_v60 }
 0xeb8   :  { %v6800_v32 = vmul.f32 0.70710677, %v6788_v34 }
 0xeb9   :  { %v3575_v45 = vand.u32 2147483647, %v6791_v25  ;;  %v3576_v33 = vand.u32 2147483647, %v6794_v12  ;;  %v3577_v21 = vand.u32 2147483647, %v6797_v5 }
 0xeba   :  { %v3578_v13 = vand.u32 2147483647, %v6800_v32  ;;  %vm3567_vm2 = vcmp.ge.f32.partialorder %v6791_v25, 0.0  ;;  %vm3568_vm4 = vcmp.ge.f32.partialorder %v6794_v12, 0.0  ;;  %vm3569_vm5 = vcmp.ge.f32.partialorder %v6797_v5, 0.0 }
 0xebb   :  { %v3579_v57 = vmul.f32 0.3275911, %v3575_v45  ;;  %v3580_v14 = vmul.f32 0.3275911, %v3576_v33  ;;  %v3581_v7 = vmul.f32 0.3275911, %v3577_v21 }
 0xebc   :  { %v3582_v6 = vmul.f32 0.3275911, %v3578_v13  ;;  %v3639_v49 = vsub.f32 0.0, %v3575_v45  ;;  %v3640_v41 = vsub.f32 0.0, %v3576_v33  ;;  %v3641_v24 = vsub.f32 0.0, %v3577_v21 }
 0xebd   :  { %v3583_v19 = vadd.f32 1.0, %v3579_v57  ;;  %v3584_v1 = vadd.f32 1.0, %v3580_v14  ;;  %v3585_v23 = vadd.f32 1.0, %v3581_v7  ;;  %v3642_v42 = vsub.f32 0.0, %v3578_v13 }
 0xebe   :  { %v3586_v35 = vadd.f32 1.0, %v3582_v6  ;;  %v3643_v52 = vmul.f32 %v3639_v49, %v3575_v45  ;;  %v3644_v9 = vmul.f32 %v3640_v41, %v3576_v33  ;;  %v3645_v8 = vmul.f32 %v3641_v24, %v3577_v21 }
 0xebf   :  { %5681 = vrcp.f32 %v3583_v19  ;;  %v3646_v63 = vmul.f32 %v3642_v42, %v3578_v13  ;;  %vm3570_vm7 = vcmp.ge.f32.partialorder %v6800_v32, 0.0  ;;  %v3572_v25 = vsel %vm3568_vm4, 1.0, %v5703_v11 }
 0xec0   :  { %5683 = vrcp.f32 %v3584_v1  ;;  %v3647_v22 = vmul.f32 1.442695, %v3643_v52  ;;  %v3649_v10 = vmul.f32 1.442695, %v3644_v9  ;;  %v3651_v48 = vmul.f32 1.442695, %v3645_v8 }
 0xec1   :  { %5685 = vrcp.f32 %v3585_v23  ;;  %v3653_v17 = vmul.f32 1.442695, %v3646_v63  ;;  %v3574_v5 = vsel %vm3570_vm7, 1.0, %v5703_v11  ;;  %v3560_v32 = vmul.f32 0.5, %v6784_v61 }
 0xec2   :  { %5687 = vrcp.f32 %v3586_v35 }
 0xec3   :  { %5689 = vpow2.f32 %v3647_v22  ;;  %v3573_v22 = vsel %vm3569_vm5, 1.0, %v5703_v11 }
 0xec4   :  { %5691 = vpow2.f32 %v3649_v10 }
 0xec5   :  { %5693 = vpow2.f32 %v3651_v48  ;;  %v3561_v48 = vmul.f32 0.5, %v6786_v60 }
 0xec6   :  { %5695 = vpow2.f32 %v3653_v17  ;;  %v3562_v17 = vmul.f32 0.5, %v6788_v34 }
 0xec9   :  { %v5682_v2 = vpop.eup %5681 }
 0xeca   :  { %v5684_v37 = vpop.eup %5683  ;;  %v3591_v47 = vmul.f32 %v5682_v2, %v3583_v19 }
 0xecb   :  { %v5686_v15 = vpop.eup %5685  ;;  %v3592_v43 = vmul.f32 %v5684_v37, %v3584_v1 }
 0xecc   :  { %v5688_v0 = vpop.eup %5687  ;;  %v3593_v59 = vmul.f32 %v5686_v15, %v3585_v23  ;;  %v3595_v40 = vsub.f32 2.0, %v3591_v47 }
 0xecd   :  { %v3594_v53 = vmul.f32 %v5688_v0, %v3586_v35  ;;  %v3596_v62 = vsub.f32 2.0, %v3592_v43 }
 0xece   :  { %v3597_v18 = vsub.f32 2.0, %v3593_v59  ;;  %v3599_v44 = vmul.f32 %v5682_v2, %v3595_v40 }
 0xecf   :  { %v3598_v51 = vsub.f32 2.0, %v3594_v53  ;;  %v3600_v38 = vmul.f32 %v5684_v37, %v3596_v62  ;;  %v5690_v53 = vpop.eup %5689 }
 0xed0   :  { %v3601_v31 = vmul.f32 %v5686_v15, %v3597_v18  ;;  %v3603_v16 = vmul.f32 1.0614054, %v3599_v44  ;;  %v5692_v18 = vpop.eup %5691 }
 0xed1   :  { %v3602_v36 = vmul.f32 %v5688_v0, %v3598_v51  ;;  %v3604_v46 = vmul.f32 1.0614054, %v3600_v38  ;;  %v5694_v52 = vpop.eup %5693 }
 0xed2   :  { %v3607_v58 = vadd.f32 -1.4531521, %v3603_v16  ;;  %v3605_v39 = vmul.f32 1.0614054, %v3601_v31  ;;  %v5696_v8 = vpop.eup %5695 }
 0xed3   :  { %v3608_v30 = vadd.f32 -1.4531521, %v3604_v46  ;;  %v3606_v56 = vmul.f32 1.0614054, %v3602_v36 }
 0xed4   :  { %v3611_v54 = vmul.f32 %v3607_v58, %v3599_v44  ;;  %v3609_v55 = vadd.f32 -1.4531521, %v3605_v39 }
 0xed5   :  { %v3612_v26 = vmul.f32 %v3608_v30, %v3600_v38  ;;  %v3610_v50 = vadd.f32 -1.4531521, %v3606_v56 }
 0xed6   :  { %v3615_v45 = vadd.f32 1.4214138, %v3611_v54  ;;  %v3613_v57 = vmul.f32 %v3609_v55, %v3601_v31 }
 0xed7   :  { %v3616_v33 = vadd.f32 1.4214138, %v3612_v26  ;;  %v3614_v14 = vmul.f32 %v3610_v50, %v3602_v36 }
 0xed8   :  { %v3619_v21 = vmul.f32 %v3615_v45, %v3599_v44  ;;  %v3617_v13 = vadd.f32 1.4214138, %v3613_v57 }
 0xed9   :  { %v3620_v7 = vmul.f32 %v3616_v33, %v3600_v38  ;;  %v3618_v6 = vadd.f32 1.4214138, %v3614_v14 }
 0xeda   :  { %v3623_v19 = vadd.f32 -0.28449672, %v3619_v21  ;;  %v3621_v1 = vmul.f32 %v3617_v13, %v3601_v31 }
 0xedb   :  { %v3624_v23 = vadd.f32 -0.28449672, %v3620_v7  ;;  %v3622_v35 = vmul.f32 %v3618_v6, %v3602_v36 }
 0xedc   :  { %v3627_v2 = vmul.f32 %v3623_v19, %v3599_v44  ;;  %v3625_v37 = vadd.f32 -0.28449672, %v3621_v1  ;;  %v5592_v1 = vld [vmem:[%s6972_s24 + $0x18] sm:$0xff]  }
 0xedd   :  { %v3628_v47 = vmul.f32 %v3624_v23, %v3600_v38  ;;  %v3626_v15 = vadd.f32 -0.28449672, %v3622_v35  ;;  %v5594_v23 = vld [vmem:[%s6973_s25] sm:$0xff]   ;;  %v5595_v35 = vld [vmem:[%s6973_s25 + $0x48] sm:$0xff]  }
 0xede   :  { %v3631_v43 = vadd.f32 0.2548296, %v3627_v2  ;;  %v3629_v49 = vmul.f32 %v3625_v37, %v3601_v31  ;;  %v5597_v2 = vld [vmem:[%s6973_s25 + $0x50] sm:$0xff]  }
 0xedf   :  { %v3632_v0 = vadd.f32 0.2548296, %v3628_v47  ;;  %v3630_v59 = vmul.f32 %v3626_v15, %v3602_v36  ;;  %v5598_v37 = vld [vmem:[%s6973_s25 + $0x10] sm:$0xff]   ;;  %v5599_v47 = vld [vmem:[%s6973_s25 + $0x58] sm:$0xff]  }
 0xee0   :  { %v3635_v40 = vmul.f32 %v3631_v43, %v3599_v44  ;;  %v3633_v41 = vadd.f32 0.2548296, %v3629_v49  ;;  %v3571_v44 = vsel %vm3567_vm2, 1.0, %v5703_v11  ;;  %v5600_v15 = vld [vmem:[%s6973_s25 + $0x18] sm:$0xff]   ;;  %v5601_v43 = vld [vmem:[%s6973_s25 + $0x60] sm:$0xff]  }
 0xee1   :  { %v3636_v62 = vmul.f32 %v3632_v0, %v3600_v38  ;;  %v3634_v24 = vadd.f32 0.2548296, %v3630_v59  ;;  %v5603_v49 = vld [vmem:[%s6973_s25 + $0x20] sm:$0xff]   ;;  %v5605_v0 = vld [vmem:[%s6973_s25 + $0x68] sm:$0xff]  }
 0xee2   :  { %v3655_v42 = vmul.f32 %v5690_v53, %v3635_v40  ;;  %v3637_v51 = vmul.f32 %v3633_v41, %v3601_v31  ;;  %v5606_v59 = vld [vmem:[%s6973_s25 + $0xc8] sm:$0xff]   ;;  %v5609_v53 = vld [vmem:[%s6973_s25 + $0x70] sm:$0xff]  }
 0xee3   :  { %v3656_v9 = vmul.f32 %v5692_v18, %v3636_v62  ;;  %v3638_v16 = vmul.f32 %v3634_v24, %v3602_v36  ;;  %v3559_v36 = vmul.f32 0.5, %v6782_v20  ;;  %v5607_v40 = vld [vmem:[%s6973_s25 + $0x28] sm:$0xff]   ;;  %v5610_v62 = vld [vmem:[%s6973_s25 + $0xd0] sm:$0xff]   ;;  %4827 = vmatprep.subr.bf16.mxu0 %v5606_v59 }
 0xee4   :  { %v3659_v46 = vsub.f32 1.0, %v3655_v42  ;;  %v3657_v63 = vmul.f32 %v5694_v52, %v3637_v51  ;;  %v5608_v41 = vld [vmem:[%s6973_s25 + $0x88] sm:$0xff]   ;;  %v5611_v24 = vld [vmem:[%s6973_s25 + $0x30] sm:$0xff]   ;;  %v5613_v42 = vld [vmem:[%s6973_s25 + $0x78] sm:$0xff]  }
 0xee5   :  { %v3660_v38 = vsub.f32 1.0, %v3656_v9  ;;  %v3658_v58 = vmul.f32 %v5696_v8, %v3638_v16  ;;  %4828 = vmatpush3.bf16.msra.mxu0 %v5608_v41  ;;  %v5612_v18 = vld [vmem:[%s6973_s25 + $0x90] sm:$0xff]   ;;  %v5614_v51 = vld [vmem:[%s6973_s25 + $0xd8] sm:$0xff]   ;;  %v5617_v16 = vld [vmem:[%s6973_s25 + $0xe0] sm:$0xff]  }
 0xee6   :  { %v3663_v39 = vmul.f32 %v3659_v46, %v3571_v44  ;;  %v3661_v31 = vsub.f32 1.0, %v3657_v63  ;;  %4829 = vmatprep.subr.bf16.mxu0 %v5610_v62  ;;  %v5615_v52 = vld [vmem:[%s6973_s25 + $0x38] sm:$0xff]   ;;  %v5618_v8 = vld [vmem:[%s6973_s25 + $0xa0] sm:$0xff]   ;;  %v5619_v46 = vld [vmem:[%s6973_s25 + $0xe8] sm:$0xff]  }
 0xee7   :  { %v3664_v12 = vmul.f32 %v3660_v38, %v3572_v25  ;;  %v3662_v30 = vsub.f32 1.0, %v3658_v58  ;;  %v5616_v9 = vld [vmem:[%s6973_s25 + $0x98] sm:$0xff]   ;;  %v5620_v63 = vld [vmem:[%s6973_s25 + $0xa8] sm:$0xff]   ;;  %v5621_v44 = vld [vmem:[%s6973_s25 + $0xf0] sm:$0xff]  }
 0xee8   :  { %v3667_v56 = vadd.f32 1.0, %v3663_v39  ;;  %v3665_v10 = vmul.f32 %v3661_v31, %v3573_v22  ;;  %v5622_v38 = vld [vmem:[%s6973_s25 + $0xb0] sm:$0xff]   ;;  %v5623_v58 = vld [vmem:[%s6973_s25 + $0xf8] sm:$0xff]  }
 0xee9   :  { %v3668_v54 = vadd.f32 1.0, %v3664_v12  ;;  %v3666_v55 = vmul.f32 %v3662_v30, %v3574_v5  ;;  %4830 = vmatpush3.bf16.msra.mxu0 %v5612_v18  ;;  %v5624_v25 = vld [vmem:[%s6973_s25 + $0xb8] sm:$0xff]  }
 0xeea   :  { %v3671_v26 = vmul.f32 %v3667_v56, %v3559_v36  ;;  %v3669_v50 = vadd.f32 1.0, %v3665_v10  ;;  %4831 = vmatprep.subr.bf16.mxu0 %v5614_v51 }
 0xeeb   :  { %v3672_v45 = vmul.f32 %v3668_v54, %v3560_v32  ;;  %v3670_v57 = vadd.f32 1.0, %v3666_v55 }
 0xeec   :  { %v3675_v33 = vadd.f32 %v3671_v26, %v6469_v27  ;;  %v3673_v14 = vmul.f32 %v3669_v50, %v3561_v48  ;;  %v5589_v27 = vld [vmem:[%s6972_s24] sm:$0xff]  }
 0xeed   :  { %v3676_v20 = vadd.f32 %v3672_v45, %v6472_v29  ;;  %v3674_v11 = vmul.f32 %v3670_v57, %v3562_v17  ;;  %v5590_v29 = vld [vmem:[%s6972_s24 + $0x8] sm:$0xff]   ;;  %4832 = vmatpush3.bf16.msra.mxu0 %v5616_v9 }
 0xeee   :  { %v3679_v21 = vmul.f32 0.7072136, %v3675_v33  ;;  %v3677_v13 = vadd.f32 %v3673_v14, %v6474_v3  ;;  %v5591_v3 = vld [vmem:[%s6972_s24 + $0x10] sm:$0xff]   ;;  %4833 = vmatprep.subr.bf16.mxu0 %v5617_v16 }
 0xeef   :  { %v3680_v61 = vmul.f32 0.7072136, %v3676_v20  ;;  %v3678_v7 = vadd.f32 %v3674_v11, %v6478_v28  ;;  %v5593_v28 = vld [vmem:[%s6973_s25 + $0x40] sm:$0xff]  }
 0xef0   :  { %v3681_v60 = vmul.f32 0.7072136, %v3677_v13  ;;  %v4537_v11 = vld [vmem:[%s6974_s26] ss:$0 sm:$0xff] }
 0xef1   :  { %v3683_v6 = vpack.c.bf16 %v3680_v61, %v3679_v21  ;;  %v3682_v19 = vmul.f32 0.7072136, %v3678_v7  ;;  %4834 = vmatpush3.bf16.msra.mxu0 %v5618_v8 }
 0xef2   :  { %4835 = vmatprep.subr.bf16.mxu0 %v5619_v46 }
 0xef3   :  { %5300 = vmatpush3.bf16.msra.mxu1 %v3683_v6  ;;  %v3684_v34 = vpack.c.bf16 %v3682_v19, %v3681_v60 }
 0xef4   :  { %5301 = vmatprep.subr.bf16.mxu1 %v5701_v4 }
 0xef5   :  { %4836 = vmatpush3.bf16.msra.mxu0 %v5620_v63 }
 0xef6   :  { %4837 = vmatprep.subr.bf16.mxu0 %v5621_v44 }
 0xef7   :  { %5302 = vmatpush3.bf16.msra.mxu1 %v3684_v34 }
 0xef8   :  { %5307 = vmatprep.subr.bf16.mxu1 %v5701_v4 }
 0xef9   :  { %4838 = vmatpush3.bf16.msra.mxu0 %v5622_v38 }
 0xefa   :  { %5304 = vmatmul.mubr.msk.bf16.vlgmr.msra.gmra.mrb[20].mxu1 %vm451_vm1, %v5589_v27  ;;  %4839 = vmatprep.subr.bf16.mxu0 %v5623_v58 }
 0xefb   :  { %5308 = vmatpush3.bf16.msra.mxu1 %v3683_v6  ;;  %5311 = vmatprep.mubr.msk.bf16.mxu1 %vm5700_vm0, %v5701_v4 }
 0xefc   :  { %5309 = vmatprep.subr.bf16.mxu1 %v5701_v4 }
 0xefd   :  { %4840 = vmatpush3.bf16.msra.mxu0 %v5624_v25 }
 0xeff   :  { %5310 = vmatpush3.bf16.msra.mxu1 %v3684_v34 }
 0xf00   :  { %5315 = vmatprep.subr.bf16.mxu1 %v5701_v4 }
 0xf02   :  { %5312 = vmatmul.mubr.msk.bf16.vlgmr.msra.gmra.mrb[24].mxu1 %vm451_vm1, %v5590_v29 }
 0xf03   :  { %5316 = vmatpush3.bf16.msra.mxu1 %v3683_v6  ;;  %5319 = vmatprep.mubr.msk.bf16.mxu1 %vm5700_vm0, %v5701_v4 }
 0xf04   :  { %5317 = vmatprep.subr.bf16.mxu1 %v5701_v4 }
 0xf07   :  { %5318 = vmatpush3.bf16.msra.mxu1 %v3684_v34 }
 0xf08   :  { %5323 = vmatprep.subr.bf16.mxu1 %v5701_v4 }
 0xf0a   :  { %5320 = vmatmul.mubr.msk.bf16.vlgmr.msra.gmra.mrb[28].mxu1 %vm451_vm1, %v5591_v3 }
 0xf0b   :  { %5324 = vmatpush3.bf16.msra.mxu1 %v3683_v6  ;;  %5327 = vmatprep.mubr.msk.bf16.mxu1 %vm5700_vm0, %v5701_v4 }
 0xf0c   :  { %5325 = vmatprep.subr.bf16.mxu1 %v5701_v4  ;;  %v5596_v4 = vld [vmem:[%s6973_s25 + $0x8] sm:$0xff]  }
 0xf0f   :  { %5326 = vmatpush3.bf16.msra.mxu1 %v3684_v34 }
 0xf10   :  { %4803 = vmatprep.subr.bf16.mxu1 %v5593_v28 }
 0xf12   :  { %5328 = vmatmul.mubr.msk.bf16.vlgmr.msra.gmra.mrb[32].mxu1 %vm451_vm1, %v5592_v1 }
 0xf13   :  { %4804 = vmatpush3.bf16.msra.mxu1 %v5594_v23 }
 0xf14   :  { %4805 = vmatprep.subr.bf16.mxu1 %v5595_v35 }
 0xf17   :  { %4806 = vmatpush3.bf16.msra.mxu1 %v5596_v4 }
 0xf18   :  { %4807 = vmatprep.subr.bf16.mxu1 %v5597_v2 }
 0xf1b   :  { %4808 = vmatpush3.bf16.msra.mxu1 %v5598_v37 }
 0xf1c   :  { %4809 = vmatprep.subr.bf16.mxu1 %v5599_v47 }
 0xf1f   :  { %4810 = vmatpush3.bf16.msra.mxu1 %v5600_v15 }
 0xf20   :  { %4811 = vmatprep.subr.bf16.mxu1 %v5601_v43 }
 0xf23   :  { %4812 = vmatpush3.bf16.msra.mxu1 %v5603_v49 }
 0xf24   :  { %4813 = vmatprep.subr.bf16.mxu1 %v5605_v0 }
 0xf27   :  { %4814 = vmatpush3.bf16.msra.mxu1 %v5607_v40 }
 0xf28   :  { %4815 = vmatprep.subr.bf16.mxu1 %v5609_v53 }
 0xf2b   :  { %4816 = vmatpush3.bf16.msra.mxu1 %v5611_v24 }
 0xf2c   :  { %4817 = vmatprep.subr.bf16.mxu1 %v5613_v42 }
 0xf2f   :  { %4818 = vmatpush3.bf16.msra.mxu1 %v5615_v52 }
 0xfcd   :  { %v3729_v39 = vpop.f32.mrb[20].mxu1 }
 0xfce   :  { %v5305_v31 = vpop.f32.mrb[21].mxu1 }
 0xfcf   :  { %v3732_v22 = vpop.f32.mrb[22].mxu1 }
 0xfd0   :  { %v3736_v12 = vpack.c.bf16 %v3732_v22, %v3729_v39  ;;  %v5306_v30 = vpop.f32.mrb[23].mxu1 }
 0xfd5   :  { %v3782_v36 = vpop.f32.mrb[24].mxu1 }
 0xfd6   :  { %v5313_v5 = vpop.f32.mrb[25].mxu1 }
 0xfd7   :  { %v3785_v56 = vpop.f32.mrb[26].mxu1 }
 0xfd8   :  { %v3789_v10 = vpack.c.bf16 %v3785_v56, %v3782_v36  ;;  %v5314_v32 = vpop.f32.mrb[27].mxu1 }
 0xfda   :  { %4191 = vmatprep.mubr.bf16.mxu1 %v3789_v10 }
 0xfdb   :  { %4192 = vmatmul.mubr.bf16.vlgmr.msra.gmra.mrb[36].mxu1 %v3736_v12 }
 0xfdd   :  { %v3835_v54 = vpop.f32.mrb[28].mxu1 }
 0xfde   :  { %v5321_v55 = vpop.f32.mrb[29].mxu1 }
 0xfdf   :  { %v3838_v48 = vpop.f32.mrb[30].mxu1 }
 0xfe0   :  { %v3842_v26 = vpack.c.bf16 %v3838_v48, %v3835_v54  ;;  %v5322_v50 = vpop.f32.mrb[31].mxu1 }
 0xfe5   :  { %v3888_v17 = vpop.f32.mrb[32].mxu1 }
 0xfe6   :  { %v5329_v45 = vpop.f32.mrb[33].mxu1 }
 0xfe7   :  { %v3891_v57 = vpop.f32.mrb[34].mxu1 }
 0xfe8   :  { %v3895_v33 = vpack.c.bf16 %v3891_v57, %v3888_v17  ;;  %v5330_v14 = vpop.f32.mrb[35].mxu1 }
 0xfea   :  { %4232 = vmatprep.mubr.bf16.mxu0 %v3895_v33 }
 0xfeb   :  { %4233 = vmatmul.mubr.bf16.vlgmr.msra.gmra.mrb[20].mxu0 %v3842_v26 }
0x10ae   :  { %v4819_v20 = vpop.f32.mrb[36].mxu1 }
0x10af   :  { %v4820_v21 = vpop.f32.mrb[37].mxu1 }
0x10b0   :  { %v4821_v13 = vadd.f32 %v4820_v21, %v4819_v20  ;;  %v4822_v61 = vpop.f32.mrb[38].mxu1 }
0x10b1   :  { %v4823_v7 = vpop.f32.mrb[39].mxu1 }
0x10b2   :  { %v4194_v6 = vadd.f32 %v4821_v13, %v4537_v11  ;;  %v4824_v60 = vadd.f32 %v4823_v7, %v4822_v61 }
0x10b4   :  { %v4197_v28 = vadd.f32 %v4824_v60, %v4537_v11 }
0x10be   :  { %v4841_v19 = vpop.f32.mrb[20].mxu0 }
0x10bf   :  { %v4842_v34 = vpop.f32.mrb[21].mxu0 }
0x10c0   :  { %v4843_v27 = vadd.f32 %v4842_v34, %v4841_v19  ;;  %v4844_v29 = vpop.f32.mrb[22].mxu0 }
0x10c1   :  { %v4845_v3 = vpop.f32.mrb[23].mxu0 }
0x10c2   :  { %v4235_v1 = vadd.f32 %v4843_v27, %v4194_v6  ;;  %v4846_v23 = vadd.f32 %v4845_v3, %v4844_v29 }
0x10c4   :  { %v4238_v35 = vadd.f32 %v4846_v23, %v4197_v28 }
0x10c6   :  { %4242 = vrot.lane.b32.xlu0 %v4238_v35, %s5704_s16 }
0x1138   :  { %v4243_v4 = vpop.permute.xlu0 %4242 }
0x1139   :  { %v4245_v2 = vsel %vm193_vm6, %v4235_v1, %v4243_v4 }
0x113a   :  { %4246 = vst [vmem:[%s6975_s27] sm:$0xff] %v4245_v2 }

</bundles_post_ra>
